<compile_context>
chip_gen: v6e
topology: v6e:2x2x1
jax: 0.10.0
libtpu: 0.0.40
codegen_flags: <defaults>
</compile_context>

<pallas_src>
import math
import functools

import jax
import jax.numpy as jnp
from jax.experimental import pallas as pl
from jax.experimental.pallas import tpu as pltpu

_LN_EPS = 1e-6
_HEAD_PAD = 128  # lane-dense padded width of the fused head output


# --------------------------------------------------------------------------
# small helpers
# --------------------------------------------------------------------------

def _pick_tile(m, target=256, mult=8):
    """Largest divisor of m that is a multiple of `mult` and <= target, else m."""
    for t in range(min(target, m), mult - 1, -1):
        if m % t == 0 and t % mult == 0:
            return t
    return m


def _pick_head_tile(lz, lx, target=256, mult=8):
    """Tile that divides Lx and also divides the Lz offset (for BlockSpec offsetting)."""
    for t in range(min(target, lx), mult - 1, -1):
        if lx % t == 0 and lz % t == 0 and t % mult == 0:
            return t
    return None


def _const_spec(arr):
    """Full-array block with a constant index map (weight stays resident)."""
    nd = arr.ndim
    return pl.BlockSpec(arr.shape, lambda *g, _nd=nd: (0,) * _nd)


def _layernorm_f32(x, gamma, beta, eps):
    """x:(M,D) f32, gamma/beta:(1,D) f32 -> (M,D) f32."""
    mu = jnp.mean(x, axis=-1, keepdims=True)
    xc = x - mu
    var = jnp.mean(xc * xc, axis=-1, keepdims=True)
    return xc * jax.lax.rsqrt(var + eps) * gamma + beta


# --------------------------------------------------------------------------
# Pallas kernels
# --------------------------------------------------------------------------

def _patch_embed_kernel(p_ref, w_ref, b_ref, pos_ref, o_ref):
    """conv-as-matmul patch embedding + bias + positional embedding.

    p_ref:(1,Lp,Kpad) f32 (zero-padded K), w_ref:(Kpad,D) bf16,
    b_ref:(1,D) f32, pos_ref:(1,Lp,D) f32 -> o:(1,Lp,D) f32.
    """
    y = jnp.dot(p_ref[0].astype(jnp.bfloat16), w_ref[...],
                preferred_element_type=jnp.float32)
    o_ref[0] = (y + b_ref[...] + pos_ref[0]).astype(o_ref.dtype)


def _block_kernel(x_ref,
                  g1_ref, b1_ref,
                  wq_ref, bq_ref, wk_ref, bk_ref, wv_ref, bv_ref,
                  wproj_ref, bproj_ref, ls1_ref,
                  g2_ref, b2_ref, wfc1_ref, bfc1_ref, wfc2_ref, bfc2_ref, ls2_ref,
                  o_ref,
                  ln1_scr, acc_scr,
                  *, num_heads, eps):
    """Whole DINOv2 block for one batch element, fully fused in VMEM.

    x_ref:(1,L,D) f32.  Per-head weights: wq/wk/wv:(nh,D,Dh) bf16,
    bq/bk/bv:(nh,1,Dh) f32, wproj:(nh,Dh,D) bf16.  MLP weights full blocks.
    Scratch: ln1_scr:(L,D) bf16, acc_scr:(L,D) f32 (out-proj accumulator).
    """
    x = x_ref[0].astype(jnp.float32)                                  # (L, D)
    ln1_scr[...] = _layernorm_f32(x, g1_ref[...], b1_ref[...], eps
                                  ).astype(jnp.bfloat16)
    acc_scr[...] = jnp.zeros_like(acc_scr)

    def head_body(h, carry):
        hb = ln1_scr[...]                                             # (L, D) bf16
        # 1/sqrt(Dh) already folded into wq/bq at parameter-prep time.
        q = (jnp.dot(hb, wq_ref[h], preferred_element_type=jnp.float32)
             + bq_ref[h]).astype(jnp.bfloat16)                        # (L, Dh)
        k = (jnp.dot(hb, wk_ref[h], preferred_element_type=jnp.float32)
             + bk_ref[h]).astype(jnp.bfloat16)
        v = (jnp.dot(hb, wv_ref[h], preferred_element_type=jnp.float32)
             + bv_ref[h]).astype(jnp.bfloat16)
        # contract last axes of q and k directly (no explicit transpose).
        s = jax.lax.dot_general(q, k, (((1,), (1,)), ((), ())),
                                preferred_element_type=jnp.float32)   # (L, L)
        m = jnp.max(s, axis=-1, keepdims=True)
        p = jnp.exp(s - m)
        p = p / jnp.sum(p, axis=-1, keepdims=True)                    # exact divide
        o = jnp.dot(p.astype(jnp.bfloat16), v,
                    preferred_element_type=jnp.float32)               # (L, Dh)
        # fold this head straight into the out-projection accumulator.
        acc_scr[...] += jnp.dot(o.astype(jnp.bfloat16), wproj_ref[h],
                                preferred_element_type=jnp.float32)
        return carry

    jax.lax.fori_loop(0, num_heads, head_body, 0)

    # attention half residual (re-read x_ref so it is not kept live across the loop)
    x1 = x_ref[0].astype(jnp.float32) + ls1_ref[...] * (acc_scr[...] + bproj_ref[...])

    # MLP half, still in VMEM.
    h2 = _layernorm_f32(x1, g2_ref[...], b2_ref[...], eps).astype(jnp.bfloat16)
    m1 = jnp.dot(h2, wfc1_ref[...], preferred_element_type=jnp.float32) + bfc1_ref[...]
    # TODO(synk): PyTorch nn.GELU is exact (erf); tanh approximation used here
    # for guaranteed Mosaic lowering (~1e-3 deviation).
    m1 = jax.nn.gelu(m1, approximate=True).astype(jnp.bfloat16)
    m2 = jnp.dot(m1, wfc2_ref[...], preferred_element_type=jnp.float32) + bfc2_ref[...]
    o_ref[0] = (x1 + ls2_ref[...] * m2).astype(o_ref.dtype)


def _head_kernel(x_ref, ng_ref, nb_ref, cw1_ref, cb1_ref, rw1_ref, rb1_ref,
                 w2_ref, b2_ref, o_ref, *, eps):
    """Final LayerNorm + fused cls/reg MLPs with a single stacked second-layer
    matmul and a lane-dense (128-wide) padded output."""
    h = _layernorm_f32(x_ref[0].astype(jnp.float32), ng_ref[...], nb_ref[...], eps)
    hb = h.astype(jnp.bfloat16)
    ch = jax.nn.gelu(jnp.dot(hb, cw1_ref[...], preferred_element_type=jnp.float32)
                     + cb1_ref[...], approximate=True)
    rh = jax.nn.gelu(jnp.dot(hb, rw1_ref[...], preferred_element_type=jnp.float32)
                     + rb1_ref[...], approximate=True)
    hcat = jnp.concatenate([ch, rh], axis=-1).astype(jnp.bfloat16)    # (TM, 2D)
    y = jnp.dot(hcat, w2_ref[...], preferred_element_type=jnp.float32) + b2_ref[...]
    o_ref[0] = y.astype(o_ref.dtype)


# --------------------------------------------------------------------------
# Pallas wrappers
# --------------------------------------------------------------------------

def patch_embed_pos(img, w_pad, b, pos, patch):
    """Conv2d(kernel=stride=patch) as matmul (K zero-padded to 128), fused with
    bias + positional embedding add."""
    B, C, H, W = img.shape
    Hp, Wp = H // patch, W // patch
    Lp, Cpp = Hp * Wp, C * patch * patch
    Kpad, D = w_pad.shape
    pt = img.reshape(B, C, Hp, patch, Wp, patch)
    pt = pt.transpose(0, 2, 4, 1, 3, 5).reshape(B, Lp, Cpp)
    if Kpad != Cpp:
        pt = jnp.pad(pt, ((0, 0), (0, 0), (0, Kpad - Cpp)))
    return pl.pallas_call(
        _patch_embed_kernel,
        out_shape=jax.ShapeDtypeStruct((B, Lp, D), jnp.float32),
        grid=(B,),
        in_specs=[
            pl.BlockSpec((1, Lp, Kpad), lambda i: (i, 0, 0)),
            _const_spec(w_pad),
            _const_spec(b),
            _const_spec(pos),
        ],
        out_specs=pl.BlockSpec((1, Lp, D), lambda i: (i, 0, 0)),
        compiler_params=pltpu.CompilerParams(dimension_semantics=("parallel",)),
    )(pt, w_pad, b, pos)


def fused_block(x3d, p, *, num_heads):
    """One transformer block, one pallas_call, grid over the batch axis."""
    B, L, D = x3d.shape
    operands = (x3d,
                p["ln1_g"], p["ln1_b"],
                p["w_q"], p["b_q"], p["w_k"], p["b_k"], p["w_v"], p["b_v"],
                p["w_proj"], p["b_proj"], p["ls1"],
                p["ln2_g"], p["ln2_b"],
                p["w_fc1"], p["b_fc1"], p["w_fc2"], p["b_fc2"], p["ls2"])
    in_specs = [pl.BlockSpec((1, L, D), lambda b: (b, 0, 0))]
    in_specs += [_const_spec(a) for a in operands[1:]]
    # TODO(synk): at real DINOv2 sizes mark the constant-index weight specs
    # pipeline_mode=pl.Buffered(1) (no double buffer) and K-tile the MLP.
    return pl.pallas_call(
        functools.partial(_block_kernel, num_heads=num_heads, eps=_LN_EPS),
        out_shape=jax.ShapeDtypeStruct((B, L, D), jnp.float32),
        grid=(B,),
        in_specs=in_specs,
        out_specs=pl.BlockSpec((1, L, D), lambda b: (b, 0, 0)),
        scratch_shapes=[pltpu.VMEM((L, D), jnp.bfloat16),   # LN1 output
                        pltpu.VMEM((L, D), jnp.float32)],   # out-proj accumulator
        compiler_params=pltpu.CompilerParams(
            dimension_semantics=("parallel",),
            vmem_limit_bytes=48 * 1024 * 1024),
    )(*operands)


def fused_head(h3d, hp, norm_g, norm_b, Lz, Lx):
    """Final norm + head on the search tokens; the [:, Lz:, :] slice is taken
    by the input BlockSpec (token-axis block offset)."""
    B, L, D = h3d.shape
    NPAD = hp["w2"].shape[1]
    TM = _pick_head_tile(Lz, Lx)
    if TM is None:
        # TODO(synk): fallback when Lz is not tile-compatible — slice in JAX.
        h3d = h3d[:, Lz:, :]
        off = 0
        TM = _pick_tile(Lx)
    else:
        off = Lz // TM

    operands = (h3d, norm_g, norm_b,
                hp["cls_w1"], hp["cls_b1"], hp["reg_w1"], hp["reg_b1"],
                hp["w2"], hp["b2"])
    in_specs = [pl.BlockSpec((1, TM, D), lambda b, j: (b, off + j, 0))]
    in_specs += [_const_spec(a) for a in operands[1:]]
    return pl.pallas_call(
        functools.partial(_head_kernel, eps=_LN_EPS),
        out_shape=jax.ShapeDtypeStruct((B, Lx, NPAD), jnp.float32),
        grid=(B, Lx // TM),
        in_specs=in_specs,
        out_specs=pl.BlockSpec((1, TM, NPAD), lambda b, j: (b, j, 0)),
        compiler_params=pltpu.CompilerParams(
            dimension_semantics=("parallel", "parallel")),
    )(*operands)


# --------------------------------------------------------------------------
# Model glue
# --------------------------------------------------------------------------

def make_forward(cfg):
    patch = cfg["patch_size"]
    nh = cfg["num_heads"]
    Lz = cfg["z_size"][0] * cfg["z_size"][1]
    Lx = cfg["x_size"][0] * cfg["x_size"][1]

    def forward(params, z, x, z_feat_mask):
        # z_feat_mask accepted but unused — matches the PyTorch baseline's _z_feat.
        z_feat = patch_embed_pos(z, params["patch_w"], params["patch_b"],
                                 params["z_pos"], patch)          # (B, Lz, D)
        x_feat = patch_embed_pos(x, params["patch_w"], params["patch_b"],
                                 params["x_pos"], patch)          # (B, Lx, D)
        h = jnp.concatenate([z_feat, x_feat], axis=1)             # (B, L, D)
        for blk in params["blocks"]:
            h = fused_block(h, blk, num_heads=nh)                 # (B, L, D) f32
        # per-token LayerNorm -> slicing search tokens before the final norm
        # equals norm-then-slice; norm + head fused, slice via BlockSpec offset.
        out = fused_head(h, params["head"], params["norm_g"], params["norm_b"],
                         Lz, Lx)                                  # (B, Lx, 128)
        B = out.shape[0]
        # TODO(synk): exact LoRAT MlpAnchorFreeHead internals unavailable here;
        # stand-in: two (Linear-GELU-Linear) token MLPs -> score logits + sigmoid boxes.
        score_map = out[:, :, 0].reshape(B, cfg["x_size"][0], cfg["x_size"][1])
        boxes = jax.nn.sigmoid(out[:, :, 1:5]).reshape(
            B, cfg["x_size"][0], cfg["x_size"][1], 4)
        return score_map, boxes

    return jax.jit(forward)


# --------------------------------------------------------------------------
# Deterministic parameter init (module layout) + kernel-layout preparation
# --------------------------------------------------------------------------

def init_raw_params(key, cfg):
    """Synthetic parameters in 'module layout' (as the PyTorch module stores them)."""
    D = cfg["embed_dim"]
    C = cfg["in_chans"]
    p = cfg["patch_size"]
    depth = cfg["depth"]
    hidden = D * cfg["mlp_ratio"]
    Lz = cfg["z_size"][0] * cfg["z_size"][1]
    Lx = cfg["x_size"][0] * cfg["x_size"][1]

    keys = iter(jax.random.split(key, 32 + 16 * depth))

    def nrm(shape, scale=0.02):
        return scale * jax.random.normal(next(keys), shape, jnp.float32)

    raw = {
        "patch_w": nrm((C * p * p, D)),
        "patch_b": nrm((D,)),
        "z_pos": nrm((1, Lz, D)),
        "x_pos": nrm((1, Lx, D)),
        "norm_g": jnp.ones((D,), jnp.float32),
        "norm_b": jnp.zeros((D,), jnp.float32),
        "blocks": [],
    }
    for _ in range(depth):
        raw["blocks"].append(dict(
            ln1_g=jnp.ones((D,), jnp.float32), ln1_b=jnp.zeros((D,), jnp.float32),
            w_qkv=nrm((D, 3 * D)), b_qkv=nrm((3 * D,)),
            w_proj=nrm((D, D)), b_proj=nrm((D,)),
            ls1=jnp.full((D,), 1e-5, jnp.float32),
            ln2_g=jnp.ones((D,), jnp.float32), ln2_b=jnp.zeros((D,), jnp.float32),
            w_fc1=nrm((D, hidden)), b_fc1=nrm((hidden,)),
            w_fc2=nrm((hidden, D)), b_fc2=nrm((D,)),
            ls2=jnp.full((D,), 1e-5, jnp.float32),
        ))
    raw["head"] = dict(
        cls_w1=nrm((D, D)), cls_b1=jnp.zeros((D,), jnp.float32),
        cls_w2=nrm((D, 1)), cls_b2=jnp.zeros((1,), jnp.float32),
        reg_w1=nrm((D, D)), reg_b1=jnp.zeros((D,), jnp.float32),
        reg_w2=nrm((D, 4)), reg_b2=jnp.zeros((4,), jnp.float32),
    )
    return raw


def prepare_params(raw, cfg):
    """Map module-layout weights to the kernel layout:
       * attention scale folded into W_q / b_q,
       * per-head leading axis for Q/K/V/proj weights,
       * patch-embed K zero-padded to a multiple of 128,
       * head second-layer weights stacked + padded to a 128-wide lane-dense slab.
    """
    D = cfg["embed_dim"]
    nh = cfg["num_heads"]
    Dh = D // nh
    scale = 1.0 / math.sqrt(Dh)
    bf = jnp.bfloat16

    Cpp = raw["patch_w"].shape[0]
    Kpad = ((Cpp + 127) // 128) * 128
    patch_w_pad = jnp.zeros((Kpad, D), jnp.float32).at[:Cpp].set(raw["patch_w"]).astype(bf)

    def split_w(w):   # (D, D) -> (nh, D, Dh)
        return w.reshape(D, nh, Dh).transpose(1, 0, 2)

    def split_b(b):   # (D,) -> (nh, 1, Dh)
        return b.reshape(nh, 1, Dh)

    params = {
        "patch_w": patch_w_pad,
        "patch_b": raw["patch_b"].reshape(1, D),
        "z_pos": raw["z_pos"],
        "x_pos": raw["x_pos"],
        "norm_g": raw["norm_g"].reshape(1, D),
        "norm_b": raw["norm_b"].reshape(1, D),
        "blocks": [],
    }
    for blk in raw["blocks"]:
        w_qkv, b_qkv = blk["w_qkv"], blk["b_qkv"]
        w_q, w_k, w_v = w_qkv[:, :D], w_qkv[:, D:2 * D], w_qkv[:, 2 * D:]
        b_q, b_k, b_v = b_qkv[:D], b_qkv[D:2 * D], b_qkv[2 * D:]
        params["blocks"].append(dict(
            ln1_g=blk["ln1_g"].reshape(1, D), ln1_b=blk["ln1_b"].reshape(1, D),
            w_q=split_w(w_q * scale).astype(bf), b_q=split_b(b_q * scale),
            w_k=split_w(w_k).astype(bf), b_k=split_b(b_k),
            w_v=split_w(w_v).astype(bf), b_v=split_b(b_v),
            w_proj=blk["w_proj"].reshape(nh, Dh, D).astype(bf),
            b_proj=blk["b_proj"].reshape(1, D),
            ls1=blk["ls1"].reshape(1, D),
            ln2_g=blk["ln2_g"].reshape(1, D), ln2_b=blk["ln2_b"].reshape(1, D),
            w_fc1=blk["w_fc1"].astype(bf), b_fc1=blk["b_fc1"].reshape(1, -1),
            w_fc2=blk["w_fc2"].astype(bf), b_fc2=blk["b_fc2"].reshape(1, D),
            ls2=blk["ls2"].reshape(1, D),
        ))

    hd = raw["head"]
    # rows 0:D multiply the cls branch, D:2D the reg branch (matches in-kernel concat);
    # column 0 = cls score, columns 1:5 = reg box, rest zero padding.
    w2 = jnp.zeros((2 * D, _HEAD_PAD), jnp.float32)
    w2 = w2.at[:D, 0:1].set(hd["cls_w2"]).at[D:, 1:5].set(hd["reg_w2"])
    b2 = jnp.zeros((1, _HEAD_PAD), jnp.float32)
    b2 = b2.at[0, 0].set(hd["cls_b2"][0]).at[0, 1:5].set(hd["reg_b2"])
    params["head"] = dict(
        cls_w1=hd["cls_w1"].astype(bf), cls_b1=hd["cls_b1"].reshape(1, D),
        reg_w1=hd["reg_w1"].astype(bf), reg_b1=hd["reg_b1"].reshape(1, D),
        w2=w2.astype(bf), b2=b2,
    )
    return params


# --------------------------------------------------------------------------
# Main
# --------------------------------------------------------------------------

if __name__ == "__main__":
    cfg = dict(
        embed_dim=128,     # vit.embed_dim (lane-dense)
        num_heads=2,       # head_dim = 64
        depth=2,           # len(vit.blocks)
        mlp_ratio=4,
        in_chans=3,
        patch_size=4,
        z_size=(4, 4),     # template_feat_size      -> 16 template tokens
        x_size=(8, 8),     # search_region_feat_size -> 64 search tokens
    )
    B = 2

    key = jax.random.PRNGKey(0)
    pkey, zkey, xkey = jax.random.split(key, 3)
    raw_params = init_raw_params(pkey, cfg)
    params = prepare_params(raw_params, cfg)

    Hz = cfg["z_size"][0] * cfg["patch_size"]
    Wz = cfg["z_size"][1] * cfg["patch_size"]
    Hx = cfg["x_size"][0] * cfg["patch_size"]
    Wx = cfg["x_size"][1] * cfg["patch_size"]

    z = jax.random.normal(zkey, (B, 3, Hz, Wz), jnp.float32)
    x = jax.random.normal(xkey, (B, 3, Hx, Wx), jnp.float32)
    z_feat_mask = jnp.ones((B, cfg["z_size"][0] * cfg["z_size"][1]), dtype=jnp.bool_)

    forward = make_forward(cfg)
    score_map, boxes = forward(params, z, x, z_feat_mask)
    jax.block_until_ready((score_map, boxes))

    assert score_map.shape == (B, cfg["x_size"][0], cfg["x_size"][1])
    assert boxes.shape == (B, cfg["x_size"][0], cfg["x_size"][1], 4)
    assert bool(jnp.all(jnp.isfinite(score_map))) and bool(jnp.all(jnp.isfinite(boxes)))
    print("KERNEL_OK")
</pallas_src>

<mosaic_0001>
module attributes {stable_mosaic.version = 11 : i64} {
  func.func @_patch_embed_kernel(%arg0: i32, %arg1: memref<1x64x128xf32, #tpu.memory_space<vmem>>, %arg2: memref<128x128xbf16, #tpu.memory_space<vmem>>, %arg3: memref<1x128xf32, #tpu.memory_space<vmem>>, %arg4: memref<1x64x128xf32, #tpu.memory_space<vmem>>, %arg5: memref<1x64x128xf32, #tpu.memory_space<vmem>>) attributes {dimension_semantics = [#tpu.dimension_semantics<parallel>], iteration_bounds = array<i64: 2>, scalar_prefetch = 0 : i64, scratch_operands = 0 : i64, tpu.core_type = #tpu.core_type<tc>, window_params = [{transform_indices = @transform_0, window_bounds = array<i64: 1, 64, 128>}, {pipeline_mode = #tpu.pipeline_mode<synchronous>, transform_indices = @transform_1, window_bounds = array<i64: 128, 128>}, {pipeline_mode = #tpu.pipeline_mode<synchronous>, transform_indices = @transform_2, window_bounds = array<i64: 1, 128>}, {pipeline_mode = #tpu.pipeline_mode<synchronous>, transform_indices = @transform_3, window_bounds = array<i64: 1, 64, 128>}, {transform_indices = @transform_4, window_bounds = array<i64: 1, 64, 128>}]} {
    %c0 = arith.constant 0 : index
    %c0_0 = arith.constant 0 : index
    %c0_1 = arith.constant 0 : index
    %0 = vector.load %arg1[%c0, %c0_0, %c0_1] : memref<1x64x128xf32, #tpu.memory_space<vmem>>, vector<1x64x128xf32>
    %1 = vector.shape_cast %0 : vector<1x64x128xf32> to vector<64x128xf32>
    %2 = arith.truncf %1 : vector<64x128xf32> to vector<64x128xbf16>
    %c0_2 = arith.constant 0 : index
    %c0_3 = arith.constant 0 : index
    %3 = vector.load %arg2[%c0_2, %c0_3] : memref<128x128xbf16, #tpu.memory_space<vmem>>, vector<128x128xbf16>
    %cst = arith.constant dense<0.000000e+00> : vector<64x128xf32>
    %4 = tpu.matmul %2, %3, %cst {dimension_numbers = #tpu.dot_dimension_numbers<[1], [0], [0], [1], [0, 0, 1, 1], [], []>} : vector<64x128xbf16>, vector<128x128xbf16>, vector<64x128xf32> -> vector<64x128xf32>
    %c0_4 = arith.constant 0 : index
    %c0_5 = arith.constant 0 : index
    %5 = vector.load %arg3[%c0_4, %c0_5] : memref<1x128xf32, #tpu.memory_space<vmem>>, vector<1x128xf32>
    %6 = vector.broadcast %5 : vector<1x128xf32> to vector<64x128xf32>
    %7 = arith.addf %4, %6 : vector<64x128xf32>
    %c0_6 = arith.constant 0 : index
    %c0_7 = arith.constant 0 : index
    %c0_8 = arith.constant 0 : index
    %8 = vector.load %arg4[%c0_6, %c0_7, %c0_8] : memref<1x64x128xf32, #tpu.memory_space<vmem>>, vector<1x64x128xf32>
    %9 = vector.shape_cast %8 : vector<1x64x128xf32> to vector<64x128xf32>
    %10 = arith.addf %7, %9 : vector<64x128xf32>
    %c0_9 = arith.constant 0 : index
    %c0_10 = arith.constant 0 : index
    %c0_11 = arith.constant 0 : index
    %11 = vector.load %arg5[%c0_9, %c0_10, %c0_11] : memref<1x64x128xf32, #tpu.memory_space<vmem>>, vector<1x64x128xf32>
    %12 = vector.shape_cast %11 : vector<1x64x128xf32> to vector<64x128xf32>
    %13 = vector.shape_cast %10 : vector<64x128xf32> to vector<1x64x128xf32>
    tpu.vector_store %arg5[%c0_9, %c0_10, %c0_11], %13 {strides = array<i32>} : memref<1x64x128xf32, #tpu.memory_space<vmem>>, vector<1x64x128xf32>,
    return
  }
  func.func @transform_0(%arg0: i32) -> (i32, i32, i32) {
    %c0_i32 = arith.constant 0 : i32
    %c0_i32_0 = arith.constant 0 : i32
    %c0_i32_1 = arith.constant 0 : i32
    return %arg0, %c0_i32, %c0_i32_0 : i32, i32, i32
  }
  func.func @transform_1(%arg0: i32) -> (i32, i32) {
    %c0_i32 = arith.constant 0 : i32
    %c0_i32_0 = arith.constant 0 : i32
    %c0_i32_1 = arith.constant 0 : i32
    return %c0_i32, %c0_i32_0 : i32, i32
  }
  func.func @transform_2(%arg0: i32) -> (i32, i32) {
    %c0_i32 = arith.constant 0 : i32
    %c0_i32_0 = arith.constant 0 : i32
    %c0_i32_1 = arith.constant 0 : i32
    return %c0_i32, %c0_i32_0 : i32, i32
  }
  func.func @transform_3(%arg0: i32) -> (i32, i32, i32) {
    %c0_i32 = arith.constant 0 : i32
    %c0_i32_0 = arith.constant 0 : i32
    %c0_i32_1 = arith.constant 0 : i32
    %c0_i32_2 = arith.constant 0 : i32
    return %c0_i32, %c0_i32_0, %c0_i32_1 : i32, i32, i32
  }
  func.func @transform_4(%arg0: i32) -> (i32, i32, i32) {
    %c0_i32 = arith.constant 0 : i32
    %c0_i32_0 = arith.constant 0 : i32
    %c0_i32_1 = arith.constant 0 : i32
    return %arg0, %c0_i32, %c0_i32_0 : i32, i32, i32
  }
}

module attributes {stable_mosaic.version = 11 : i64} {
  func.func @_patch_embed_kernel(%arg0: i32, %arg1: memref<1x16x128xf32, #tpu.memory_space<vmem>>, %arg2: memref<128x128xbf16, #tpu.memory_space<vmem>>, %arg3: memref<1x128xf32, #tpu.memory_space<vmem>>, %arg4: memref<1x16x128xf32, #tpu.memory_space<vmem>>, %arg5: memref<1x16x128xf32, #tpu.memory_space<vmem>>) attributes {dimension_semantics = [#tpu.dimension_semantics<parallel>], iteration_bounds = array<i64: 2>, scalar_prefetch = 0 : i64, scratch_operands = 0 : i64, tpu.core_type = #tpu.core_type<tc>, window_params = [{transform_indices = @transform_0, window_bounds = array<i64: 1, 16, 128>}, {pipeline_mode = #tpu.pipeline_mode<synchronous>, transform_indices = @transform_1, window_bounds = array<i64: 128, 128>}, {pipeline_mode = #tpu.pipeline_mode<synchronous>, transform_indices = @transform_2, window_bounds = array<i64: 1, 128>}, {pipeline_mode = #tpu.pipeline_mode<synchronous>, transform_indices = @transform_3, window_bounds = array<i64: 1, 16, 128>}, {transform_indices = @transform_4, window_bounds = array<i64: 1, 16, 128>}]} {
    %c0 = arith.constant 0 : index
    %c0_0 = arith.constant 0 : index
    %c0_1 = arith.constant 0 : index
    %0 = vector.load %arg1[%c0, %c0_0, %c0_1] : memref<1x16x128xf32, #tpu.memory_space<vmem>>, vector<1x16x128xf32>
    %1 = vector.shape_cast %0 : vector<1x16x128xf32> to vector<16x128xf32>
    %2 = arith.truncf %1 : vector<16x128xf32> to vector<16x128xbf16>
    %c0_2 = arith.constant 0 : index
    %c0_3 = arith.constant 0 : index
    %3 = vector.load %arg2[%c0_2, %c0_3] : memref<128x128xbf16, #tpu.memory_space<vmem>>, vector<128x128xbf16>
    %cst = arith.constant dense<0.000000e+00> : vector<16x128xf32>
    %4 = tpu.matmul %2, %3, %cst {dimension_numbers = #tpu.dot_dimension_numbers<[1], [0], [0], [1], [0, 0, 1, 1], [], []>} : vector<16x128xbf16>, vector<128x128xbf16>, vector<16x128xf32> -> vector<16x128xf32>
    %c0_4 = arith.constant 0 : index
    %c0_5 = arith.constant 0 : index
    %5 = vector.load %arg3[%c0_4, %c0_5] : memref<1x128xf32, #tpu.memory_space<vmem>>, vector<1x128xf32>
    %6 = vector.broadcast %5 : vector<1x128xf32> to vector<16x128xf32>
    %7 = arith.addf %4, %6 : vector<16x128xf32>
    %c0_6 = arith.constant 0 : index
    %c0_7 = arith.constant 0 : index
    %c0_8 = arith.constant 0 : index
    %8 = vector.load %arg4[%c0_6, %c0_7, %c0_8] : memref<1x16x128xf32, #tpu.memory_space<vmem>>, vector<1x16x128xf32>
    %9 = vector.shape_cast %8 : vector<1x16x128xf32> to vector<16x128xf32>
    %10 = arith.addf %7, %9 : vector<16x128xf32>
    %c0_9 = arith.constant 0 : index
    %c0_10 = arith.constant 0 : index
    %c0_11 = arith.constant 0 : index
    %11 = vector.load %arg5[%c0_9, %c0_10, %c0_11] : memref<1x16x128xf32, #tpu.memory_space<vmem>>, vector<1x16x128xf32>
    %12 = vector.shape_cast %11 : vector<1x16x128xf32> to vector<16x128xf32>
    %13 = vector.shape_cast %10 : vector<16x128xf32> to vector<1x16x128xf32>
    tpu.vector_store %arg5[%c0_9, %c0_10, %c0_11], %13 {strides = array<i32>} : memref<1x16x128xf32, #tpu.memory_space<vmem>>, vector<1x16x128xf32>,
    return
  }
  func.func @transform_0(%arg0: i32) -> (i32, i32, i32) {
    %c0_i32 = arith.constant 0 : i32
    %c0_i32_0 = arith.constant 0 : i32
    %c0_i32_1 = arith.constant 0 : i32
    return %arg0, %c0_i32, %c0_i32_0 : i32, i32, i32
  }
  func.func @transform_1(%arg0: i32) -> (i32, i32) {
    %c0_i32 = arith.constant 0 : i32
    %c0_i32_0 = arith.constant 0 : i32
    %c0_i32_1 = arith.constant 0 : i32
    return %c0_i32, %c0_i32_0 : i32, i32
  }
  func.func @transform_2(%arg0: i32) -> (i32, i32) {
    %c0_i32 = arith.constant 0 : i32
    %c0_i32_0 = arith.constant 0 : i32
    %c0_i32_1 = arith.constant 0 : i32
    return %c0_i32, %c0_i32_0 : i32, i32
  }
  func.func @transform_3(%arg0: i32) -> (i32, i32, i32) {
    %c0_i32 = arith.constant 0 : i32
    %c0_i32_0 = arith.constant 0 : i32
    %c0_i32_1 = arith.constant 0 : i32
    %c0_i32_2 = arith.constant 0 : i32
    return %c0_i32, %c0_i32_0, %c0_i32_1 : i32, i32, i32
  }
  func.func @transform_4(%arg0: i32) -> (i32, i32, i32) {
    %c0_i32 = arith.constant 0 : i32
    %c0_i32_0 = arith.constant 0 : i32
    %c0_i32_1 = arith.constant 0 : i32
    return %arg0, %c0_i32, %c0_i32_0 : i32, i32, i32
  }
}

module attributes {stable_mosaic.version = 11 : i64} {
  func.func @_block_kernel(%arg0: i32, %arg1: memref<1x80x128xf32, #tpu.memory_space<vmem>>, %arg2: memref<1x128xf32, #tpu.memory_space<vmem>>, %arg3: memref<1x128xf32, #tpu.memory_space<vmem>>, %arg4: memref<2x128x64xbf16, #tpu.memory_space<vmem>>, %arg5: memref<2x1x64xf32, #tpu.memory_space<vmem>>, %arg6: memref<2x128x64xbf16, #tpu.memory_space<vmem>>, %arg7: memref<2x1x64xf32, #tpu.memory_space<vmem>>, %arg8: memref<2x128x64xbf16, #tpu.memory_space<vmem>>, %arg9: memref<2x1x64xf32, #tpu.memory_space<vmem>>, %arg10: memref<2x64x128xbf16, #tpu.memory_space<vmem>>, %arg11: memref<1x128xf32, #tpu.memory_space<vmem>>, %arg12: memref<1x128xf32, #tpu.memory_space<vmem>>, %arg13: memref<1x128xf32, #tpu.memory_space<vmem>>, %arg14: memref<1x128xf32, #tpu.memory_space<vmem>>, %arg15: memref<128x512xbf16, #tpu.memory_space<vmem>>, %arg16: memref<1x512xf32, #tpu.memory_space<vmem>>, %arg17: memref<512x128xbf16, #tpu.memory_space<vmem>>, %arg18: memref<1x128xf32, #tpu.memory_space<vmem>>, %arg19: memref<1x128xf32, #tpu.memory_space<vmem>>, %arg20: memref<1x80x128xf32, #tpu.memory_space<vmem>>, %arg21: memref<80x128xbf16, #tpu.memory_space<vmem>>, %arg22: memref<80x128xf32, #tpu.memory_space<vmem>>) attributes {dimension_semantics = [#tpu.dimension_semantics<parallel>], iteration_bounds = array<i64: 2>, scalar_prefetch = 0 : i64, scratch_operands = 2 : i64, tpu.core_type = #tpu.core_type<tc>, window_params = [{transform_indices = @transform_0, window_bounds = array<i64: 1, 80, 128>}, {pipeline_mode = #tpu.pipeline_mode<synchronous>, transform_indices = @transform_1, window_bounds = array<i64: 1, 128>}, {pipeline_mode = #tpu.pipeline_mode<synchronous>, transform_indices = @transform_2, window_bounds = array<i64: 1, 128>}, {pipeline_mode = #tpu.pipeline_mode<synchronous>, transform_indices = @transform_3, window_bounds = array<i64: 2, 128, 64>}, {pipeline_mode = #tpu.pipeline_mode<synchronous>, transform_indices = @transform_4, window_bounds = array<i64: 2, 1, 64>}, {pipeline_mode = #tpu.pipeline_mode<synchronous>, transform_indices = @transform_5, window_bounds = array<i64: 2, 128, 64>}, {pipeline_mode = #tpu.pipeline_mode<synchronous>, transform_indices = @transform_6, window_bounds = array<i64: 2, 1, 64>}, {pipeline_mode = #tpu.pipeline_mode<synchronous>, transform_indices = @transform_7, window_bounds = array<i64: 2, 128, 64>}, {pipeline_mode = #tpu.pipeline_mode<synchronous>, transform_indices = @transform_8, window_bounds = array<i64: 2, 1, 64>}, {pipeline_mode = #tpu.pipeline_mode<synchronous>, transform_indices = @transform_9, window_bounds = array<i64: 2, 64, 128>}, {pipeline_mode = #tpu.pipeline_mode<synchronous>, transform_indices = @transform_10, window_bounds = array<i64: 1, 128>}, {pipeline_mode = #tpu.pipeline_mode<synchronous>, transform_indices = @transform_11, window_bounds = array<i64: 1, 128>}, {pipeline_mode = #tpu.pipeline_mode<synchronous>, transform_indices = @transform_12, window_bounds = array<i64: 1, 128>}, {pipeline_mode = #tpu.pipeline_mode<synchronous>, transform_indices = @transform_13, window_bounds = array<i64: 1, 128>}, {pipeline_mode = #tpu.pipeline_mode<synchronous>, transform_indices = @transform_14, window_bounds = array<i64: 128, 512>}, {pipeline_mode = #tpu.pipeline_mode<synchronous>, transform_indices = @transform_15, window_bounds = array<i64: 1, 512>}, {pipeline_mode = #tpu.pipeline_mode<synchronous>, transform_indices = @transform_16, window_bounds = array<i64: 512, 128>}, {pipeline_mode = #tpu.pipeline_mode<synchronous>, transform_indices = @transform_17, window_bounds = array<i64: 1, 128>}, {pipeline_mode = #tpu.pipeline_mode<synchronous>, transform_indices = @transform_18, window_bounds = array<i64: 1, 128>}, {transform_indices = @transform_19, window_bounds = array<i64: 1, 80, 128>}]} {
    %c0 = arith.constant 0 : index
    %c0_0 = arith.constant 0 : index
    %c0_1 = arith.constant 0 : index
    %0 = vector.load %arg1[%c0, %c0_0, %c0_1] : memref<1x80x128xf32, #tpu.memory_space<vmem>>, vector<1x80x128xf32>
    %1 = vector.shape_cast %0 : vector<1x80x128xf32> to vector<80x128xf32>
    %c0_2 = arith.constant 0 : index
    %c0_3 = arith.constant 0 : index
    %2 = vector.load %arg2[%c0_2, %c0_3] : memref<1x128xf32, #tpu.memory_space<vmem>>, vector<1x128xf32>
    %c0_4 = arith.constant 0 : index
    %c0_5 = arith.constant 0 : index
    %3 = vector.load %arg3[%c0_4, %c0_5] : memref<1x128xf32, #tpu.memory_space<vmem>>, vector<1x128xf32>
    %cst = arith.constant dense<0.000000e+00> : vector<80xf32>
    %4 = vector.multi_reduction <add>, %1, %cst [1] : vector<80x128xf32> to vector<80xf32>
    %5 = vector.shape_cast %4 : vector<80xf32> to vector<80x1xf32>
    %cst_6 = arith.constant 1.280000e+02 : f32
    %6 = vector.broadcast %cst_6 : f32 to vector<80x1xf32>
    %7 = arith.divf %5, %6 : vector<80x1xf32>
    %8 = vector.broadcast %7 : vector<80x1xf32> to vector<80x128xf32>
    %9 = arith.subf %1, %8 : vector<80x128xf32>
    %10 = arith.mulf %9, %9 : vector<80x128xf32>
    %cst_7 = arith.constant dense<0.000000e+00> : vector<80xf32>
    %11 = vector.multi_reduction <add>, %10, %cst_7 [1] : vector<80x128xf32> to vector<80xf32>
    %12 = vector.shape_cast %11 : vector<80xf32> to vector<80x1xf32>
    %cst_8 = arith.constant 1.280000e+02 : f32
    %13 = vector.broadcast %cst_8 : f32 to vector<80x1xf32>
    %14 = arith.divf %12, %13 : vector<80x1xf32>
    %cst_9 = arith.constant 9.99999997E-7 : f32
    %15 = vector.broadcast %cst_9 : f32 to vector<80x1xf32>
    %16 = arith.addf %14, %15 : vector<80x1xf32>
    %17 = math.rsqrt %16 : vector<80x1xf32>
    %18 = vector.broadcast %17 : vector<80x1xf32> to vector<80x128xf32>
    %19 = arith.mulf %9, %18 : vector<80x128xf32>
    %20 = vector.broadcast %2 : vector<1x128xf32> to vector<80x128xf32>
    %21 = arith.mulf %19, %20 : vector<80x128xf32>
    %22 = vector.broadcast %3 : vector<1x128xf32> to vector<80x128xf32>
    %23 = arith.addf %21, %22 : vector<80x128xf32>
    %24 = arith.truncf %23 : vector<80x128xf32> to vector<80x128xbf16>
    %c0_10 = arith.constant 0 : index
    %c0_11 = arith.constant 0 : index
    %25 = vector.load %arg21[%c0_10, %c0_11] : memref<80x128xbf16, #tpu.memory_space<vmem>>, vector<80x128xbf16>
    tpu.vector_store %arg21[%c0_10, %c0_11], %24 {strides = array<i32>} : memref<80x128xbf16, #tpu.memory_space<vmem>>, vector<80x128xbf16>,
    %cst_12 = arith.constant 0.000000e+00 : f32
    %26 = vector.broadcast %cst_12 : f32 to vector<80x128xf32>
    %c0_13 = arith.constant 0 : index
    %c0_14 = arith.constant 0 : index
    %27 = vector.load %arg22[%c0_13, %c0_14] : memref<80x128xf32, #tpu.memory_space<vmem>>, vector<80x128xf32>
    tpu.vector_store %arg22[%c0_13, %c0_14], %26 {strides = array<i32>} : memref<80x128xf32, #tpu.memory_space<vmem>>, vector<80x128xf32>,
    %c0_i32 = arith.constant 0 : i32
    %c2_i32 = arith.constant 2 : i32
    %28 = arith.addi %c0_i32, %c2_i32 : i32
    %c1_i32 = arith.constant 1 : i32
    scf.for %arg23 = %c0_i32 to %28 step %c1_i32  : i32 {
      %c0_53 = arith.constant 0 : index
      %c0_54 = arith.constant 0 : index
      %93 = vector.load %arg21[%c0_53, %c0_54] : memref<80x128xbf16, #tpu.memory_space<vmem>>, vector<80x128xbf16>
      %94 = arith.index_cast %arg23 : i32 to index
      %c0_55 = arith.constant 0 : index
      %c0_56 = arith.constant 0 : index
      %95 = vector.load %arg4[%94, %c0_55, %c0_56] : memref<2x128x64xbf16, #tpu.memory_space<vmem>>, vector<1x128x64xbf16>
      %96 = vector.shape_cast %95 : vector<1x128x64xbf16> to vector<128x64xbf16>
      %cst_57 = arith.constant dense<0.000000e+00> : vector<80x64xf32>
      %97 = tpu.matmul %93, %96, %cst_57 {dimension_numbers = #tpu.dot_dimension_numbers<[1], [0], [0], [1], [0, 0, 1, 1], [], []>} : vector<80x128xbf16>, vector<128x64xbf16>, vector<80x64xf32> -> vector<80x64xf32>
      %98 = arith.index_cast %arg23 : i32 to index
      %c0_58 = arith.constant 0 : index
      %c0_59 = arith.constant 0 : index
      %99 = vector.load %arg5[%98, %c0_58, %c0_59] : memref<2x1x64xf32, #tpu.memory_space<vmem>>, vector<1x1x64xf32>
      %100 = vector.shape_cast %99 : vector<1x1x64xf32> to vector<1x64xf32>
      %101 = vector.broadcast %100 : vector<1x64xf32> to vector<80x64xf32>
      %102 = arith.addf %97, %101 : vector<80x64xf32>
      %103 = arith.truncf %102 : vector<80x64xf32> to vector<80x64xbf16>
      %104 = arith.index_cast %arg23 : i32 to index
      %c0_60 = arith.constant 0 : index
      %c0_61 = arith.constant 0 : index
      %105 = vector.load %arg6[%104, %c0_60, %c0_61] : memref<2x128x64xbf16, #tpu.memory_space<vmem>>, vector<1x128x64xbf16>
      %106 = vector.shape_cast %105 : vector<1x128x64xbf16> to vector<128x64xbf16>
      %cst_62 = arith.constant dense<0.000000e+00> : vector<80x64xf32>
      %107 = tpu.matmul %93, %106, %cst_62 {dimension_numbers = #tpu.dot_dimension_numbers<[1], [0], [0], [1], [0, 0, 1, 1], [], []>} : vector<80x128xbf16>, vector<128x64xbf16>, vector<80x64xf32> -> vector<80x64xf32>
      %108 = arith.index_cast %arg23 : i32 to index
      %c0_63 = arith.constant 0 : index
      %c0_64 = arith.constant 0 : index
      %109 = vector.load %arg7[%108, %c0_63, %c0_64] : memref<2x1x64xf32, #tpu.memory_space<vmem>>, vector<1x1x64xf32>
      %110 = vector.shape_cast %109 : vector<1x1x64xf32> to vector<1x64xf32>
      %111 = vector.broadcast %110 : vector<1x64xf32> to vector<80x64xf32>
      %112 = arith.addf %107, %111 : vector<80x64xf32>
      %113 = arith.truncf %112 : vector<80x64xf32> to vector<80x64xbf16>
      %114 = arith.index_cast %arg23 : i32 to index
      %c0_65 = arith.constant 0 : index
      %c0_66 = arith.constant 0 : index
      %115 = vector.load %arg8[%114, %c0_65, %c0_66] : memref<2x128x64xbf16, #tpu.memory_space<vmem>>, vector<1x128x64xbf16>
      %116 = vector.shape_cast %115 : vector<1x128x64xbf16> to vector<128x64xbf16>
      %cst_67 = arith.constant dense<0.000000e+00> : vector<80x64xf32>
      %117 = tpu.matmul %93, %116, %cst_67 {dimension_numbers = #tpu.dot_dimension_numbers<[1], [0], [0], [1], [0, 0, 1, 1], [], []>} : vector<80x128xbf16>, vector<128x64xbf16>, vector<80x64xf32> -> vector<80x64xf32>
      %118 = arith.index_cast %arg23 : i32 to index
      %c0_68 = arith.constant 0 : index
      %c0_69 = arith.constant 0 : index
      %119 = vector.load %arg9[%118, %c0_68, %c0_69] : memref<2x1x64xf32, #tpu.memory_space<vmem>>, vector<1x1x64xf32>
      %120 = vector.shape_cast %119 : vector<1x1x64xf32> to vector<1x64xf32>
      %121 = vector.broadcast %120 : vector<1x64xf32> to vector<80x64xf32>
      %122 = arith.addf %117, %121 : vector<80x64xf32>
      %123 = arith.truncf %122 : vector<80x64xf32> to vector<80x64xbf16>
      %cst_70 = arith.constant dense<0.000000e+00> : vector<80x80xf32>
      %124 = tpu.matmul %103, %113, %cst_70 {dimension_numbers = #tpu.dot_dimension_numbers<[1], [1], [0], [0], [0, 0, 1, 0], [], []>} : vector<80x64xbf16>, vector<80x64xbf16>, vector<80x80xf32> -> vector<80x80xf32>
      %cst_71 = arith.constant dense<0xFF800000> : vector<80xf32>
      %125 = vector.multi_reduction <maximumf>, %124, %cst_71 [1] : vector<80x80xf32> to vector<80xf32>
      %126 = vector.shape_cast %125 : vector<80xf32> to vector<80x1xf32>
      %127 = vector.broadcast %126 : vector<80x1xf32> to vector<80x80xf32>
      %128 = arith.subf %124, %127 : vector<80x80xf32>
      %129 = math.exp %128 : vector<80x80xf32>
      %cst_72 = arith.constant dense<0.000000e+00> : vector<80xf32>
      %130 = vector.multi_reduction <add>, %129, %cst_72 [1] : vector<80x80xf32> to vector<80xf32>
      %131 = vector.shape_cast %130 : vector<80xf32> to vector<80x1xf32>
      %132 = vector.broadcast %131 : vector<80x1xf32> to vector<80x80xf32>
      %133 = arith.divf %129, %132 : vector<80x80xf32>
      %134 = arith.truncf %133 : vector<80x80xf32> to vector<80x80xbf16>
      %cst_73 = arith.constant dense<0.000000e+00> : vector<80x64xf32>
      %135 = tpu.matmul %134, %123, %cst_73 {dimension_numbers = #tpu.dot_dimension_numbers<[1], [0], [0], [1], [0, 0, 1, 1], [], []>} : vector<80x80xbf16>, vector<80x64xbf16>, vector<80x64xf32> -> vector<80x64xf32>
      %c0_74 = arith.constant 0 : index
      %c0_75 = arith.constant 0 : index
      %136 = vector.load %arg22[%c0_74, %c0_75] : memref<80x128xf32, #tpu.memory_space<vmem>>, vector<80x128xf32>
      %137 = arith.truncf %135 : vector<80x64xf32> to vector<80x64xbf16>
      %138 = arith.index_cast %arg23 : i32 to index
      %c0_76 = arith.constant 0 : index
      %c0_77 = arith.constant 0 : index
      %139 = vector.load %arg10[%138, %c0_76, %c0_77] : memref<2x64x128xbf16, #tpu.memory_space<vmem>>, vector<1x64x128xbf16>
      %140 = vector.shape_cast %139 : vector<1x64x128xbf16> to vector<64x128xbf16>
      %cst_78 = arith.constant dense<0.000000e+00> : vector<80x128xf32>
      %141 = tpu.matmul %137, %140, %cst_78 {dimension_numbers = #tpu.dot_dimension_numbers<[1], [0], [0], [1], [0, 0, 1, 1], [], []>} : vector<80x64xbf16>, vector<64x128xbf16>, vector<80x128xf32> -> vector<80x128xf32>
      %142 = arith.addf %136, %141 : vector<80x128xf32>
      %c0_79 = arith.constant 0 : index
      %c0_80 = arith.constant 0 : index
      %143 = vector.load %arg22[%c0_79, %c0_80] : memref<80x128xf32, #tpu.memory_space<vmem>>, vector<80x128xf32>
      tpu.vector_store %arg22[%c0_79, %c0_80], %142 {strides = array<i32>} : memref<80x128xf32, #tpu.memory_space<vmem>>, vector<80x128xf32>,
    }
    %c2_i32_15 = arith.constant 2 : i32
    %c0_16 = arith.constant 0 : index
    %c0_17 = arith.constant 0 : index
    %c0_18 = arith.constant 0 : index
    %29 = vector.load %arg1[%c0_16, %c0_17, %c0_18] : memref<1x80x128xf32, #tpu.memory_space<vmem>>, vector<1x80x128xf32>
    %30 = vector.shape_cast %29 : vector<1x80x128xf32> to vector<80x128xf32>
    %c0_19 = arith.constant 0 : index
    %c0_20 = arith.constant 0 : index
    %31 = vector.load %arg12[%c0_19, %c0_20] : memref<1x128xf32, #tpu.memory_space<vmem>>, vector<1x128xf32>
    %c0_21 = arith.constant 0 : index
    %c0_22 = arith.constant 0 : index
    %32 = vector.load %arg22[%c0_21, %c0_22] : memref<80x128xf32, #tpu.memory_space<vmem>>, vector<80x128xf32>
    %c0_23 = arith.constant 0 : index
    %c0_24 = arith.constant 0 : index
    %33 = vector.load %arg11[%c0_23, %c0_24] : memref<1x128xf32, #tpu.memory_space<vmem>>, vector<1x128xf32>
    %34 = vector.broadcast %33 : vector<1x128xf32> to vector<80x128xf32>
    %35 = arith.addf %32, %34 : vector<80x128xf32>
    %36 = vector.broadcast %31 : vector<1x128xf32> to vector<80x128xf32>
    %37 = arith.mulf %36, %35 : vector<80x128xf32>
    %38 = arith.addf %30, %37 : vector<80x128xf32>
    %c0_25 = arith.constant 0 : index
    %c0_26 = arith.constant 0 : index
    %39 = vector.load %arg13[%c0_25, %c0_26] : memref<1x128xf32, #tpu.memory_space<vmem>>, vector<1x128xf32>
    %c0_27 = arith.constant 0 : index
    %c0_28 = arith.constant 0 : index
    %40 = vector.load %arg14[%c0_27, %c0_28] : memref<1x128xf32, #tpu.memory_space<vmem>>, vector<1x128xf32>
    %cst_29 = arith.constant dense<0.000000e+00> : vector<80xf32>
    %41 = vector.multi_reduction <add>, %38, %cst_29 [1] : vector<80x128xf32> to vector<80xf32>
    %42 = vector.shape_cast %41 : vector<80xf32> to vector<80x1xf32>
    %cst_30 = arith.constant 1.280000e+02 : f32
    %43 = vector.broadcast %cst_30 : f32 to vector<80x1xf32>
    %44 = arith.divf %42, %43 : vector<80x1xf32>
    %45 = vector.broadcast %44 : vector<80x1xf32> to vector<80x128xf32>
    %46 = arith.subf %38, %45 : vector<80x128xf32>
    %47 = arith.mulf %46, %46 : vector<80x128xf32>
    %cst_31 = arith.constant dense<0.000000e+00> : vector<80xf32>
    %48 = vector.multi_reduction <add>, %47, %cst_31 [1] : vector<80x128xf32> to vector<80xf32>
    %49 = vector.shape_cast %48 : vector<80xf32> to vector<80x1xf32>
    %cst_32 = arith.constant 1.280000e+02 : f32
    %50 = vector.broadcast %cst_32 : f32 to vector<80x1xf32>
    %51 = arith.divf %49, %50 : vector<80x1xf32>
    %cst_33 = arith.constant 9.99999997E-7 : f32
    %52 = vector.broadcast %cst_33 : f32 to vector<80x1xf32>
    %53 = arith.addf %51, %52 : vector<80x1xf32>
    %54 = math.rsqrt %53 : vector<80x1xf32>
    %55 = vector.broadcast %54 : vector<80x1xf32> to vector<80x128xf32>
    %56 = arith.mulf %46, %55 : vector<80x128xf32>
    %57 = vector.broadcast %39 : vector<1x128xf32> to vector<80x128xf32>
    %58 = arith.mulf %56, %57 : vector<80x128xf32>
    %59 = vector.broadcast %40 : vector<1x128xf32> to vector<80x128xf32>
    %60 = arith.addf %58, %59 : vector<80x128xf32>
    %61 = arith.truncf %60 : vector<80x128xf32> to vector<80x128xbf16>
    %c0_34 = arith.constant 0 : index
    %c0_35 = arith.constant 0 : index
    %62 = vector.load %arg15[%c0_34, %c0_35] : memref<128x512xbf16, #tpu.memory_space<vmem>>, vector<128x512xbf16>
    %cst_36 = arith.constant dense<0.000000e+00> : vector<80x512xf32>
    %63 = tpu.matmul %61, %62, %cst_36 {dimension_numbers = #tpu.dot_dimension_numbers<[1], [0], [0], [1], [0, 0, 1, 1], [], []>} : vector<80x128xbf16>, vector<128x512xbf16>, vector<80x512xf32> -> vector<80x512xf32>
    %c0_37 = arith.constant 0 : index
    %c0_38 = arith.constant 0 : index
    %64 = vector.load %arg16[%c0_37, %c0_38] : memref<1x512xf32, #tpu.memory_space<vmem>>, vector<1x512xf32>
    %65 = vector.broadcast %64 : vector<1x512xf32> to vector<80x512xf32>
    %66 = arith.addf %63, %65 : vector<80x512xf32>
    %67 = arith.mulf %66, %66 : vector<80x512xf32>
    %68 = arith.mulf %66, %67 : vector<80x512xf32>
    %cst_39 = arith.constant 4.471500e-02 : f32
    %69 = vector.broadcast %cst_39 : f32 to vector<80x512xf32>
    %70 = arith.mulf %69, %68 : vector<80x512xf32>
    %71 = arith.addf %66, %70 : vector<80x512xf32>
    %cst_40 = arith.constant 0.797884583 : f32
    %72 = vector.broadcast %cst_40 : f32 to vector<80x512xf32>
    %73 = arith.mulf %72, %71 : vector<80x512xf32>
    %74 = math.tanh %73 : vector<80x512xf32>
    %cst_41 = arith.constant 1.000000e+00 : f32
    %75 = vector.broadcast %cst_41 : f32 to vector<80x512xf32>
    %76 = arith.addf %75, %74 : vector<80x512xf32>
    %cst_42 = arith.constant 5.000000e-01 : f32
    %77 = vector.broadcast %cst_42 : f32 to vector<80x512xf32>
    %78 = arith.mulf %77, %76 : vector<80x512xf32>
    %79 = arith.mulf %66, %78 : vector<80x512xf32>
    %80 = arith.truncf %79 : vector<80x512xf32> to vector<80x512xbf16>
    %c0_43 = arith.constant 0 : index
    %c0_44 = arith.constant 0 : index
    %81 = vector.load %arg17[%c0_43, %c0_44] : memref<512x128xbf16, #tpu.memory_space<vmem>>, vector<512x128xbf16>
    %cst_45 = arith.constant dense<0.000000e+00> : vector<80x128xf32>
    %82 = tpu.matmul %80, %81, %cst_45 {dimension_numbers = #tpu.dot_dimension_numbers<[1], [0], [0], [1], [0, 0, 1, 1], [], []>} : vector<80x512xbf16>, vector<512x128xbf16>, vector<80x128xf32> -> vector<80x128xf32>
    %c0_46 = arith.constant 0 : index
    %c0_47 = arith.constant 0 : index
    %83 = vector.load %arg18[%c0_46, %c0_47] : memref<1x128xf32, #tpu.memory_space<vmem>>, vector<1x128xf32>
    %84 = vector.broadcast %83 : vector<1x128xf32> to vector<80x128xf32>
    %85 = arith.addf %82, %84 : vector<80x128xf32>
    %c0_48 = arith.constant 0 : index
    %c0_49 = arith.constant 0 : index
    %86 = vector.load %arg19[%c0_48, %c0_49] : memref<1x128xf32, #tpu.memory_space<vmem>>, vector<1x128xf32>
    %87 = vector.broadcast %86 : vector<1x128xf32> to vector<80x128xf32>
    %88 = arith.mulf %87, %85 : vector<80x128xf32>
    %89 = arith.addf %38, %88 : vector<80x128xf32>
    %c0_50 = arith.constant 0 : index
    %c0_51 = arith.constant 0 : index
    %c0_52 = arith.constant 0 : index
    %90 = vector.load %arg20[%c0_50, %c0_51, %c0_52] : memref<1x80x128xf32, #tpu.memory_space<vmem>>, vector<1x80x128xf32>
    %91 = vector.shape_cast %90 : vector<1x80x128xf32> to vector<80x128xf32>
    %92 = vector.shape_cast %89 : vector<80x128xf32> to vector<1x80x128xf32>
    tpu.vector_store %arg20[%c0_50, %c0_51, %c0_52], %92 {strides = array<i32>} : memref<1x80x128xf32, #tpu.memory_space<vmem>>, vector<1x80x128xf32>,
    return
  }
  func.func @transform_0(%arg0: i32) -> (i32, i32, i32) {
    %c0_i32 = arith.constant 0 : i32
    %c0_i32_0 = arith.constant 0 : i32
    %c0_i32_1 = arith.constant 0 : i32
    return %arg0, %c0_i32, %c0_i32_0 : i32, i32, i32
  }
  func.func @transform_1(%arg0: i32) -> (i32, i32) {
    %c0_i32 = arith.constant 0 : i32
    %c0_i32_0 = arith.constant 0 : i32
    %c0_i32_1 = arith.constant 0 : i32
    return %c0_i32, %c0_i32_0 : i32, i32
  }
  func.func @transform_2(%arg0: i32) -> (i32, i32) {
    %c0_i32 = arith.constant 0 : i32
    %c0_i32_0 = arith.constant 0 : i32
    %c0_i32_1 = arith.constant 0 : i32
    return %c0_i32, %c0_i32_0 : i32, i32
  }
  func.func @transform_3(%arg0: i32) -> (i32, i32, i32) {
    %c0_i32 = arith.constant 0 : i32
    %c0_i32_0 = arith.constant 0 : i32
    %c0_i32_1 = arith.constant 0 : i32
    %c0_i32_2 = arith.constant 0 : i32
    return %c0_i32, %c0_i32_0, %c0_i32_1 : i32, i32, i32
  }
  func.func @transform_4(%arg0: i32) -> (i32, i32, i32) {
    %c0_i32 = arith.constant 0 : i32
    %c0_i32_0 = arith.constant 0 : i32
    %c0_i32_1 = arith.constant 0 : i32
    %c0_i32_2 = arith.constant 0 : i32
    return %c0_i32, %c0_i32_0, %c0_i32_1 : i32, i32, i32
  }
  func.func @transform_5(%arg0: i32) -> (i32, i32, i32) {
    %c0_i32 = arith.constant 0 : i32
    %c0_i32_0 = arith.constant 0 : i32
    %c0_i32_1 = arith.constant 0 : i32
    %c0_i32_2 = arith.constant 0 : i32
    return %c0_i32, %c0_i32_0, %c0_i32_1 : i32, i32, i32
  }
  func.func @transform_6(%arg0: i32) -> (i32, i32, i32) {
    %c0_i32 = arith.constant 0 : i32
    %c0_i32_0 = arith.constant 0 : i32
    %c0_i32_1 = arith.constant 0 : i32
    %c0_i32_2 = arith.constant 0 : i32
    return %c0_i32, %c0_i32_0, %c0_i32_1 : i32, i32, i32
  }
  func.func @transform_7(%arg0: i32) -> (i32, i32, i32) {
    %c0_i32 = arith.constant 0 : i32
    %c0_i32_0 = arith.constant 0 : i32
    %c0_i32_1 = arith.constant 0 : i32
    %c0_i32_2 = arith.constant 0 : i32
    return %c0_i32, %c0_i32_0, %c0_i32_1 : i32, i32, i32
  }
  func.func @transform_8(%arg0: i32) -> (i32, i32, i32) {
    %c0_i32 = arith.constant 0 : i32
    %c0_i32_0 = arith.constant 0 : i32
    %c0_i32_1 = arith.constant 0 : i32
    %c0_i32_2 = arith.constant 0 : i32
    return %c0_i32, %c0_i32_0, %c0_i32_1 : i32, i32, i32
  }
  func.func @transform_9(%arg0: i32) -> (i32, i32, i32) {
    %c0_i32 = arith.constant 0 : i32
    %c0_i32_0 = arith.constant 0 : i32
    %c0_i32_1 = arith.constant 0 : i32
    %c0_i32_2 = arith.constant 0 : i32
    return %c0_i32, %c0_i32_0, %c0_i32_1 : i32, i32, i32
  }
  func.func @transform_10(%arg0: i32) -> (i32, i32) {
    %c0_i32 = arith.constant 0 : i32
    %c0_i32_0 = arith.constant 0 : i32
    %c0_i32_1 = arith.constant 0 : i32
    return %c0_i32, %c0_i32_0 : i32, i32
  }
  func.func @transform_11(%arg0: i32) -> (i32, i32) {
    %c0_i32 = arith.constant 0 : i32
    %c0_i32_0 = arith.constant 0 : i32
    %c0_i32_1 = arith.constant 0 : i32
    return %c0_i32, %c0_i32_0 : i32, i32
  }
  func.func @transform_12(%arg0: i32) -> (i32, i32) {
    %c0_i32 = arith.constant 0 : i32
    %c0_i32_0 = arith.constant 0 : i32
    %c0_i32_1 = arith.constant 0 : i32
    return %c0_i32, %c0_i32_0 : i32, i32
  }
  func.func @transform_13(%arg0: i32) -> (i32, i32) {
    %c0_i32 = arith.constant 0 : i32
    %c0_i32_0 = arith.constant 0 : i32
    %c0_i32_1 = arith.constant 0 : i32
    return %c0_i32, %c0_i32_0 : i32, i32
  }
  func.func @transform_14(%arg0: i32) -> (i32, i32) {
    %c0_i32 = arith.constant 0 : i32
    %c0_i32_0 = arith.constant 0 : i32
    %c0_i32_1 = arith.constant 0 : i32
    return %c0_i32, %c0_i32_0 : i32, i32
  }
  func.func @transform_15(%arg0: i32) -> (i32, i32) {
    %c0_i32 = arith.constant 0 : i32
    %c0_i32_0 = arith.constant 0 : i32
    %c0_i32_1 = arith.constant 0 : i32
    return %c0_i32, %c0_i32_0 : i32, i32
  }
  func.func @transform_16(%arg0: i32) -> (i32, i32) {
    %c0_i32 = arith.constant 0 : i32
    %c0_i32_0 = arith.constant 0 : i32
    %c0_i32_1 = arith.constant 0 : i32
    return %c0_i32, %c0_i32_0 : i32, i32
  }
  func.func @transform_17(%arg0: i32) -> (i32, i32) {
    %c0_i32 = arith.constant 0 : i32
    %c0_i32_0 = arith.constant 0 : i32
    %c0_i32_1 = arith.constant 0 : i32
    return %c0_i32, %c0_i32_0 : i32, i32
  }
  func.func @transform_18(%arg0: i32) -> (i32, i32) {
    %c0_i32 = arith.constant 0 : i32
    %c0_i32_0 = arith.constant 0 : i32
    %c0_i32_1 = arith.constant 0 : i32
    return %c0_i32, %c0_i32_0 : i32, i32
  }
  func.func @transform_19(%arg0: i32) -> (i32, i32, i32) {
    %c0_i32 = arith.constant 0 : i32
    %c0_i32_0 = arith.constant 0 : i32
    %c0_i32_1 = arith.constant 0 : i32
    return %arg0, %c0_i32, %c0_i32_0 : i32, i32, i32
  }
}

module attributes {stable_mosaic.version = 11 : i64} {
  func.func @_head_kernel(%arg0: i32, %arg1: i32, %arg2: memref<1x16x128xf32, #tpu.memory_space<vmem>>, %arg3: memref<1x128xf32, #tpu.memory_space<vmem>>, %arg4: memref<1x128xf32, #tpu.memory_space<vmem>>, %arg5: memref<128x128xbf16, #tpu.memory_space<vmem>>, %arg6: memref<1x128xf32, #tpu.memory_space<vmem>>, %arg7: memref<128x128xbf16, #tpu.memory_space<vmem>>, %arg8: memref<1x128xf32, #tpu.memory_space<vmem>>, %arg9: memref<256x128xbf16, #tpu.memory_space<vmem>>, %arg10: memref<1x128xf32, #tpu.memory_space<vmem>>, %arg11: memref<1x16x128xf32, #tpu.memory_space<vmem>>) attributes {dimension_semantics = [#tpu.dimension_semantics<parallel>, #tpu.dimension_semantics<parallel>], iteration_bounds = array<i64: 2, 4>, scalar_prefetch = 0 : i64, scratch_operands = 0 : i64, tpu.core_type = #tpu.core_type<tc>, window_params = [{transform_indices = @transform_0, window_bounds = array<i64: 1, 16, 128>}, {pipeline_mode = #tpu.pipeline_mode<synchronous>, transform_indices = @transform_1, window_bounds = array<i64: 1, 128>}, {pipeline_mode = #tpu.pipeline_mode<synchronous>, transform_indices = @transform_2, window_bounds = array<i64: 1, 128>}, {pipeline_mode = #tpu.pipeline_mode<synchronous>, transform_indices = @transform_3, window_bounds = array<i64: 128, 128>}, {pipeline_mode = #tpu.pipeline_mode<synchronous>, transform_indices = @transform_4, window_bounds = array<i64: 1, 128>}, {pipeline_mode = #tpu.pipeline_mode<synchronous>, transform_indices = @transform_5, window_bounds = array<i64: 128, 128>}, {pipeline_mode = #tpu.pipeline_mode<synchronous>, transform_indices = @transform_6, window_bounds = array<i64: 1, 128>}, {pipeline_mode = #tpu.pipeline_mode<synchronous>, transform_indices = @transform_7, window_bounds = array<i64: 256, 128>}, {pipeline_mode = #tpu.pipeline_mode<synchronous>, transform_indices = @transform_8, window_bounds = array<i64: 1, 128>}, {transform_indices = @transform_9, window_bounds = array<i64: 1, 16, 128>}]} {
    %c0 = arith.constant 0 : index
    %c0_0 = arith.constant 0 : index
    %c0_1 = arith.constant 0 : index
    %0 = vector.load %arg2[%c0, %c0_0, %c0_1] : memref<1x16x128xf32, #tpu.memory_space<vmem>>, vector<1x16x128xf32>
    %1 = vector.shape_cast %0 : vector<1x16x128xf32> to vector<16x128xf32>
    %c0_2 = arith.constant 0 : index
    %c0_3 = arith.constant 0 : index
    %2 = vector.load %arg3[%c0_2, %c0_3] : memref<1x128xf32, #tpu.memory_space<vmem>>, vector<1x128xf32>
    %c0_4 = arith.constant 0 : index
    %c0_5 = arith.constant 0 : index
    %3 = vector.load %arg4[%c0_4, %c0_5] : memref<1x128xf32, #tpu.memory_space<vmem>>, vector<1x128xf32>
    %cst = arith.constant dense<0.000000e+00> : vector<16xf32>
    %4 = vector.multi_reduction <add>, %1, %cst [1] : vector<16x128xf32> to vector<16xf32>
    %5 = vector.shape_cast %4 : vector<16xf32> to vector<16x1xf32>
    %cst_6 = arith.constant 1.280000e+02 : f32
    %6 = vector.broadcast %cst_6 : f32 to vector<16x1xf32>
    %7 = arith.divf %5, %6 : vector<16x1xf32>
    %8 = vector.broadcast %7 : vector<16x1xf32> to vector<16x128xf32>
    %9 = arith.subf %1, %8 : vector<16x128xf32>
    %10 = arith.mulf %9, %9 : vector<16x128xf32>
    %cst_7 = arith.constant dense<0.000000e+00> : vector<16xf32>
    %11 = vector.multi_reduction <add>, %10, %cst_7 [1] : vector<16x128xf32> to vector<16xf32>
    %12 = vector.shape_cast %11 : vector<16xf32> to vector<16x1xf32>
    %cst_8 = arith.constant 1.280000e+02 : f32
    %13 = vector.broadcast %cst_8 : f32 to vector<16x1xf32>
    %14 = arith.divf %12, %13 : vector<16x1xf32>
    %cst_9 = arith.constant 9.99999997E-7 : f32
    %15 = vector.broadcast %cst_9 : f32 to vector<16x1xf32>
    %16 = arith.addf %14, %15 : vector<16x1xf32>
    %17 = math.rsqrt %16 : vector<16x1xf32>
    %18 = vector.broadcast %17 : vector<16x1xf32> to vector<16x128xf32>
    %19 = arith.mulf %9, %18 : vector<16x128xf32>
    %20 = vector.broadcast %2 : vector<1x128xf32> to vector<16x128xf32>
    %21 = arith.mulf %19, %20 : vector<16x128xf32>
    %22 = vector.broadcast %3 : vector<1x128xf32> to vector<16x128xf32>
    %23 = arith.addf %21, %22 : vector<16x128xf32>
    %24 = arith.truncf %23 : vector<16x128xf32> to vector<16x128xbf16>
    %c0_10 = arith.constant 0 : index
    %c0_11 = arith.constant 0 : index
    %25 = vector.load %arg5[%c0_10, %c0_11] : memref<128x128xbf16, #tpu.memory_space<vmem>>, vector<128x128xbf16>
    %cst_12 = arith.constant dense<0.000000e+00> : vector<16x128xf32>
    %26 = tpu.matmul %24, %25, %cst_12 {dimension_numbers = #tpu.dot_dimension_numbers<[1], [0], [0], [1], [0, 0, 1, 1], [], []>} : vector<16x128xbf16>, vector<128x128xbf16>, vector<16x128xf32> -> vector<16x128xf32>
    %c0_13 = arith.constant 0 : index
    %c0_14 = arith.constant 0 : index
    %27 = vector.load %arg6[%c0_13, %c0_14] : memref<1x128xf32, #tpu.memory_space<vmem>>, vector<1x128xf32>
    %28 = vector.broadcast %27 : vector<1x128xf32> to vector<16x128xf32>
    %29 = arith.addf %26, %28 : vector<16x128xf32>
    %30 = arith.mulf %29, %29 : vector<16x128xf32>
    %31 = arith.mulf %29, %30 : vector<16x128xf32>
    %cst_15 = arith.constant 4.471500e-02 : f32
    %32 = vector.broadcast %cst_15 : f32 to vector<16x128xf32>
    %33 = arith.mulf %32, %31 : vector<16x128xf32>
    %34 = arith.addf %29, %33 : vector<16x128xf32>
    %cst_16 = arith.constant 0.797884583 : f32
    %35 = vector.broadcast %cst_16 : f32 to vector<16x128xf32>
    %36 = arith.mulf %35, %34 : vector<16x128xf32>
    %37 = math.tanh %36 : vector<16x128xf32>
    %cst_17 = arith.constant 1.000000e+00 : f32
    %38 = vector.broadcast %cst_17 : f32 to vector<16x128xf32>
    %39 = arith.addf %38, %37 : vector<16x128xf32>
    %cst_18 = arith.constant 5.000000e-01 : f32
    %40 = vector.broadcast %cst_18 : f32 to vector<16x128xf32>
    %41 = arith.mulf %40, %39 : vector<16x128xf32>
    %42 = arith.mulf %29, %41 : vector<16x128xf32>
    %c0_19 = arith.constant 0 : index
    %c0_20 = arith.constant 0 : index
    %43 = vector.load %arg7[%c0_19, %c0_20] : memref<128x128xbf16, #tpu.memory_space<vmem>>, vector<128x128xbf16>
    %cst_21 = arith.constant dense<0.000000e+00> : vector<16x128xf32>
    %44 = tpu.matmul %24, %43, %cst_21 {dimension_numbers = #tpu.dot_dimension_numbers<[1], [0], [0], [1], [0, 0, 1, 1], [], []>} : vector<16x128xbf16>, vector<128x128xbf16>, vector<16x128xf32> -> vector<16x128xf32>
    %c0_22 = arith.constant 0 : index
    %c0_23 = arith.constant 0 : index
    %45 = vector.load %arg8[%c0_22, %c0_23] : memref<1x128xf32, #tpu.memory_space<vmem>>, vector<1x128xf32>
    %46 = vector.broadcast %45 : vector<1x128xf32> to vector<16x128xf32>
    %47 = arith.addf %44, %46 : vector<16x128xf32>
    %48 = arith.mulf %47, %47 : vector<16x128xf32>
    %49 = arith.mulf %47, %48 : vector<16x128xf32>
    %cst_24 = arith.constant 4.471500e-02 : f32
    %50 = vector.broadcast %cst_24 : f32 to vector<16x128xf32>
    %51 = arith.mulf %50, %49 : vector<16x128xf32>
    %52 = arith.addf %47, %51 : vector<16x128xf32>
    %cst_25 = arith.constant 0.797884583 : f32
    %53 = vector.broadcast %cst_25 : f32 to vector<16x128xf32>
    %54 = arith.mulf %53, %52 : vector<16x128xf32>
    %55 = math.tanh %54 : vector<16x128xf32>
    %cst_26 = arith.constant 1.000000e+00 : f32
    %56 = vector.broadcast %cst_26 : f32 to vector<16x128xf32>
    %57 = arith.addf %56, %55 : vector<16x128xf32>
    %cst_27 = arith.constant 5.000000e-01 : f32
    %58 = vector.broadcast %cst_27 : f32 to vector<16x128xf32>
    %59 = arith.mulf %58, %57 : vector<16x128xf32>
    %60 = arith.mulf %47, %59 : vector<16x128xf32>
    %61 = tpu.concatenate %42, %60 in 1 : vector<16x128xf32>, vector<16x128xf32> -> vector<16x256xf32>
    %62 = arith.truncf %61 : vector<16x256xf32> to vector<16x256xbf16>
    %c0_28 = arith.constant 0 : index
    %c0_29 = arith.constant 0 : index
    %63 = vector.load %arg9[%c0_28, %c0_29] : memref<256x128xbf16, #tpu.memory_space<vmem>>, vector<256x128xbf16>
    %cst_30 = arith.constant dense<0.000000e+00> : vector<16x128xf32>
    %64 = tpu.matmul %62, %63, %cst_30 {dimension_numbers = #tpu.dot_dimension_numbers<[1], [0], [0], [1], [0, 0, 1, 1], [], []>} : vector<16x256xbf16>, vector<256x128xbf16>, vector<16x128xf32> -> vector<16x128xf32>
    %c0_31 = arith.constant 0 : index
    %c0_32 = arith.constant 0 : index
    %65 = vector.load %arg10[%c0_31, %c0_32] : memref<1x128xf32, #tpu.memory_space<vmem>>, vector<1x128xf32>
    %66 = vector.broadcast %65 : vector<1x128xf32> to vector<16x128xf32>
    %67 = arith.addf %64, %66 : vector<16x128xf32>
    %c0_33 = arith.constant 0 : index
    %c0_34 = arith.constant 0 : index
    %c0_35 = arith.constant 0 : index
    %68 = vector.load %arg11[%c0_33, %c0_34, %c0_35] : memref<1x16x128xf32, #tpu.memory_space<vmem>>, vector<1x16x128xf32>
    %69 = vector.shape_cast %68 : vector<1x16x128xf32> to vector<16x128xf32>
    %70 = vector.shape_cast %67 : vector<16x128xf32> to vector<1x16x128xf32>
    tpu.vector_store %arg11[%c0_33, %c0_34, %c0_35], %70 {strides = array<i32>} : memref<1x16x128xf32, #tpu.memory_space<vmem>>, vector<1x16x128xf32>,
    return
  }
  func.func @transform_0(%arg0: i32, %arg1: i32) -> (i32, i32, i32) {
    %c1_i32 = arith.constant 1 : i32
    %0 = arith.addi %c1_i32, %arg1 : i32
    %c0_i32 = arith.constant 0 : i32
    %c0_i32_0 = arith.constant 0 : i32
    return %arg0, %0, %c0_i32 : i32, i32, i32
  }
  func.func @transform_1(%arg0: i32, %arg1: i32) -> (i32, i32) {
    %c0_i32 = arith.constant 0 : i32
    %c0_i32_0 = arith.constant 0 : i32
    %c0_i32_1 = arith.constant 0 : i32
    return %c0_i32, %c0_i32_0 : i32, i32
  }
  func.func @transform_2(%arg0: i32, %arg1: i32) -> (i32, i32) {
    %c0_i32 = arith.constant 0 : i32
    %c0_i32_0 = arith.constant 0 : i32
    %c0_i32_1 = arith.constant 0 : i32
    return %c0_i32, %c0_i32_0 : i32, i32
  }
  func.func @transform_3(%arg0: i32, %arg1: i32) -> (i32, i32) {
    %c0_i32 = arith.constant 0 : i32
    %c0_i32_0 = arith.constant 0 : i32
    %c0_i32_1 = arith.constant 0 : i32
    return %c0_i32, %c0_i32_0 : i32, i32
  }
  func.func @transform_4(%arg0: i32, %arg1: i32) -> (i32, i32) {
    %c0_i32 = arith.constant 0 : i32
    %c0_i32_0 = arith.constant 0 : i32
    %c0_i32_1 = arith.constant 0 : i32
    return %c0_i32, %c0_i32_0 : i32, i32
  }
  func.func @transform_5(%arg0: i32, %arg1: i32) -> (i32, i32) {
    %c0_i32 = arith.constant 0 : i32
    %c0_i32_0 = arith.constant 0 : i32
    %c0_i32_1 = arith.constant 0 : i32
    return %c0_i32, %c0_i32_0 : i32, i32
  }
  func.func @transform_6(%arg0: i32, %arg1: i32) -> (i32, i32) {
    %c0_i32 = arith.constant 0 : i32
    %c0_i32_0 = arith.constant 0 : i32
    %c0_i32_1 = arith.constant 0 : i32
    return %c0_i32, %c0_i32_0 : i32, i32
  }
  func.func @transform_7(%arg0: i32, %arg1: i32) -> (i32, i32) {
    %c0_i32 = arith.constant 0 : i32
    %c0_i32_0 = arith.constant 0 : i32
    %c0_i32_1 = arith.constant 0 : i32
    return %c0_i32, %c0_i32_0 : i32, i32
  }
  func.func @transform_8(%arg0: i32, %arg1: i32) -> (i32, i32) {
    %c0_i32 = arith.constant 0 : i32
    %c0_i32_0 = arith.constant 0 : i32
    %c0_i32_1 = arith.constant 0 : i32
    return %c0_i32, %c0_i32_0 : i32, i32
  }
  func.func @transform_9(%arg0: i32, %arg1: i32) -> (i32, i32, i32) {
    %c0_i32 = arith.constant 0 : i32
    %c0_i32_0 = arith.constant 0 : i32
    return %arg0, %arg1, %c0_i32 : i32, i32, i32
  }
}

</mosaic_0001>

<bundles_post_ra>
// kernel: forward.6
= control target key start
LH: loop header
LB: loop body
LE: loop exit
PB: predicated region body
PF: predicated region fallthrough
CT: control target
= control target key end

     0   :  { %s549_s15 = smov 0   ;;  %s644_s0 = inlined_call_operand.vmem [shape: f32[2,64,128], index: 0, kind: input, shape index: {}]   ;;  %s645_s1 = inlined_call_operand.vmem [shape: bf16[128,128], index: 1, kind: input, shape index: {}]   ;;  %s646_s2 = inlined_call_operand.vmem [shape: f32[1,128], index: 2, kind: input, shape index: {}]   ;;  %s647_s3 = inlined_call_operand.vmem [shape: f32[1,64,128], index: 3, kind: input, shape index: {}]   ;;  %s648_s4 = inlined_call_operand.vmem [shape: f32[2,64,128], index: 4, kind: output, shape index: {}]  }
   0x1 LB: > { %s426_s16 = sadd.s32 4294967295, %s522_s15   ;;  %p430_p0 = scmp.ge.s32.totalorder %s522_s15, 1  ;;  %s522_s15 = sphi %s549_s15, %s14_s15  }
   0x2   : > { %p162_p1 = scmp.lt.s32.totalorder %s522_s15, 3 }
   0x4   : > { %p163_p2 = pnand %p430_p0, %p162_p1 }
   0x5   : > { %p188_p3 = scmp.lt.s32.totalorder (!%p163_p2), %s426_s16, 1 }
   0x6   : > { %166 = sbr.rel (%p163_p2) target bundleno = 248 (0xf8), region = 36 }
   0xb   : > { %v508_v0 = vld [vmem:[%s645_s1 + $0x38] sm:$0xff]   ;;  %v509_v1 = vld [vmem:[%s645_s1 + $0x30] sm:$0xff]   ;;  %s650_s16 = smov (!%p188_p3, %s426_s16), 1  ;;  %v510_v2 = vld [vmem:[%s645_s1 + $0x28] sm:$0xff]  }
   0xc   : > { %460 = vmatprep.subr.bf16.mxu0 %v508_v0  ;;  %484 = vmatprep.subr.bf16.mxu1 %v508_v0  ;;  %s446_s23 = sshll.u32 %s650_s16, 6  ;;  %v511_v3 = vld [vmem:[%s645_s1 + $0x20] sm:$0xff]   ;;  %v512_v10 = vld [vmem:[%s645_s1 + $0x18] sm:$0xff]   ;;  %v513_v11 = vld [vmem:[%s645_s1 + $0x10] sm:$0xff]  }
   0xd   : > { %461 = vmatpush3.bf16.msra.mxu0 %v508_v0  ;;  %492 = vmatpush3.bf16.msra.mxu1 %v508_v0  ;;  %s574_s26 = scalar_lea.vmem %s644_s0, %s446_s23  ;;  %v514_v12 = vld [vmem:[%s645_s1 + $0x8] sm:$0xff]   ;;  %v515_v13 = vld [vmem:[%s645_s1] sm:$0xff]   ;;  %v349_v22 = vld [vmem:[%s647_s3 + $0x10] sm:$0xff]  ;;  %s613_s21 = scalar_lea.vmem %s648_s4, %s446_s23 }
   0xe   : > { %462 = vmatprep.subr.bf16.mxu0 %v509_v1  ;;  %485 = vmatprep.subr.bf16.mxu1 %v509_v1  ;;  %v199_v4 = vld [vmem:[%s574_s26] sm:$0xff]  ;;  %v200_v5 = vld [vmem:[%s574_s26 + $0x8] sm:$0xff]  ;;  %v201_v14 = vld [vmem:[%s574_s26 + $0x10] sm:$0xff] }
   0xf   : > { %v203_v6 = vld [vmem:[%s574_s26 + $0x20] sm:$0xff]  ;;  %v207_v7 = vpack.c.bf16 %v200_v5, %v199_v4  ;;  %v204_v8 = vld [vmem:[%s574_s26 + $0x28] sm:$0xff]  ;;  %v202_v15 = vld [vmem:[%s574_s26 + $0x18] sm:$0xff] }
  0x10   : > { %v209_v9 = vpack.c.bf16 %v204_v8, %v203_v6  ;;  %v205_v16 = vld [vmem:[%s574_s26 + $0x30] sm:$0xff]  ;;  %v206_v17 = vld [vmem:[%s574_s26 + $0x38] sm:$0xff]  ;;  %v208_v18 = vpack.c.bf16 %v202_v15, %v201_v14  ;;  %v435_v20 = vld [vmem:[%s646_s2] ss:$0 sm:$0xff] }
  0x11   : > { %463 = vmatpush3.bf16.msra.mxu0 %v509_v1  ;;  %493 = vmatpush3.bf16.msra.mxu1 %v509_v1  ;;  %v210_v19 = vpack.c.bf16 %v206_v17, %v205_v16  ;;  %v353_v24 = vld [vmem:[%s647_s3 + $0x30] sm:$0xff]  ;;  %v347_v28 = vld [vmem:[%s647_s3] sm:$0xff]  ;;  %v350_v36 = vld [vmem:[%s647_s3 + $0x18] sm:$0xff] }
  0x12   : > { %464 = vmatprep.subr.bf16.mxu0 %v510_v2  ;;  %486 = vmatprep.subr.bf16.mxu1 %v510_v2  ;;  %v351_v30 = vld [vmem:[%s647_s3 + $0x20] sm:$0xff]  ;;  %v354_v38 = vld [vmem:[%s647_s3 + $0x38] sm:$0xff]  ;;  %v348_v44 = vld [vmem:[%s647_s3 + $0x8] sm:$0xff] }
  0x13   : > { %476 = vmatprep.mubr.bf16.mxu0 %v207_v7  ;;  %480 = vmatprep.mubr.bf16.mxu1 %v209_v9  ;;  %v352_v46 = vld [vmem:[%s647_s3 + $0x28] sm:$0xff] }
  0x15   : > { %465 = vmatpush3.bf16.msra.mxu0 %v510_v2  ;;  %494 = vmatpush3.bf16.msra.mxu1 %v510_v2 }
  0x16   : > { %466 = vmatprep.subr.bf16.mxu0 %v511_v3  ;;  %487 = vmatprep.subr.bf16.mxu1 %v511_v3 }
  0x19   : > { %467 = vmatpush3.bf16.msra.mxu0 %v511_v3  ;;  %495 = vmatpush3.bf16.msra.mxu1 %v511_v3 }
  0x1a   : > { %468 = vmatprep.subr.bf16.mxu0 %v512_v10  ;;  %488 = vmatprep.subr.bf16.mxu1 %v512_v10 }
  0x1d   : > { %469 = vmatpush3.bf16.msra.mxu0 %v512_v10  ;;  %496 = vmatpush3.bf16.msra.mxu1 %v512_v10 }
  0x1e   : > { %470 = vmatprep.subr.bf16.mxu0 %v513_v11  ;;  %489 = vmatprep.subr.bf16.mxu1 %v513_v11 }
  0x21   : > { %471 = vmatpush3.bf16.msra.mxu0 %v513_v11  ;;  %497 = vmatpush3.bf16.msra.mxu1 %v513_v11 }
  0x22   : > { %472 = vmatprep.subr.bf16.mxu0 %v514_v12  ;;  %490 = vmatprep.subr.bf16.mxu1 %v514_v12 }
  0x25   : > { %473 = vmatpush3.bf16.msra.mxu0 %v514_v12  ;;  %498 = vmatpush3.bf16.msra.mxu1 %v514_v12 }
  0x26   : > { %474 = vmatprep.subr.bf16.mxu0 %v515_v13  ;;  %491 = vmatprep.subr.bf16.mxu1 %v515_v13 }
  0x29   : > { %475 = vmatpush3.bf16.msra.mxu0 %v515_v13  ;;  %499 = vmatpush3.bf16.msra.mxu1 %v515_v13 }
  0x2c   : > { %477 = vmatmul.mubr.bf16.vlgmr.msra.gmra.mxu0 %v208_v18  ;;  %481 = vmatmul.mubr.bf16.vlgmr.msra.gmra.mxu1 %v210_v19 }
  0xec   : > { %v478_v21 = vpop.f32.mrf.mxu0  ;;  %v482_v23 = vpop.f32.mrf.mxu1 }
  0xed   : > { %v325_v25 = vadd.f32 %v478_v21, %v435_v20  ;;  %v341_v26 = vadd.f32 %v482_v23, %v435_v20 }
  0xee   : > { %v316_v27 = vpop.f32.mrf.mxu0  ;;  %v332_v29 = vpop.f32.mrf.mxu1 }
  0xef   : > { %v357_v31 = vadd.f32 %v349_v22, %v325_v25  ;;  %v361_v32 = vadd.f32 %v353_v24, %v341_v26  ;;  %v317_v33 = vadd.f32 %v435_v20, %v316_v27  ;;  %v333_v34 = vadd.f32 %v435_v20, %v332_v29 }
  0xf0   : > { %v479_v35 = vpop.f32.mrf.mxu0  ;;  %v483_v37 = vpop.f32.mrf.mxu1 }
  0xf1   : > { %365 = vst [vmem:[%s613_s21 + $0x10] sm:$0xff] %v357_v31  ;;  %369 = vst [vmem:[%s613_s21 + $0x30] sm:$0xff] %v361_v32  ;;  %v355_v39 = vadd.f32 %v347_v28, %v317_v33  ;;  %v359_v40 = vadd.f32 %v351_v30, %v333_v34  ;;  %v328_v41 = vadd.f32 %v479_v35, %v435_v20 }
  0xf2   : > { %v344_v42 = vadd.f32 %v483_v37, %v435_v20  ;;  %v319_v43 = vpop.f32.mrf.mxu0  ;;  %v335_v45 = vpop.f32.mrf.mxu1 }
  0xf3   : > { %363 = vst [vmem:[%s613_s21] sm:$0xff] %v355_v39  ;;  %367 = vst [vmem:[%s613_s21 + $0x20] sm:$0xff] %v359_v40  ;;  %v358_v47 = vadd.f32 %v350_v36, %v328_v41  ;;  %v320_v49 = vadd.f32 %v435_v20, %v319_v43  ;;  %v336_v50 = vadd.f32 %v435_v20, %v335_v45 }
  0xf4   : > { %v362_v48 = vadd.f32 %v354_v38, %v344_v42 }
  0xf5   : > { %366 = vst [vmem:[%s613_s21 + $0x18] sm:$0xff] %v358_v47  ;;  %v356_v51 = vadd.f32 %v348_v44, %v320_v49  ;;  %v360_v52 = vadd.f32 %v352_v46, %v336_v50 }
  0xf6   : > { %370 = vst [vmem:[%s613_s21 + $0x38] sm:$0xff] %v362_v48 }
  0xf7   : > { %364 = vst [vmem:[%s613_s21 + $0x8] sm:$0xff] %v356_v51  ;;  %368 = vst [vmem:[%s613_s21 + $0x28] sm:$0xff] %v360_v52 }
  0xf8 PF: > { %s14_s15 = sadd.s32 1, %s522_s15  }
  0xf9   : > { %p11_p4 = scmp.ge.s32.totalorder %s14_s15, 4  }
  0xfb   :  { %13 = sbr.rel (!%p11_p4) target bundleno = 1 (0x1), region = 66 }

// kernel: forward.5
= control target key start
LH: loop header
LB: loop body
LE: loop exit
PB: predicated region body
PF: predicated region fallthrough
CT: control target
= control target key end

     0   :  { %s479_s15 = smov 0   ;;  %s529_s0 = inlined_call_operand.vmem [shape: f32[2,16,128], index: 0, kind: input, shape index: {}]   ;;  %s530_s1 = inlined_call_operand.vmem [shape: bf16[128,128], index: 1, kind: input, shape index: {}]   ;;  %s531_s2 = inlined_call_operand.vmem [shape: f32[1,128], index: 2, kind: input, shape index: {}]   ;;  %s532_s3 = inlined_call_operand.vmem [shape: f32[1,16,128], index: 3, kind: input, shape index: {}]   ;;  %s533_s4 = inlined_call_operand.vmem [shape: f32[2,16,128], index: 4, kind: output, shape index: {}]  }
   0x1 LB: > { %s375_s16 = sadd.s32 4294967295, %s450_s15   ;;  %p379_p0 = scmp.ge.s32.totalorder %s450_s15, 1  ;;  %s450_s15 = sphi %s479_s15, %s14_s15  }
   0x2   : > { %p162_p1 = scmp.lt.s32.totalorder %s450_s15, 3 }
   0x4   : > { %p163_p2 = pnand %p379_p0, %p162_p1 }
   0x5   : > { %p188_p3 = scmp.lt.s32.totalorder (!%p163_p2), %s375_s16, 1 }
   0x6   : > { %166 = sbr.rel (%p163_p2) target bundleno = 246 (0xf6), region = 36 }
   0xb   : > { %v436_v0 = vld [vmem:[%s530_s1 + $0x38] sm:$0xff]   ;;  %v452_v1 = vmov 0.0   ;;  %v437_v2 = vld [vmem:[%s530_s1 + $0x30] sm:$0xff]   ;;  %vm453_vm0 = vmmov 0   ;;  %v438_v3 = vld [vmem:[%s530_s1 + $0x28] sm:$0xff]   ;;  %s535_s16 = smov (!%p188_p3, %s375_s16), 1 }
   0xc   : > { %406 = vmatprep.subr.bf16.mxu0 %v452_v1  ;;  %422 = vmatprep.mubr.msk.bf16.mxu0 %vm453_vm0, %v452_v1  ;;  %v439_v4 = vld [vmem:[%s530_s1 + $0x20] sm:$0xff]   ;;  %v440_v5 = vld [vmem:[%s530_s1 + $0x18] sm:$0xff]   ;;  %v441_v6 = vld [vmem:[%s530_s1 + $0x10] sm:$0xff]   ;;  %s395_s29 = sshll.u32 %s535_s16, 4 }
   0xd   : > { %407 = vmatpush3.bf16.msra.mxu0 %v436_v0  ;;  %v442_v7 = vld [vmem:[%s530_s1 + $0x8] sm:$0xff]   ;;  %s192_s8 = scalar_lea.vmem %s529_s0, %s395_s29  ;;  %v443_v8 = vld [vmem:[%s530_s1] sm:$0xff]   ;;  %s197_s18 = scalar_lea.vmem %s533_s4, %s395_s29 }
   0xe   : > { %408 = vmatprep.subr.bf16.mxu0 %v452_v1  ;;  %v199_v9 = vld [vmem:[%s192_s8] sm:$0xff]  ;;  %v200_v10 = vld [vmem:[%s192_s8 + $0x8] sm:$0xff] }
   0xf   : > { %v201_v11 = vpack.c.bf16 %v200_v10, %v199_v9  ;;  %v384_v12 = vld [vmem:[%s531_s2] ss:$0 sm:$0xff]  ;;  %v315_v19 = vld [vmem:[%s532_s3 + $0x8] sm:$0xff] }
  0x10   : > { %v314_v14 = vld [vmem:[%s532_s3] sm:$0xff] }
  0x11   : > { %409 = vmatpush3.bf16.msra.mxu0 %v437_v2 }
  0x12   : > { %410 = vmatprep.subr.bf16.mxu0 %v452_v1 }
  0x15   : > { %411 = vmatpush3.bf16.msra.mxu0 %v438_v3 }
  0x16   : > { %412 = vmatprep.subr.bf16.mxu0 %v452_v1 }
  0x19   : > { %413 = vmatpush3.bf16.msra.mxu0 %v439_v4 }
  0x1a   : > { %414 = vmatprep.subr.bf16.mxu0 %v452_v1 }
  0x1d   : > { %415 = vmatpush3.bf16.msra.mxu0 %v440_v5 }
  0x1e   : > { %416 = vmatprep.subr.bf16.mxu0 %v452_v1 }
  0x21   : > { %417 = vmatpush3.bf16.msra.mxu0 %v441_v6 }
  0x22   : > { %418 = vmatprep.subr.bf16.mxu0 %v452_v1 }
  0x25   : > { %419 = vmatpush3.bf16.msra.mxu0 %v442_v7 }
  0x26   : > { %420 = vmatprep.subr.bf16.mxu0 %v452_v1 }
  0x29   : > { %421 = vmatpush3.bf16.msra.mxu0 %v443_v8 }
  0x2c   : > { %423 = vmatmul.mubr.bf16.vlgmr.msra.gmra.mxu0 %v201_v11 }
  0xec   : > { %v307_v13 = vpop.f32.mrf.mxu0 }
  0xed   : > { %v308_v15 = vadd.f32 %v384_v12, %v307_v13 }
  0xee   : > { %v424_v16 = vpop.f32.mrf.mxu0 }
  0xef   : > { %v316_v17 = vadd.f32 %v314_v14, %v308_v15 }
  0xf0   : > { %v310_v18 = vpop.f32.mrf.mxu0 }
  0xf1   : > { %318 = vst [vmem:[%s197_s18] sm:$0xff] %v316_v17  ;;  %v311_v20 = vadd.f32 %v384_v12, %v310_v18 }
  0xf2   : > { %v425_v21 = vpop.f32.mrf.mxu0 }
  0xf3   : > { %v317_v22 = vadd.f32 %v315_v19, %v311_v20 }
  0xf5   : > { %319 = vst [vmem:[%s197_s18 + $0x8] sm:$0xff] %v317_v22 }
  0xf6 PF: > { %s14_s15 = sadd.s32 1, %s450_s15  }
  0xf7   : > { %p11_p4 = scmp.ge.s32.totalorder %s14_s15, 4  }
  0xf9   :  { %13 = sbr.rel (!%p11_p4) target bundleno = 1 (0x1), region = 66 }

// kernel: squeeze.1
= control target key start
LH: loop header
LB: loop body
LE: loop exit
PB: predicated region body
PF: predicated region fallthrough
CT: control target
= control target key end

     0   :  { %s125_s0 = inlined_call_operand.vmem [shape: f32[2,64], index: 0, kind: input, shape index: {}]   ;;  %s126_s1 = inlined_call_operand.hbm [shape: f32[2,8,8], index: 1, kind: output, shape index: {}]  }
   0x1   :  { %v6_v0 = vld [vmem:[%s125_s0] sm:$0x3] }
   0x2   :  { %7 = vst [vmem:[#allocation2] sm:$0x3] %v6_v0 }
   0x3   :  { %2 = vsyncpa [#allocation1], 0  ;;  %s93_s0 = smov 120   ;;  %s94_s8 = smov 104   ;;  %vm9_vm0 = vcmask 64512  }
   0x4   :  { %s95_s9 = smov 112   ;;  %s96_s10 = smov 96  }
   0x5   :  { %s97_s11 = smov 88   ;;  %s98_s12 = smov 80  }
   0x6   :  { %s99_s13 = smov 72   ;;  %s100_s14 = smov [#allocation0]  }
   0x7   :  { %s57_s15 = sshll.u32 %s100_s14, 4  ;;  %s58_s15 = int_to_ptr.vmem [resolvable:$true] %s57_s15 }
   0x8   :  { %s71_s16 = scalar_lea.vmem %s58_s15, 256  ;;  %p76_p1 = scmp.lt.s32.totalorder %s58_s15, %s58_s15 }
   0x9   :  { %v11_v1 = vld [vmem:[#allocation2] sm:$0x3]   ;;  %p72_p0 = scmp.ne.s32.totalorder %s58_s15, %s71_s16  ;;  %p77_p2 = scmp.lt.s32.totalorder %s71_s16, %s71_s16 }
   0xa   :  { %v23_v2 = vld [vmem:[#allocation2] sm:$0x3]   ;;  %12 = vrot.lane.b32.xlu0 %v11_v1, %s93_s0 }
   0xb   :  { %24 = vrot.lane.b32.xlu1 %v23_v2, %s94_s8  ;;  %v17_v3 = vld [vmem:[#allocation2] sm:$0x3]   ;;  %p78_p3 = por %p77_p2, %p76_p1 }
   0xc   :  { %v29_v4 = vld [vmem:[#allocation2] sm:$0x3]  }
   0xd   :  { %v8_v5 = vld [vmem:[#allocation2] sm:$0x3]   ;;  %p79_p4 = pnand %p78_p3, %p72_p0 }
   0xe   :  { %10 = vst.msk [vmem:[#allocation0] ss:$8 sm:$0x3] %vm9_vm0, %v8_v5   ;;  %18 = vrot.lane.b32.xlu0 %v17_v3, %s95_s9  ;;  %v35_v6 = vld [vmem:[#allocation2] sm:$0x3]  }
   0xf   :  { %30 = vrot.lane.b32.xlu1 %v29_v4, %s96_s10  ;;  %v41_v7 = vld [vmem:[#allocation2] sm:$0x3]  }
  0x10   :  { %v47_v8 = vld [vmem:[#allocation2] sm:$0x3]  }
  0x12   :  { %36 = vrot.lane.b32.xlu0 %v35_v6, %s97_s11 }
  0x13   :  { %42 = vrot.lane.b32.xlu1 %v41_v7, %s98_s12 }
  0x16   :  { %48 = vrot.lane.b32.xlu0 %v47_v8, %s99_s13 }
  0x7c   :  { %v13_v9 = vpop.permute.xlu0 %12  }
  0x7d   :  { %v25_v10 = vpop.permute.xlu1 %24   ;;  %16 = vst.msk [vmem:[#allocation0 + $0x1] ss:$8 sm:$0x3] %vm9_vm0, %v13_v9  }
  0x7e   :  { %28 = vst.msk [vmem:[#allocation0 + $0x3] ss:$8 sm:$0x3] %vm9_vm0, %v25_v10  }
  0x80   :  { %v19_v11 = vpop.permute.xlu0 %18  }
  0x81   :  { %v31_v12 = vpop.permute.xlu1 %30   ;;  %22 = vst.msk [vmem:[#allocation0 + $0x2] ss:$8 sm:$0x3] %vm9_vm0, %v19_v11  }
  0x82   :  { %34 = vst.msk [vmem:[#allocation0 + $0x4] ss:$8 sm:$0x3] %vm9_vm0, %v31_v12  }
  0x84   :  { %v37_v13 = vpop.permute.xlu0 %36  }
  0x85   :  { %v43_v14 = vpop.permute.xlu1 %42   ;;  %40 = vst.msk [vmem:[#allocation0 + $0x5] ss:$8 sm:$0x3] %vm9_vm0, %v37_v13  }
  0x86   :  { %46 = vst.msk [vmem:[#allocation0 + $0x6] ss:$8 sm:$0x3] %vm9_vm0, %v43_v14  }
  0x88   :  { %v49_v15 = vpop.permute.xlu0 %48  }
  0x89   :  { %52 = vst.msk [vmem:[#allocation0 + $0x7] ss:$8 sm:$0x3] %vm9_vm0, %v49_v15  }
  0x8a   :  { %82 = shalt.err (!%p79_p4)
}
  0x8b   :  { %60 = dma.vmem_to_hbm [thread:$0]  %s58_s15, 256, %s126_s1, [#allocation1]  }
  0x8c   :  { %91 = dma.done.wait [#allocation1], 256  }
  0x8d   :  { %92 = vsyncadd [#allocation1], 4294967040 }
  0x8e   :  { %62 = vsyncpa [#allocation1], 1 }

// kernel: forward.9
= control target key start
LH: loop header
LB: loop body
LE: loop exit
PB: predicated region body
PF: predicated region fallthrough
CT: control target
= control target key end

     0   :  { %s1264_s30 = smov 0   ;;  %s1266_s10 = smov 0   ;;  %s1435_s0 = inlined_call_operand.vmem [shape: f32[2,80,128], index: 0, kind: input, shape index: {}]   ;;  %s1436_s1 = inlined_call_operand.vmem [shape: f32[1,128], index: 1, kind: input, shape index: {}]   ;;  %s1437_s2 = inlined_call_operand.vmem [shape: f32[1,128], index: 2, kind: input, shape index: {}]   ;;  %s1438_s3 = inlined_call_operand.vmem [shape: bf16[128,128], index: 3, kind: input, shape index: {}]   ;;  %s1439_s4 = inlined_call_operand.vmem [shape: f32[1,128], index: 4, kind: input, shape index: {}]   ;;  %s1440_s5 = inlined_call_operand.vmem [shape: bf16[128,128], index: 5, kind: input, shape index: {}]   ;;  %s1441_s6 = inlined_call_operand.vmem [shape: f32[1,128], index: 6, kind: input, shape index: {}]   ;;  %s1442_s7 = inlined_call_operand.vmem [shape: bf16[256,128], index: 7, kind: input, shape index: {}]   ;;  %s1443_s8 = inlined_call_operand.vmem [shape: f32[1,128], index: 8, kind: input, shape index: {}]   ;;  %s1444_s9 = inlined_call_operand.vmem [shape: f32[2,64,128], index: 9, kind: output, shape index: {}]  }
   0x1   :  { %s1268_s11 = smov 0   ;;  %s1270_s12 = smov 0  }
   0x2   :  { %s1272_s13 = smov 0  }
   0x3 LB: > { %s28_s14 = sadd.s32 1, %s1202_s11  ;;  %s31_s15 = sadd.s32 1, %s1206_s12  ;;  %s1210_s13 = sphi %s1272_s13, %s19_s13   ;;  %s1206_s12 = sphi %s1270_s12, %s1448_s12   ;;  %s1202_s11 = sphi %s1268_s11, %s1447_s11   ;;  %s1198_s10 = sphi %s1266_s10, %s1446_s10   ;;  %s1194_s30 = sphi %s1264_s30, %s1445_s30  }
   0x4   : > { %p29_p0 = scmp.ge.s32.totalorder %s28_s14, 4  ;;  %p958_p1 = scmp.ge.s32.totalorder %s1210_s13, 1 }
   0x5   : > { %p312_p2 = scmp.lt.s32.totalorder %s1210_s13, 9 }
   0x6   : > { %s1450_s14 = smov (%p29_p0, %s28_s14), 0  ;;  %s1452_s15 = smov (!%p29_p0, %s31_s15), %s1206_s12 }
   0x7   : > { %p313_p3 = pnand %p958_p1, %p312_p2  ;;  %p33_p4 = scmp.ge.s32.totalorder %s1452_s15, 2 }
   0x8   : > { %s1294_s16 = sshll.u32 (!%p313_p3), %s1194_s30, 1  ;;  %p359_p5 = scmp.lt.s32.totalorder (!%p313_p3), %s1198_s10, 1 }
   0x9   : > { %s1454_s15 = smov (%p33_p4, %s1452_s15), 0  ;;  %316 = sbr.rel (%p313_p3) target bundleno = 770 (0x302), region = 56 }
   0xa   : > { %s1004_s17 = sadd.s32 (!%p313_p3), 2, %s1294_s16  ;;  %p372_p7 = scmp.lt.s32.totalorder (!%p313_p3), %s1294_s16, 7 }
   0xb   : > { %p361_p6 = scmp.lt.s32.totalorder (!%p313_p3), %s1004_s17, 9 }
   0xe   : > { %s1456_s10 = smov (!%p359_p5, %s1198_s10), 1  ;;  %s1458_s17 = smov (!%p361_p6, %s1004_s17), 9  ;;  %v1128_v2 = vld [vmem:[%s1438_s3 + $0x38] sm:$0xff]   ;;  %v1212_v4 = vmov 0.0   ;;  %v1130_v13 = vld [vmem:[%s1438_s3 + $0x30] sm:$0xff]   ;;  %v1132_v15 = vld [vmem:[%s1438_s3 + $0x28] sm:$0xff]  }
   0xf   : > { %s1085_s18 = smul.u32 10, %s1456_s10  ;;  %v1129_v3 = vld [vmem:[%s1440_s5 + $0x38] sm:$0xff]   ;;  %1045 = vmatprep.subr.bf16.mxu0 %v1212_v4  ;;  %1065 = vmatprep.subr.bf16.mxu1 %v1212_v4  ;;  %v1131_v14 = vld [vmem:[%s1440_s5 + $0x30] sm:$0xff]   ;;  %v1133_v16 = vld [vmem:[%s1440_s5 + $0x28] sm:$0xff]   ;;  %vm1213_vm0 = vmmov 0   ;;  %s1460_s16 = smov (!%p372_p7, %s1294_s16), 7 }
  0x10   : > { %1046 = vmatpush3.bf16.msra.mxu0 %v1128_v2  ;;  %1066 = vmatpush3.bf16.msra.mxu1 %v1129_v3  ;;  %v1134_v17 = vld [vmem:[%s1438_s3 + $0x20] sm:$0xff]   ;;  %v1136_v19 = vld [vmem:[%s1438_s3 + $0x18] sm:$0xff]   ;;  %v1138_v21 = vld [vmem:[%s1438_s3 + $0x10] sm:$0xff]   ;;  %s962_s26 = sshll.u32 %s1456_s10, 3 }
  0x11   : > { %s364_s19 = sadd.s32 %s1085_s18, %s1458_s17  ;;  %1047 = vmatprep.subr.bf16.mxu0 %v1212_v4  ;;  %1067 = vmatprep.subr.bf16.mxu1 %v1212_v4  ;;  %v1135_v18 = vld [vmem:[%s1440_s5 + $0x20] sm:$0xff]   ;;  %v1137_v20 = vld [vmem:[%s1440_s5 + $0x18] sm:$0xff]   ;;  %v1139_v22 = vld [vmem:[%s1440_s5 + $0x10] sm:$0xff]   ;;  %s375_s27 = sadd.s32 %s962_s26, %s1460_s16 }
  0x12   : > { %s960_s20 = sshll.u32 %s364_s19, 3  ;;  %1061 = vmatprep.mubr.msk.bf16.mxu0 %vm1213_vm0, %v1212_v4  ;;  %1081 = vmatprep.mubr.msk.bf16.mxu1 %vm1213_vm0, %v1212_v4  ;;  %v1140_v23 = vld [vmem:[%s1438_s3 + $0x8] sm:$0xff]   ;;  %v1142_v25 = vld [vmem:[%s1438_s3] sm:$0xff]   ;;  %v1144_v44 = vld [vmem:[%s1442_s7 + $0x78] sm:$0xff]   ;;  %s963_s28 = sshll.u32 %s375_s27, 3 }
  0x13   : > { %s366_s23 = scalar_lea.vmem %s1435_s0, %s960_s20  ;;  %v1141_v24 = vld [vmem:[%s1440_s5 + $0x8] sm:$0xff]   ;;  %v1143_v26 = vld [vmem:[%s1440_s5] sm:$0xff]   ;;  %v1145_v45 = vld [vmem:[%s1442_s7 + $0x38] sm:$0xff]   ;;  %s377_s19 = scalar_lea.vmem %s1444_s9, %s963_s28 }
  0x14   : > { %v380_v0 = vld [vmem:[%s366_s23] sm:$0xff]  ;;  %v381_v1 = vld [vmem:[%s366_s23 + $0x8] sm:$0xff]  ;;  %1048 = vmatpush3.bf16.msra.mxu0 %v1130_v13  ;;  %1068 = vmatpush3.bf16.msra.mxu1 %v1131_v14  ;;  %v1146_v46 = vld [vmem:[%s1442_s7 + $0x70] sm:$0xff]  }
  0x15   : > { %384 = vadd.xlane.f32.xlu0 %v380_v0  ;;  %1049 = vmatprep.subr.bf16.mxu0 %v1212_v4  ;;  %v964_v35 = vld [vmem:[%s1436_s1] ss:$0 sm:$0xff]  ;;  %v1147_v47 = vld [vmem:[%s1442_s7 + $0x30] sm:$0xff]   ;;  %v1148_v48 = vld [vmem:[%s1442_s7 + $0x68] sm:$0xff]  }
  0x16   : > { %1069 = vmatprep.subr.bf16.mxu1 %v1212_v4  ;;  %v965_v39 = vld [vmem:[%s1437_s2] ss:$0 sm:$0xff]  ;;  %v1149_v49 = vld [vmem:[%s1442_s7 + $0x28] sm:$0xff]   ;;  %v1152_v52 = vld [vmem:[%s1442_s7 + $0x58] sm:$0xff]  }
  0x17   : > { %v1150_v50 = vld [vmem:[%s1442_s7 + $0x60] sm:$0xff]   ;;  %v1153_v53 = vld [vmem:[%s1442_s7 + $0x18] sm:$0xff]   ;;  %v1154_v54 = vld [vmem:[%s1442_s7 + $0x50] sm:$0xff]  }
  0x18   : > { %1050 = vmatpush3.bf16.msra.mxu0 %v1132_v15  ;;  %1070 = vmatpush3.bf16.msra.mxu1 %v1133_v16  ;;  %v1151_v51 = vld [vmem:[%s1442_s7 + $0x20] sm:$0xff]   ;;  %v1155_v55 = vld [vmem:[%s1442_s7 + $0x10] sm:$0xff]   ;;  %v1156_v56 = vld [vmem:[%s1442_s7 + $0x48] sm:$0xff]  }
  0x19   : > { %386 = vadd.xlane.f32.xlu0 %v381_v1  ;;  %1051 = vmatprep.subr.bf16.mxu0 %v1212_v4  ;;  %v1157_v57 = vld [vmem:[%s1442_s7 + $0x8] sm:$0xff]   ;;  %v1158_v58 = vld [vmem:[%s1442_s7 + $0x40] sm:$0xff]  }
  0x1a   : > { %1071 = vmatprep.subr.bf16.mxu1 %v1212_v4  ;;  %v1159_v59 = vld [vmem:[%s1442_s7] sm:$0xff]  }
  0x1b   : > { %v966_v60 = vld [vmem:[%s1439_s4] ss:$0 sm:$0xff] }
  0x1c   : > { %1052 = vmatpush3.bf16.msra.mxu0 %v1134_v17  ;;  %1072 = vmatpush3.bf16.msra.mxu1 %v1135_v18  ;;  %v975_v61 = vld [vmem:[%s1441_s6] ss:$0 sm:$0xff] }
  0x1d   : > { %1053 = vmatprep.subr.bf16.mxu0 %v1212_v4  ;;  %1073 = vmatprep.subr.bf16.mxu1 %v1212_v4 }
  0x20   : > { %1054 = vmatpush3.bf16.msra.mxu0 %v1136_v19  ;;  %1074 = vmatpush3.bf16.msra.mxu1 %v1137_v20 }
  0x21   : > { %1055 = vmatprep.subr.bf16.mxu0 %v1212_v4  ;;  %1075 = vmatprep.subr.bf16.mxu1 %v1212_v4 }
  0x24   : > { %1056 = vmatpush3.bf16.msra.mxu0 %v1138_v21  ;;  %1076 = vmatpush3.bf16.msra.mxu1 %v1139_v22 }
  0x25   : > { %1057 = vmatprep.subr.bf16.mxu0 %v1212_v4  ;;  %1077 = vmatprep.subr.bf16.mxu1 %v1212_v4 }
  0x28   : > { %1058 = vmatpush3.bf16.msra.mxu0 %v1140_v23  ;;  %1078 = vmatpush3.bf16.msra.mxu1 %v1141_v24 }
  0x29   : > { %1059 = vmatprep.subr.bf16.mxu0 %v1212_v4  ;;  %1079 = vmatprep.subr.bf16.mxu1 %v1212_v4 }
  0x2c   : > { %1060 = vmatpush3.bf16.msra.mxu0 %v1142_v25  ;;  %1080 = vmatpush3.bf16.msra.mxu1 %v1143_v26 }
  0x2d   : > { %1023 = vmatprep.subr.bf16.mxu0 %v1144_v44 }
  0x9e   : > { %v385_v5 = vpop.xlane.xlu0 %384 }
  0x9f   : > { %v389_v6 = vmul.f32 0.0078125, %v385_v5 }
  0xa1   : > { %v391_v7 = vsub.f32 %v380_v0, %v389_v6 }
  0xa2   : > { %v387_v8 = vpop.xlane.xlu0 %386 }
  0xa3   : > { %v390_v9 = vmul.f32 0.0078125, %v387_v8  ;;  %v393_v10 = vmul.f32 %v391_v7, %v391_v7 }
  0xa5   : > { %v392_v11 = vsub.f32 %v381_v1, %v390_v9  ;;  %395 = vadd.xlane.f32.xlu1 %v393_v10 }
  0xa7   : > { %v394_v12 = vmul.f32 %v392_v11, %v392_v11 }
  0xa9   : > { %397 = vadd.xlane.f32.xlu1 %v394_v12 }
 0x12e   : > { %v396_v27 = vpop.xlane.xlu1 %395 }
 0x12f   : > { %v399_v28 = vmul.f32 0.0078125, %v396_v27 }
 0x131   : > { %v401_v29 = vadd.f32 1e-06, %v399_v28 }
 0x132   : > { %v398_v30 = vpop.xlane.xlu1 %397 }
 0x133   : > { %1160 = vrsqrt.f32 %v401_v29  ;;  %v400_v31 = vmul.f32 0.0078125, %v398_v30 }
 0x135   : > { %v402_v32 = vadd.f32 1e-06, %v400_v31 }
 0x137   : > { %1162 = vrsqrt.f32 %v402_v32 }
 0x140   : > { %v1161_v33 = vpop.eup %1160 }
 0x141   : > { %v405_v34 = vmul.f32 %v1161_v33, %v391_v7 }
 0x143   : > { %v413_v38 = vmul.f32 %v964_v35, %v405_v34 }
 0x144   : > { %v1163_v36 = vpop.eup %1162 }
 0x145   : > { %v406_v37 = vmul.f32 %v1163_v36, %v392_v11  ;;  %v421_v41 = vadd.f32 %v965_v39, %v413_v38 }
 0x147   : > { %v414_v40 = vmul.f32 %v964_v35, %v406_v37 }
 0x149   : > { %v422_v42 = vadd.f32 %v965_v39, %v414_v40 }
 0x14b   : > { %v423_v43 = vpack.c.bf16 %v422_v42, %v421_v41 }
 0x14d   : > { %1062 = vmatmul.mubr.bf16.vlgmr.msra.gmra.mxu0 %v423_v43  ;;  %1082 = vmatmul.mubr.bf16.vlgmr.msra.gmra.mxu1 %v423_v43 }
 0x14e   : > { %1024 = vmatpush3.bf16.msra.mxu0 %v1145_v45 }
 0x14f   : > { %1025 = vmatprep.subr.bf16.mxu0 %v1146_v46 }
 0x152   : > { %1026 = vmatpush3.bf16.msra.mxu0 %v1147_v47 }
 0x153   : > { %1027 = vmatprep.subr.bf16.mxu0 %v1148_v48 }
 0x156   : > { %1028 = vmatpush3.bf16.msra.mxu0 %v1149_v49  ;;  %v984_v49 = vld [vmem:[%s1443_s8] ss:$0 sm:$0xff] }
 0x157   : > { %1029 = vmatprep.subr.bf16.mxu0 %v1150_v50 }
 0x15a   : > { %1030 = vmatpush3.bf16.msra.mxu0 %v1151_v51 }
 0x15b   : > { %1031 = vmatprep.subr.bf16.mxu0 %v1152_v52 }
 0x15e   : > { %1032 = vmatpush3.bf16.msra.mxu0 %v1153_v53 }
 0x15f   : > { %1033 = vmatprep.subr.bf16.mxu0 %v1154_v54 }
 0x162   : > { %1034 = vmatpush3.bf16.msra.mxu0 %v1155_v55 }
 0x163   : > { %1035 = vmatprep.subr.bf16.mxu0 %v1156_v56 }
 0x166   : > { %1036 = vmatpush3.bf16.msra.mxu0 %v1157_v57 }
 0x167   : > { %1037 = vmatprep.subr.bf16.mxu0 %v1158_v58 }
 0x16a   : > { %1038 = vmatpush3.bf16.msra.mxu0 %v1159_v59 }
 0x20d   : > { %v529_v62 = vpop.f32.mrf.mxu0  ;;  %v659_v63 = vpop.f32.mrf.mxu1 }
 0x20e   : > { %v530_v0 = vadd.f32 %v966_v60, %v529_v62  ;;  %v660_v1 = vadd.f32 %v975_v61, %v659_v63 }
 0x20f   : > { %v1063_v2 = vpop.f32.mrf.mxu0  ;;  %v1083_v3 = vpop.f32.mrf.mxu1 }
 0x210   : > { %v536_v4 = vmul.f32 %v530_v0, %v530_v0  ;;  %v666_v5 = vmul.f32 %v660_v1, %v660_v1 }
 0x211   : > { %v532_v6 = vpop.f32.mrf.mxu0  ;;  %v662_v7 = vpop.f32.mrf.mxu1 }
 0x212   : > { %v538_v8 = vmul.f32 %v536_v4, %v530_v0  ;;  %v668_v9 = vmul.f32 %v666_v5, %v660_v1  ;;  %v533_v10 = vadd.f32 %v966_v60, %v532_v6  ;;  %v663_v11 = vadd.f32 %v975_v61, %v662_v7 }
 0x213   : > { %v1064_v12 = vpop.f32.mrf.mxu0  ;;  %v1084_v13 = vpop.f32.mrf.mxu1 }
 0x214   : > { %v540_v14 = vmul.f32 0.044715, %v538_v8  ;;  %v670_v15 = vmul.f32 0.044715, %v668_v9  ;;  %v537_v16 = vmul.f32 %v533_v10, %v533_v10  ;;  %v667_v17 = vmul.f32 %v663_v11, %v663_v11 }
 0x216   : > { %v542_v18 = vadd.f32 %v540_v14, %v530_v0  ;;  %v672_v19 = vadd.f32 %v670_v15, %v660_v1  ;;  %v539_v20 = vmul.f32 %v537_v16, %v533_v10  ;;  %v669_v21 = vmul.f32 %v667_v17, %v663_v11 }
 0x218   : > { %v544_v22 = vmul.f32 0.7978846, %v542_v18  ;;  %v674_v23 = vmul.f32 0.7978846, %v672_v19  ;;  %v541_v24 = vmul.f32 0.044715, %v539_v20 }
 0x219   : > { %v671_v25 = vmul.f32 0.044715, %v669_v21 }
 0x21a   : > { %1164 = vtanh.f32 %v544_v22  ;;  %v543_v26 = vadd.f32 %v541_v24, %v533_v10 }
 0x21b   : > { %1166 = vtanh.f32 %v674_v23  ;;  %v673_v27 = vadd.f32 %v671_v25, %v663_v11 }
 0x21c   : > { %v545_v28 = vmul.f32 0.7978846, %v543_v26 }
 0x21d   : > { %v675_v29 = vmul.f32 0.7978846, %v673_v27 }
 0x21e   : > { %1168 = vtanh.f32 %v545_v28 }
 0x21f   : > { %1170 = vtanh.f32 %v675_v29 }
 0x227   : > { %v1165_v30 = vpop.eup %1164 }
 0x228   : > { %v1167_v31 = vpop.eup %1166  ;;  %v548_v32 = vadd.f32 1.0, %v1165_v30 }
 0x229   : > { %v678_v33 = vadd.f32 1.0, %v1167_v31 }
 0x22a   : > { %v550_v36 = vmul.f32 0.5, %v548_v32 }
 0x22b   : > { %v1169_v34 = vpop.eup %1168  ;;  %v680_v39 = vmul.f32 0.5, %v678_v33 }
 0x22c   : > { %v1171_v35 = vpop.eup %1170  ;;  %v549_v37 = vadd.f32 1.0, %v1169_v34  ;;  %v552_v42 = vmul.f32 %v550_v36, %v530_v0 }
 0x22d   : > { %v679_v38 = vadd.f32 1.0, %v1171_v35  ;;  %v682_v44 = vmul.f32 %v680_v39, %v660_v1 }
 0x22e   : > { %v551_v40 = vmul.f32 0.5, %v549_v37 }
 0x22f   : > { %v681_v41 = vmul.f32 0.5, %v679_v38 }
 0x230   : > { %v553_v43 = vmul.f32 %v551_v40, %v533_v10 }
 0x231   : > { %v683_v45 = vmul.f32 %v681_v41, %v663_v11 }
 0x232   : > { %v684_v46 = vpack.c.bf16 %v553_v43, %v552_v42 }
 0x233   : > { %v685_v47 = vpack.c.bf16 %v683_v45, %v682_v44 }
 0x235   : > { %853 = vmatprep.mubr.bf16.mxu0 %v685_v47 }
 0x236   : > { %854 = vmatmul.mubr.bf16.vlgmr.msra.gmra.mxu0 %v684_v46 }
 0x2f6   : > { %v1039_v48 = vpop.f32.mrf.mxu0 }
 0x2f8   : > { %v1040_v50 = vpop.f32.mrf.mxu0 }
 0x2f9   : > { %v1041_v51 = vadd.f32 %v1040_v50, %v1039_v48 }
 0x2fa   : > { %v1042_v52 = vpop.f32.mrf.mxu0 }
 0x2fb   : > { %v856_v53 = vadd.f32 %v1041_v51, %v984_v49 }
 0x2fc   : > { %v1043_v54 = vpop.f32.mrf.mxu0 }
 0x2fd   : > { %862 = vst [vmem:[%s377_s19] sm:$0xff] %v856_v53  ;;  %v1044_v55 = vadd.f32 %v1043_v54, %v1042_v52 }
 0x2ff   : > { %v859_v56 = vadd.f32 %v1044_v55, %v984_v49 }
 0x301   : > { %863 = vst [vmem:[%s377_s19 + $0x8] sm:$0xff] %v859_v56 }
 0x302 PF: > { %s19_s13 = sadd.s32 1, %s1210_s13   ;;  %s1445_s30 = smov %s1202_s11 }
 0x303   : > { %p16_p8 = scmp.ge.s32.totalorder %s19_s13, 10   ;;  %s1446_s10 = smov %s1206_s12 }
 0x304   : > { %s1447_s11 = smov %s1450_s14  ;;  %s1448_s12 = smov %s1454_s15 }
 0x305   :  { %18 = sbr.rel (!%p16_p8) target bundleno = 3 (0x3), region = 86 }

// kernel: forward.7
= control target key start
LH: loop header
LB: loop body
LE: loop exit
PB: predicated region body
PF: predicated region fallthrough
CT: control target
= control target key end

     0   :  { %s5490_s0 = inlined_call_operand.vmem [shape: f32[2,80,128], index: 0, kind: input, shape index: {}]   ;;  %s5491_s1 = inlined_call_operand.vmem [shape: f32[1,128], index: 1, kind: input, shape index: {}]   ;;  %s5492_s2 = inlined_call_operand.vmem [shape: f32[1,128], index: 2, kind: input, shape index: {}]   ;;  %s5493_s3 = inlined_call_operand.vmem [shape: bf16[2,128,64], index: 3, kind: input, shape index: {}]   ;;  %s5494_s4 = inlined_call_operand.vmem [shape: f32[2,1,64], index: 4, kind: input, shape index: {}]   ;;  %s5495_s5 = inlined_call_operand.vmem [shape: bf16[2,128,64], index: 5, kind: input, shape index: {}]   ;;  %s5496_s6 = inlined_call_operand.vmem [shape: f32[2,1,64], index: 6, kind: input, shape index: {}]   ;;  %s5497_s7 = inlined_call_operand.vmem [shape: bf16[2,128,64], index: 7, kind: input, shape index: {}]   ;;  %s5498_s8 = inlined_call_operand.vmem [shape: f32[2,1,64], index: 8, kind: input, shape index: {}]   ;;  %s5499_s9 = inlined_call_operand.vmem [shape: bf16[2,64,128], index: 9, kind: input, shape index: {}]   ;;  %s5500_s10 = inlined_call_operand.vmem [shape: f32[1,128], index: 10, kind: input, shape index: {}]   ;;  %s5501_s11 = inlined_call_operand.vmem [shape: f32[1,128], index: 11, kind: input, shape index: {}]   ;;  %s5502_s12 = inlined_call_operand.vmem [shape: f32[1,128], index: 12, kind: input, shape index: {}]   ;;  %s5503_s13 = inlined_call_operand.vmem [shape: f32[1,128], index: 13, kind: input, shape index: {}]   ;;  %s5504_s14 = inlined_call_operand.vmem [shape: bf16[128,512], index: 14, kind: input, shape index: {}]   ;;  %s5505_s15 = inlined_call_operand.vmem [shape: f32[1,512], index: 15, kind: input, shape index: {}]   ;;  %s5506_s16 = inlined_call_operand.vmem [shape: bf16[512,128], index: 16, kind: input, shape index: {}]   ;;  %s5507_s17 = inlined_call_operand.vmem [shape: f32[1,128], index: 17, kind: input, shape index: {}]   ;;  %s5508_s18 = inlined_call_operand.vmem [shape: f32[1,128], index: 18, kind: input, shape index: {}]   ;;  %s5509_s19 = inlined_call_operand.vmem [shape: f32[2,80,128], index: 19, kind: output, shape index: {}]  }
   0x1   :  { %5536 = sst [smem:[#allocation32_spill]] %s5490_s0  ;;  %s4239_s0 = smov 0  }
   0x2   :  { %5537 = sst [smem:[#allocation33_spill]] %s5491_s1 }
   0x3   :  { %5538 = sst [smem:[#allocation34_spill]] %s5492_s2 }
   0x4   :  { %5539 = sst [smem:[#allocation35_spill]] %s5493_s3 }
   0x5 LB: > { %s3278_s30 = sadd.s32 4294967295, %s4129_s0   ;;  %p3282_p0 = scmp.ge.s32.totalorder %s4129_s0, 1  ;;  %s4129_s0 = sphi %s4239_s0, %s29_s0  }
   0x6   : > { %p537_p1 = scmp.lt.s32.totalorder %s4129_s0, 3 }
   0x8   : > { %p538_p2 = pnand %p3282_p0, %p537_p1 }
   0xa   : > { %541 = sbr.rel (%p538_p2) target bundleno = 2411 (0x96b), region = 96 }
   0xf   : > { %p593_p3 = scmp.lt.s32.totalorder %s3278_s30, 1  ;;  %s5540_s22 = sld [smem:[#allocation32_spill]]  ;;  %v4135_v50 = vmov 0.0  }
  0x10   : > { %809 = vst [vmem:[#allocation3 + $0x30] sm:$0xff] %v4135_v50  ;;  %810 = vst [vmem:[#allocation3] sm:$0xff] %v4135_v50  ;;  %s5541_s27 = sld [smem:[#allocation33_spill]] }
  0x11   : > { %s5603_s30 = smov (!%p593_p3, %s3278_s30), 1  ;;  %811 = vst [vmem:[#allocation3 + $0x18] sm:$0xff] %v4135_v50  ;;  %812 = vst [vmem:[#allocation3 + $0x10] sm:$0xff] %v4135_v50 }
  0x12   : > { %s3825_s20 = smul.u32 80, %s5603_s30  ;;  %813 = vst [vmem:[#allocation3 + $0x48] sm:$0xff] %v4135_v50  ;;  %814 = vst [vmem:[#allocation3 + $0x28] sm:$0xff] %v4135_v50  ;;  %s5542_s30 = sld [smem:[#allocation34_spill]] }
  0x13   : > { %815 = vst [vmem:[#allocation3 + $0x8] sm:$0xff] %v4135_v50  ;;  %816 = vst [vmem:[#allocation3 + $0x20] sm:$0xff] %v4135_v50 }
  0x14   : > { %s4255_s25 = scalar_lea.vmem %s5509_s19, %s3825_s20  ;;  %817 = vst [vmem:[#allocation3 + $0x40] sm:$0xff] %v4135_v50  ;;  %818 = vst [vmem:[#allocation3 + $0x38] sm:$0xff] %v4135_v50 }
  0x15   : > { %s4250_s2 = scalar_lea.vmem %s5540_s22, %s3825_s20  ;;  %s4323_s20 = smov 0  }
  0x16   : > { %v604_v0 = vld [vmem:[%s4250_s2] sm:$0xff]  ;;  %v606_v1 = vld [vmem:[%s4250_s2 + $0x10] sm:$0xff]  ;;  %v605_v2 = vld [vmem:[%s4250_s2 + $0x8] sm:$0xff] }
  0x17   : > { %616 = vadd.xlane.f32.xlu0 %v604_v0  ;;  %620 = vadd.xlane.f32.xlu1 %v606_v1  ;;  %v607_v3 = vld [vmem:[%s4250_s2 + $0x18] sm:$0xff]  ;;  %v608_v4 = vld [vmem:[%s4250_s2 + $0x20] sm:$0xff]  ;;  %v609_v5 = vld [vmem:[%s4250_s2 + $0x28] sm:$0xff] }
  0x18   : > { %v610_v6 = vld [vmem:[%s4250_s2 + $0x30] sm:$0xff]  ;;  %v611_v7 = vld [vmem:[%s4250_s2 + $0x38] sm:$0xff]  ;;  %v612_v8 = vld [vmem:[%s4250_s2 + $0x40] sm:$0xff] }
  0x19   : > { %v613_v9 = vld [vmem:[%s4250_s2 + $0x48] sm:$0xff] }
  0x1b   : > { %618 = vadd.xlane.f32.xlu0 %v605_v2  ;;  %622 = vadd.xlane.f32.xlu1 %v607_v3 }
  0x1f   : > { %624 = vadd.xlane.f32.xlu0 %v608_v4  ;;  %626 = vadd.xlane.f32.xlu1 %v609_v5 }
  0x23   : > { %628 = vadd.xlane.f32.xlu0 %v610_v6  ;;  %630 = vadd.xlane.f32.xlu1 %v611_v7 }
  0x27   : > { %632 = vadd.xlane.f32.xlu0 %v612_v8  ;;  %634 = vadd.xlane.f32.xlu1 %v613_v9 }
  0xa0   : > { %v617_v10 = vpop.xlane.xlu0 %616  ;;  %v621_v11 = vpop.xlane.xlu1 %620 }
  0xa1   : > { %v637_v12 = vmul.f32 0.0078125, %v617_v10  ;;  %v639_v13 = vmul.f32 0.0078125, %v621_v11 }
  0xa3   : > { %v4267_v14 = vsub.f32 %v604_v0, %v637_v12  ;;  %v4269_v15 = vsub.f32 %v606_v1, %v639_v13 }
  0xa4   : > { %v619_v16 = vpop.xlane.xlu0 %618  ;;  %v623_v17 = vpop.xlane.xlu1 %622 }
  0xa5   : > { %v638_v18 = vmul.f32 0.0078125, %v619_v16  ;;  %v657_v19 = vmul.f32 %v4267_v14, %v4267_v14  ;;  %v640_v20 = vmul.f32 0.0078125, %v623_v17  ;;  %v659_v23 = vmul.f32 %v4269_v15, %v4269_v15 }
  0xa7   : > { %v4273_v21 = vsub.f32 %v605_v2, %v638_v18  ;;  %667 = vadd.xlane.f32.xlu0 %v657_v19  ;;  %v4275_v22 = vsub.f32 %v607_v3, %v640_v20  ;;  %v3285_v18 = vld [vmem:[%s5541_s27] ss:$0 sm:$0xff] }
  0xa8   : > { %v625_v24 = vpop.xlane.xlu0 %624  ;;  %v627_v25 = vpop.xlane.xlu1 %626 }
  0xa9   : > { %v641_v26 = vmul.f32 0.0078125, %v625_v24  ;;  %v658_v27 = vmul.f32 %v4273_v21, %v4273_v21  ;;  %v642_v28 = vmul.f32 0.0078125, %v627_v25  ;;  %v660_v31 = vmul.f32 %v4275_v22, %v4275_v22 }
  0xab   : > { %v4281_v29 = vsub.f32 %v608_v4, %v641_v26  ;;  %671 = vadd.xlane.f32.xlu0 %v659_v23  ;;  %669 = vadd.xlane.f32.xlu1 %v658_v27  ;;  %v4283_v30 = vsub.f32 %v609_v5, %v642_v28 }
  0xac   : > { %v629_v32 = vpop.xlane.xlu0 %628  ;;  %v631_v33 = vpop.xlane.xlu1 %630 }
  0xad   : > { %v643_v34 = vmul.f32 0.0078125, %v629_v32  ;;  %v661_v35 = vmul.f32 %v4281_v29, %v4281_v29  ;;  %v644_v36 = vmul.f32 0.0078125, %v631_v33  ;;  %v662_v39 = vmul.f32 %v4283_v30, %v4283_v30 }
  0xaf   : > { %v4289_v37 = vsub.f32 %v610_v6, %v643_v34  ;;  %673 = vadd.xlane.f32.xlu1 %v660_v31  ;;  %675 = vadd.xlane.f32.xlu0 %v661_v35  ;;  %v4291_v38 = vsub.f32 %v611_v7, %v644_v36 }
  0xb0   : > { %v633_v40 = vpop.xlane.xlu0 %632  ;;  %v635_v41 = vpop.xlane.xlu1 %634 }
  0xb1   : > { %v645_v42 = vmul.f32 0.0078125, %v633_v40  ;;  %v663_v43 = vmul.f32 %v4289_v37, %v4289_v37  ;;  %v646_v44 = vmul.f32 0.0078125, %v635_v41  ;;  %v664_v47 = vmul.f32 %v4291_v38, %v4291_v38 }
  0xb3   : > { %v4297_v45 = vsub.f32 %v612_v8, %v645_v42  ;;  %677 = vadd.xlane.f32.xlu1 %v662_v39  ;;  %679 = vadd.xlane.f32.xlu0 %v663_v43  ;;  %v4299_v46 = vsub.f32 %v613_v9, %v646_v44 }
  0xb5   : > { %v665_v48 = vmul.f32 %v4297_v45, %v4297_v45  ;;  %v666_v49 = vmul.f32 %v4299_v46, %v4299_v46 }
  0xb7   : > { %681 = vadd.xlane.f32.xlu1 %v664_v47  ;;  %683 = vadd.xlane.f32.xlu0 %v665_v48 }
  0xbb   : > { %685 = vadd.xlane.f32.xlu1 %v666_v49 }
 0x130   : > { %v668_v51 = vpop.xlane.xlu0 %667 }
 0x131   : > { %v687_v52 = vmul.f32 0.0078125, %v668_v51 }
 0x133   : > { %v697_v53 = vadd.f32 1e-06, %v687_v52 }
 0x134   : > { %v670_v54 = vpop.xlane.xlu1 %669  ;;  %v672_v55 = vpop.xlane.xlu0 %671 }
 0x135   : > { %3846 = vrsqrt.f32 %v697_v53  ;;  %v688_v56 = vmul.f32 0.0078125, %v670_v54  ;;  %v689_v57 = vmul.f32 0.0078125, %v672_v55 }
 0x137   : > { %v698_v58 = vadd.f32 1e-06, %v688_v56  ;;  %v699_v59 = vadd.f32 1e-06, %v689_v57 }
 0x138   : > { %v674_v60 = vpop.xlane.xlu1 %673  ;;  %v676_v61 = vpop.xlane.xlu0 %675 }
 0x139   : > { %3848 = vrsqrt.f32 %v698_v58  ;;  %v690_v62 = vmul.f32 0.0078125, %v674_v60  ;;  %v691_v63 = vmul.f32 0.0078125, %v676_v61 }
 0x13a   : > { %3850 = vrsqrt.f32 %v699_v59 }
 0x13b   : > { %v700_v0 = vadd.f32 1e-06, %v690_v62  ;;  %v701_v1 = vadd.f32 1e-06, %v691_v63 }
 0x13c   : > { %v678_v2 = vpop.xlane.xlu1 %677  ;;  %v680_v3 = vpop.xlane.xlu0 %679 }
 0x13d   : > { %3852 = vrsqrt.f32 %v700_v0  ;;  %v692_v4 = vmul.f32 0.0078125, %v678_v2  ;;  %v693_v5 = vmul.f32 0.0078125, %v680_v3 }
 0x13e   : > { %3854 = vrsqrt.f32 %v701_v1 }
 0x13f   : > { %v702_v6 = vadd.f32 1e-06, %v692_v4  ;;  %v703_v7 = vadd.f32 1e-06, %v693_v5 }
 0x140   : > { %v682_v8 = vpop.xlane.xlu1 %681  ;;  %v684_v9 = vpop.xlane.xlu0 %683 }
 0x141   : > { %3856 = vrsqrt.f32 %v702_v6  ;;  %v694_v10 = vmul.f32 0.0078125, %v682_v8  ;;  %v695_v11 = vmul.f32 0.0078125, %v684_v9 }
 0x142   : > { %v3847_v12 = vpop.eup %3846  ;;  %3858 = vrsqrt.f32 %v703_v7 }
 0x143   : > { %v717_v13 = vmul.f32 %v3847_v12, %v4267_v14  ;;  %v704_v16 = vadd.f32 1e-06, %v694_v10  ;;  %v705_v17 = vadd.f32 1e-06, %v695_v11  ;;  %v3286_v14 = vld [vmem:[%s5542_s30] ss:$0 sm:$0xff] }
 0x144   : > { %v686_v19 = vpop.xlane.xlu1 %685 }
 0x145   : > { %3860 = vrsqrt.f32 %v704_v16  ;;  %v696_v20 = vmul.f32 0.0078125, %v686_v19  ;;  %v733_v25 = vmul.f32 %v3285_v18, %v717_v13 }
 0x146   : > { %v3849_v23 = vpop.eup %3848  ;;  %3862 = vrsqrt.f32 %v705_v17 }
 0x147   : > { %v3851_v24 = vpop.eup %3850  ;;  %v718_v26 = vmul.f32 %v3849_v23, %v4273_v21  ;;  %v706_v27 = vadd.f32 1e-06, %v696_v20  ;;  %v749_v34 = vadd.f32 %v3286_v14, %v733_v25 }
 0x148   : > { %v719_v28 = vmul.f32 %v3851_v24, %v4269_v15 }
 0x149   : > { %v734_v31 = vmul.f32 %v3285_v18, %v718_v26  ;;  %3864 = vrsqrt.f32 %v706_v27 }
 0x14a   : > { %v3853_v32 = vpop.eup %3852  ;;  %v735_v36 = vmul.f32 %v3285_v18, %v719_v28 }
 0x14b   : > { %v3855_v33 = vpop.eup %3854  ;;  %v750_v35 = vadd.f32 %v3286_v14, %v734_v31  ;;  %v720_v39 = vmul.f32 %v3853_v32, %v4275_v22 }
 0x14c   : > { %v721_v40 = vmul.f32 %v3855_v33, %v4281_v29  ;;  %v751_v44 = vadd.f32 %v3286_v14, %v735_v36 }
 0x14d   : > { %v3443_v41 = vpack.c.bf16 %v750_v35, %v749_v34  ;;  %v736_v21 = vmul.f32 %v3285_v18, %v720_v39 }
 0x14e   : > { %v3857_v42 = vpop.eup %3856  ;;  %v737_v48 = vmul.f32 %v3285_v18, %v721_v40 }
 0x14f   : > { %v3859_v43 = vpop.eup %3858  ;;  %3444 = vst [vmem:[#allocation2] sm:$0xff] %v3443_v41   ;;  %v752_v47 = vadd.f32 %v3286_v14, %v736_v21  ;;  %v722_v15 = vmul.f32 %v3857_v42, %v4283_v30 }
 0x150   : > { %v723_v49 = vmul.f32 %v3859_v43, %v4289_v37  ;;  %v753_v22 = vadd.f32 %v3286_v14, %v737_v48 }
 0x151   : > { %v3448_v50 = vpack.c.bf16 %v752_v47, %v751_v44  ;;  %v738_v51 = vmul.f32 %v3285_v18, %v722_v15 }
 0x152   : > { %v3861_v52 = vpop.eup %3860  ;;  %v739_v29 = vmul.f32 %v3285_v18, %v723_v49 }
 0x153   : > { %v3863_v53 = vpop.eup %3862  ;;  %3465 = vst [vmem:[#allocation2 + $0x8] sm:$0xff] %v3448_v50   ;;  %v754_v54 = vadd.f32 %v3286_v14, %v738_v51  ;;  %v724_v55 = vmul.f32 %v3861_v52, %v4291_v38 }
 0x154   : > { %v725_v56 = vmul.f32 %v3863_v53, %v4297_v45  ;;  %v755_v60 = vadd.f32 %v3286_v14, %v739_v29 }
 0x155   : > { %v3453_v57 = vpack.c.bf16 %v754_v54, %v753_v22  ;;  %v740_v58 = vmul.f32 %v3285_v18, %v724_v55 }
 0x156   : > { %v3865_v59 = vpop.eup %3864  ;;  %v741_v61 = vmul.f32 %v3285_v18, %v725_v56 }
 0x157   : > { %3466 = vst [vmem:[#allocation2 + $0x10] sm:$0xff] %v3453_v57   ;;  %v756_v30 = vadd.f32 %v3286_v14, %v740_v58  ;;  %v726_v37 = vmul.f32 %v3865_v59, %v4299_v46 }
 0x158   : > { %v757_v0 = vadd.f32 %v3286_v14, %v741_v61 }
 0x159   : > { %v3458_v62 = vpack.c.bf16 %v756_v30, %v755_v60  ;;  %v742_v63 = vmul.f32 %v3285_v18, %v726_v37 }
 0x15b   : > { %3467 = vst [vmem:[#allocation2 + $0x18] sm:$0xff] %v3458_v62   ;;  %v758_v1 = vadd.f32 %v3286_v14, %v742_v63 }
 0x15d   : > { %v3463_v2 = vpack.c.bf16 %v758_v1, %v757_v0 }
 0x15f   : > { %3468 = vst [vmem:[#allocation2 + $0x20] sm:$0xff] %v3463_v2  }
 0x160 LB: >> { %v4136_v38 = vmov 0.0   ;;  %vm4137_vm0 = vmmov 0   ;;  %s3436_s21 = sshll.u32 %s4133_s20, 6  ;;  %s5543_s26 = sld [smem:[#allocation35_spill]]  ;;  %v4375_v17 = vld [vmem:[#allocation2] sm:$0xff]   ;;  %v4385_v20 = vld [vmem:[#allocation2 + $0x8] sm:$0xff]   ;;  %s4133_s20 = sphi %s4323_s20, %s824_s20  }
 0x161   : >> { %3665 = vmatprep.subr.bf16.mxu1 %v4136_v38  ;;  %3681 = vmatprep.mubr.msk.bf16.mxu1 %vm4137_vm0, %v4136_v38  ;;  %s4338_s23 = scalar_lea.vmem %s5495_s5, %s3436_s21  ;;  %s4360_s30 = scalar_lea.vmem %s5497_s7, %s3436_s21  ;;  %v4395_v23 = vld [vmem:[#allocation2 + $0x10] sm:$0xff]   ;;  %vm1322_vm1 = vcmask 523264   ;;  %vm1426_vm2 = vcmask 654336  }
 0x162   : >> { %3629 = vmatprep.subr.bf16.mxu0 %v4136_v38  ;;  %3645 = vmatprep.mubr.msk.bf16.mxu0 %vm4137_vm0, %v4136_v38  ;;  %v3866_v45 = vld [vmem:[%s4338_s23 + $0x38] sm:$0xff]   ;;  %v3867_v46 = vld [vmem:[%s4338_s23 + $0x30] sm:$0xff]   ;;  %v3868_v3 = vld [vmem:[%s4338_s23 + $0x28] sm:$0xff]   ;;  %s1036_s22 = scalar_lea.vmem %s5496_s6, %s4133_s20  ;;  %s854_s3 = scalar_lea.vmem %s5494_s4, %s4133_s20 }
 0x163   : >> { %3666 = vmatpush3.bf16.msra.mxu1 %v3866_v45  ;;  %v3869_v4 = vld [vmem:[%s4338_s23 + $0x20] sm:$0xff]   ;;  %v3870_v7 = vld [vmem:[%s4338_s23 + $0x18] sm:$0xff]   ;;  %v3871_v9 = vld [vmem:[%s4338_s23 + $0x10] sm:$0xff]   ;;  %s1188_s28 = scalar_lea.vmem %s5498_s8, %s4133_s20  ;;  %s3439_s29 = sshll.u32 %s4133_s20, 5 }
 0x164   : >> { %3667 = vmatprep.subr.bf16.mxu1 %v4136_v38  ;;  %v3872_v11 = vld [vmem:[%s4338_s23 + $0x8] sm:$0xff]   ;;  %v3873_v13 = vld [vmem:[%s4338_s23] sm:$0xff]   ;;  %v4403_v24 = vld [vmem:[#allocation2 + $0x18] sm:$0xff]   ;;  %s1647_s1 = scalar_lea.vmem %s5499_s9, %s3439_s29  ;;  %s824_s20 = sadd.s32 1, %s4133_s20  }
 0x165   : >> { %v3887_v26 = vld [vmem:[%s4360_s30 + $0x38] sm:$0xff]   ;;  %v3888_v27 = vld [vmem:[%s4360_s30 + $0x30] sm:$0xff]   ;;  %v3889_v14 = vld [vmem:[%s4360_s30 + $0x28] sm:$0xff]   ;;  %p821_p4 = scmp.ge.s32.totalorder %s824_s20, 2  }
 0x166   : >> { %s4348_s27 = scalar_lea.vmem %s5543_s26, %s3436_s21  ;;  %v4411_v25 = vld [vmem:[#allocation2 + $0x20] sm:$0xff]   ;;  %v3891_v31 = vld [vmem:[%s4360_s30 + $0x18] sm:$0xff]   ;;  %v3892_v35 = vld [vmem:[%s4360_s30 + $0x10] sm:$0xff]  }
 0x167   : >> { %3668 = vmatpush3.bf16.msra.mxu1 %v3867_v46  ;;  %v3879_v5 = vld [vmem:[%s4348_s27 + $0x38] sm:$0xff]   ;;  %v3880_v6 = vld [vmem:[%s4348_s27 + $0x30] sm:$0xff]   ;;  %v3881_v8 = vld [vmem:[%s4348_s27 + $0x28] sm:$0xff]  }
 0x168   : >> { %3669 = vmatprep.subr.bf16.mxu1 %v4136_v38  ;;  %3630 = vmatpush3.bf16.msra.mxu0 %v3879_v5  ;;  %v3882_v10 = vld [vmem:[%s4348_s27 + $0x20] sm:$0xff]   ;;  %v3883_v12 = vld [vmem:[%s4348_s27 + $0x18] sm:$0xff]   ;;  %v3884_v16 = vld [vmem:[%s4348_s27 + $0x10] sm:$0xff]  }
 0x169   : >> { %3631 = vmatprep.subr.bf16.mxu0 %v4136_v38  ;;  %v3885_v18 = vld [vmem:[%s4348_s27 + $0x8] sm:$0xff]   ;;  %v3886_v19 = vld [vmem:[%s4348_s27] sm:$0xff]  }
 0x16a   : >> { %v3890_v28 = vld [vmem:[%s4360_s30 + $0x20] sm:$0xff]   ;;  %v3893_v42 = vld [vmem:[%s4360_s30 + $0x8] sm:$0xff]  }
 0x16b   : >> { %3670 = vmatpush3.bf16.msra.mxu1 %v3868_v3  ;;  %v4435_v33 = vld [vmem:[%s1036_s22] ss:$0 sm:$0xff] }
 0x16c   : >> { %3671 = vmatprep.subr.bf16.mxu1 %v4136_v38  ;;  %3632 = vmatpush3.bf16.msra.mxu0 %v3880_v6  ;;  %v3894_v48 = vld [vmem:[%s4360_s30] sm:$0xff]  }
 0x16d   : >> { %3633 = vmatprep.subr.bf16.mxu0 %v4136_v38 }
 0x16f   : >> { %3672 = vmatpush3.bf16.msra.mxu1 %v3869_v4 }
 0x170   : >> { %3673 = vmatprep.subr.bf16.mxu1 %v4136_v38  ;;  %3634 = vmatpush3.bf16.msra.mxu0 %v3881_v8 }
 0x171   : >> { %3635 = vmatprep.subr.bf16.mxu0 %v4136_v38 }
 0x173   : >> { %3674 = vmatpush3.bf16.msra.mxu1 %v3870_v7 }
 0x174   : >> { %3675 = vmatprep.subr.bf16.mxu1 %v4136_v38  ;;  %3636 = vmatpush3.bf16.msra.mxu0 %v3882_v10 }
 0x175   : >> { %3637 = vmatprep.subr.bf16.mxu0 %v4136_v38 }
 0x177   : >> { %3676 = vmatpush3.bf16.msra.mxu1 %v3871_v9 }
 0x178   : >> { %3677 = vmatprep.subr.bf16.mxu1 %v4136_v38  ;;  %3638 = vmatpush3.bf16.msra.mxu0 %v3883_v12 }
 0x179   : >> { %3639 = vmatprep.subr.bf16.mxu0 %v4136_v38 }
 0x17b   : >> { %3678 = vmatpush3.bf16.msra.mxu1 %v3872_v11 }
 0x17c   : >> { %3679 = vmatprep.subr.bf16.mxu1 %v4136_v38  ;;  %3640 = vmatpush3.bf16.msra.mxu0 %v3884_v16 }
 0x17d   : >> { %3641 = vmatprep.subr.bf16.mxu0 %v4136_v38 }
 0x17f   : >> { %3680 = vmatpush3.bf16.msra.mxu1 %v3873_v13 }
 0x180   : >> { %3737 = vmatprep.subr.bf16.mxu1 %v4136_v38  ;;  %3642 = vmatpush3.bf16.msra.mxu0 %v3885_v18 }
 0x181   : >> { %3643 = vmatprep.subr.bf16.mxu0 %v4136_v38 }
 0x182   : >> { %3682 = vmatmul.mubr.bf16.vlgmr.msra.gmra.mxu1 %v4375_v17 }
 0x183   : >> { %3685 = vmatprep.mubr.msk.bf16.mxu1 %vm4137_vm0, %v4136_v38 }
 0x184   : >> { %3644 = vmatpush3.bf16.msra.mxu0 %v3886_v19 }
 0x185   : >> { %3701 = vmatprep.subr.bf16.mxu0 %v4136_v38 }
 0x187   : >> { %3646 = vmatmul.mubr.bf16.vlgmr.msra.gmra.mxu0 %v4375_v17 }
 0x188   : >> { %3649 = vmatprep.mubr.msk.bf16.mxu0 %vm4137_vm0, %v4136_v38  ;;  %3702 = vmatpush3.bf16.msra.mxu0 %v3887_v26 }
 0x189   : >> { %3703 = vmatprep.subr.bf16.mxu0 %v4136_v38 }
 0x18a   : >> { %3686 = vmatmul.mubr.bf16.gmra.mxu1 %v4385_v20 }
 0x18b   : >> { %3689 = vmatprep.mubr.msk.bf16.mxu1 %vm4137_vm0, %v4136_v38 }
 0x18c   : >> { %3704 = vmatpush3.bf16.msra.mxu0 %v3888_v27 }
 0x18d   : >> { %3705 = vmatprep.subr.bf16.mxu0 %v4136_v38 }
 0x18f   : >> { %3650 = vmatmul.mubr.bf16.gmra.mxu0 %v4385_v20 }
 0x190   : >> { %3653 = vmatprep.mubr.msk.bf16.mxu0 %vm4137_vm0, %v4136_v38  ;;  %3706 = vmatpush3.bf16.msra.mxu0 %v3889_v14 }
 0x191   : >> { %3707 = vmatprep.subr.bf16.mxu0 %v4136_v38 }
 0x192   : >> { %3690 = vmatmul.mubr.bf16.gmra.mxu1 %v4395_v23 }
 0x193   : >> { %3693 = vmatprep.mubr.msk.bf16.mxu1 %vm4137_vm0, %v4136_v38 }
 0x194   : >> { %3708 = vmatpush3.bf16.msra.mxu0 %v3890_v28 }
 0x195   : >> { %3709 = vmatprep.subr.bf16.mxu0 %v4136_v38 }
 0x197   : >> { %3654 = vmatmul.mubr.bf16.gmra.mxu0 %v4395_v23 }
 0x198   : >> { %3657 = vmatprep.mubr.msk.bf16.mxu0 %vm4137_vm0, %v4136_v38  ;;  %3710 = vmatpush3.bf16.msra.mxu0 %v3891_v31 }
 0x199   : >> { %3711 = vmatprep.subr.bf16.mxu0 %v4136_v38 }
 0x19a   : >> { %3694 = vmatmul.mubr.bf16.gmra.mxu1 %v4403_v24 }
 0x19b   : >> { %3697 = vmatprep.mubr.msk.bf16.mxu1 %vm4137_vm0, %v4136_v38 }
 0x19c   : >> { %3712 = vmatpush3.bf16.msra.mxu0 %v3892_v35 }
 0x19d   : >> { %3713 = vmatprep.subr.bf16.mxu0 %v4136_v38 }
 0x19f   : >> { %3658 = vmatmul.mubr.bf16.gmra.mxu0 %v4403_v24 }
 0x1a0   : >> { %3661 = vmatprep.mubr.msk.bf16.mxu0 %vm4137_vm0, %v4136_v38  ;;  %3714 = vmatpush3.bf16.msra.mxu0 %v3893_v42 }
 0x1a1   : >> { %3715 = vmatprep.subr.bf16.mxu0 %v4136_v38 }
 0x1a2   : >> { %3698 = vmatmul.mubr.bf16.gmra.mxu1 %v4411_v25 }
 0x1a3   : >> { %3747 = vmatprep.mubr.msk.bf16.mxu1 %vm4137_vm0, %v4136_v38 }
 0x1a4   : >> { %3716 = vmatpush3.bf16.msra.mxu0 %v3894_v48 }
 0x1a5   : >> { %3767 = vmatprep.subr.bf16.mxu0 %v4136_v38 }
 0x1a7   : >> { %3662 = vmatmul.mubr.bf16.gmra.mxu0 %v4411_v25 }
 0x1a8   : >> { %3717 = vmatprep.mubr.msk.bf16.mxu0 %vm4137_vm0, %v4136_v38 }
 0x1af   : >> { %3718 = vmatmul.mubr.bf16.vlgmr.msra.gmra.mxu0 %v4375_v17 }
 0x1b0   : >> { %3721 = vmatprep.mubr.msk.bf16.mxu0 %vm4137_vm0, %v4136_v38 }
 0x1b7   : >> { %3722 = vmatmul.mubr.bf16.gmra.mxu0 %v4385_v20 }
 0x1b8   : >> { %3725 = vmatprep.mubr.msk.bf16.mxu0 %vm4137_vm0, %v4136_v38 }
 0x1bf   : >> { %3726 = vmatmul.mubr.bf16.gmra.mxu0 %v4395_v23 }
 0x1c0   : >> { %3729 = vmatprep.mubr.msk.bf16.mxu0 %vm4137_vm0, %v4136_v38 }
 0x1c7   : >> { %3730 = vmatmul.mubr.bf16.gmra.mxu0 %v4403_v24 }
 0x1c8   : >> { %3733 = vmatprep.mubr.msk.bf16.mxu0 %vm4137_vm0, %v4136_v38 }
 0x1cf   : >> { %3734 = vmatmul.mubr.bf16.gmra.mxu0 %v4411_v25 }
 0x1d0   : >> { %3777 = vmatprep.mubr.msk.bf16.mxu0 %vm4137_vm0, %v4136_v38 }
 0x242   : >> { %v1126_v32 = vpop.f32.mrf.mxu1 }
 0x243   : >> { %v4440_v39 = vadd.f32 %v4435_v33, %v1126_v32  ;;  %v3299_v32 = vld [vmem:[%s854_s3] ss:$0 sm:$0xff] }
 0x244   : >> { %v3683_v34 = vpop.f32.mrf.mxu1 }
 0x246   : >> { %v1129_v36 = vpop.f32.mrf.mxu1 }
 0x247   : >> { %v4443_v40 = vadd.f32 %v4435_v33, %v1129_v36  ;;  %v4451_v47 = vpop.f32.mrf.mxu0 }
 0x248   : >> { %v3684_v41 = vpop.f32.mrf.mxu1 }
 0x249   : >> { %v1165_v21 = vpack.c.bf16 %v4443_v40, %v4440_v39  ;;  %v3647_v49 = vpop.f32.mrf.mxu0 }
 0x24a   : >> { %v4448_v43 = vpop.f32.mrf.mxu1 }
 0x24b   : >> { %v4455_v51 = vpop.f32.mrf.mxu0  ;;  %v1135_v28 = vadd.f32 %v4435_v33, %v4448_v43  ;;  %v1339_v34 = vsel %vm1322_vm1, %v1165_v21, 0 }
 0x24c   : >> { %v3687_v44 = vpop.f32.mrf.mxu1  ;;  %v978_v35 = vadd.f32 %v3299_v32, %v4455_v51 }
 0x24d   : >> { %v3648_v53 = vpop.f32.mrf.mxu0 }
 0x24e   : >> { %v1137_v15 = vpop.f32.mrf.mxu1 }
 0x24f   : >> { %v4458_v54 = vpop.f32.mrf.mxu0  ;;  %v1138_v27 = vadd.f32 %v4435_v33, %v1137_v15 }
 0x250   : >> { %v3688_v50 = vpop.f32.mrf.mxu1  ;;  %v983_v41 = vadd.f32 %v3299_v32, %v4458_v54 }
 0x251   : >> { %v3651_v55 = vpop.f32.mrf.mxu0  ;;  %v1166_v31 = vpack.c.bf16 %v1138_v27, %v1135_v28 }
 0x252   : >> { %v1142_v52 = vpop.f32.mrf.mxu1 }
 0x253   : >> { %v4463_v57 = vpop.f32.mrf.mxu0  ;;  %v1143_v24 = vadd.f32 %v4435_v33, %v1142_v52  ;;  %v1342_v25 = vsel %vm1322_vm1, %v1166_v31, 0 }
 0x254   : >> { %v3691_v22 = vpop.f32.mrf.mxu1  ;;  %v986_v42 = vadd.f32 %v3299_v32, %v4463_v57 }
 0x255   : >> { %v3652_v59 = vpop.f32.mrf.mxu0 }
 0x256   : >> { %v1145_v29 = vpop.f32.mrf.mxu1  ;;  %v1014_v39 = vpack.c.bf16 %v986_v42, %v983_v41 }
 0x257   : >> { %v4465_v30 = vpop.f32.mrf.mxu0  ;;  %v1146_v20 = vadd.f32 %v4435_v33, %v1145_v29 }
 0x258   : >> { %v3692_v56 = vpop.f32.mrf.mxu1  ;;  %v991_v40 = vadd.f32 %v3299_v32, %v4465_v30 }
 0x259   : >> { %v3655_v37 = vpop.f32.mrf.mxu0  ;;  %v1167_v26 = vpack.c.bf16 %v1146_v20, %v1143_v24 }
 0x25a   : >> { %v1150_v58 = vpop.f32.mrf.mxu1 }
 0x25b   : >> { %v993_v63 = vpop.f32.mrf.mxu0  ;;  %v1151_v13 = vadd.f32 %v4435_v33, %v1150_v58  ;;  %v1345_v14 = vsel %vm1322_vm1, %v1167_v26, 0 }
 0x25c   : >> { %v3695_v60 = vpop.f32.mrf.mxu1  ;;  %v994_v21 = vadd.f32 %v3299_v32, %v993_v63 }
 0x25d   : >> { %v3656_v1 = vpop.f32.mrf.mxu0 }
 0x25e   : >> { %v1153_v61 = vpop.f32.mrf.mxu1  ;;  %v1015_v43 = vpack.c.bf16 %v994_v21, %v991_v40 }
 0x25f   : >> { %v998_v45 = vpop.f32.mrf.mxu0  ;;  %v1154_v10 = vadd.f32 %v4435_v33, %v1153_v61 }
 0x260   : >> { %v3696_v62 = vpop.f32.mrf.mxu1  ;;  %v999_v44 = vadd.f32 %v3299_v32, %v998_v45 }
 0x261   : >> { %v3659_v3 = vpop.f32.mrf.mxu0  ;;  %v1168_v17 = vpack.c.bf16 %v1154_v10, %v1151_v13 }
 0x262   : >> { %v1158_v0 = vpop.f32.mrf.mxu1 }
 0x263   : >> { %v1159_v4 = vadd.f32 %v4435_v33, %v1158_v0  ;;  %v1001_v7 = vpop.f32.mrf.mxu0  ;;  %v1348_v23 = vsel %vm1322_vm1, %v1168_v17, 0 }
 0x264   : >> { %v3699_v2 = vpop.f32.mrf.mxu1 }
 0x265   : >> { %v3660_v9 = vpop.f32.mrf.mxu0 }
 0x266   : >> { %v1161_v46 = vpop.f32.mrf.mxu1 }
 0x267   : >> { %v1162_v5 = vadd.f32 %v4435_v33, %v1161_v46  ;;  %v1006_v12 = vpop.f32.mrf.mxu0  ;;  %v975_v33 = vadd.f32 %v3299_v32, %v4451_v47  ;;  %v1002_v47 = vadd.f32 %v3299_v32, %v1001_v7 }
 0x268   : >> { %v3700_v6 = vpop.f32.mrf.mxu1  ;;  %v1007_v15 = vadd.f32 %v3299_v32, %v1006_v12 }
 0x269   : >> { %v1169_v8 = vpack.c.bf16 %v1162_v5, %v1159_v4  ;;  %v3663_v16 = vpop.f32.mrf.mxu0  ;;  %v1013_v36 = vpack.c.bf16 %v978_v35, %v975_v33  ;;  %v1016_v48 = vpack.c.bf16 %v1002_v47, %v999_v44 }
 0x26b   : >> { %v1351_v11 = vsel %vm1322_vm1, %v1169_v8, 0  ;;  %v1009_v18 = vpop.f32.mrf.mxu0 }
 0x26c   : >> { %3738 = vmatpush3.bf16.xpose.msra.mxu1 %v1351_v11  ;;  %v1010_v49 = vadd.f32 %v3299_v32, %v1009_v18  ;;  %v3324_v32 = vld [vmem:[%s1188_s28] ss:$0 sm:$0xff] }
 0x26d   : >> { %3739 = vmatprep.subr.bf16.mxu1 %v4136_v38  ;;  %v3664_v19 = vpop.f32.mrf.mxu0 }
 0x26e   : >> { %v1017_v50 = vpack.c.bf16 %v1010_v49, %v1007_v15 }
 0x26f   : >> { %v1278_v11 = vpop.f32.mrf.mxu0 }
 0x271   : >> { %v3719_v12 = vpop.f32.mrf.mxu0 }
 0x273   : >> { %v1281_v13 = vpop.f32.mrf.mxu0 }
 0x274   : >> { %3740 = vmatpush3.bf16.xpose.msra.mxu1 %v1348_v23 }
 0x275   : >> { %3741 = vmatprep.subr.bf16.mxu1 %v4136_v38  ;;  %v3720_v16 = vpop.f32.mrf.mxu0 }
 0x277   : >> { %v1286_v17 = vpop.f32.mrf.mxu0 }
 0x279   : >> { %v3723_v18 = vpop.f32.mrf.mxu0 }
 0x27b   : >> { %v1289_v19 = vpop.f32.mrf.mxu0 }
 0x27c   : >> { %3742 = vmatpush3.bf16.xpose.msra.mxu1 %v1345_v14  ;;  %v1290_v15 = vadd.f32 %v3324_v32, %v1289_v19 }
 0x27d   : >> { %3743 = vmatprep.subr.bf16.mxu1 %v4136_v38  ;;  %v3724_v20 = vpop.f32.mrf.mxu0 }
 0x27f   : >> { %v1294_v23 = vpop.f32.mrf.mxu0 }
 0x281   : >> { %v3727_v24 = vpop.f32.mrf.mxu0 }
 0x283   : >> { %v1297_v26 = vpop.f32.mrf.mxu0 }
 0x284   : >> { %3744 = vmatpush3.bf16.xpose.msra.mxu1 %v1342_v25  ;;  %v1298_v44 = vadd.f32 %v3324_v32, %v1297_v26 }
 0x285   : >> { %3745 = vmatprep.subr.bf16.mxu1 %v4136_v38  ;;  %v3728_v27 = vpop.f32.mrf.mxu0 }
 0x287   : >> { %v1302_v14 = vpop.f32.mrf.mxu0 }
 0x288   : >> { %v1303_v41 = vadd.f32 %v3324_v32, %v1302_v14 }
 0x289   : >> { %v3731_v28 = vpop.f32.mrf.mxu0 }
 0x28b   : >> { %v1305_v31 = vpop.f32.mrf.mxu0 }
 0x28c   : >> { %3746 = vmatpush3.bf16.xpose.msra.mxu1 %v1339_v34  ;;  %v1306_v42 = vadd.f32 %v3324_v32, %v1305_v31 }
 0x28d   : >> { %3797 = vmatprep.subr.bf16.mxu1 %v4136_v38  ;;  %v3732_v25 = vpop.f32.mrf.mxu0 }
 0x28e   : >> { %v1320_v47 = vpack.c.bf16 %v1306_v42, %v1303_v41 }
 0x28f   : >> { %v1310_v34 = vpop.f32.mrf.mxu0 }
 0x290   : >> { %v1311_v35 = vadd.f32 %v3324_v32, %v1310_v34 }
 0x291   : >> { %v3735_v33 = vpop.f32.mrf.mxu0 }
 0x293   : >> { %3748 = vmatmul.mubr.msk.bf16.vlgmr.msra.gmra.mxu1 %vm1322_vm1, %v1013_v36  ;;  %v1313_v36 = vpop.f32.mrf.mxu0 }
 0x294   : >> { %3751 = vmatprep.mubr.msk.bf16.mxu1 %vm4137_vm0, %v4136_v38 }
 0x295   : >> { %v3736_v40 = vpop.f32.mrf.mxu0 }
 0x296   : >> { %v3896_v40 = vld [vmem:[%s1647_s1 + $0x10] sm:$0xff]  }
 0x29b   : >> { %3752 = vmatmul.mubr.msk.bf16.gmra.mxu1 %vm1322_vm1, %v1014_v39  ;;  %v1314_v39 = vadd.f32 %v3324_v32, %v1313_v36 }
 0x29c   : >> { %3755 = vmatprep.mubr.msk.bf16.mxu1 %vm4137_vm0, %v4136_v38 }
 0x29d   : >> { %v1321_v21 = vpack.c.bf16 %v1314_v39, %v1311_v35  ;;  %v3895_v39 = vld [vmem:[%s1647_s1 + $0x18] sm:$0xff]  }
 0x29e   : >> { %3798 = vmatpush3.bf16.msra.mxu1 %v3895_v39 }
 0x29f   : >> { %3768 = vmatpush3.bf16.msra.mxu0 %v1321_v21  ;;  %3799 = vmatprep.subr.bf16.mxu1 %v4136_v38  ;;  %v3897_v21 = vld [vmem:[%s1647_s1 + $0x8] sm:$0xff]  }
 0x2a0   : >> { %3769 = vmatprep.subr.bf16.mxu0 %v4136_v38 }
 0x2a2   : >> { %3800 = vmatpush3.bf16.msra.mxu1 %v3896_v40  ;;  %v1630_v40 = vld [vmem:[#allocation3 + $0x30] sm:$0xff] }
 0x2a3   : >> { %3756 = vmatmul.mubr.msk.bf16.gmra.mxu1 %vm1322_vm1, %v1015_v43  ;;  %v1295_v43 = vadd.f32 %v3324_v32, %v1294_v23  ;;  %3770 = vmatpush3.bf16.msra.mxu0 %v1320_v47 }
 0x2a4   : >> { %3759 = vmatprep.mubr.msk.bf16.mxu1 %vm4137_vm0, %v4136_v38  ;;  %3771 = vmatprep.subr.bf16.mxu0 %v4136_v38 }
 0x2a5   : >> { %v1319_v49 = vpack.c.bf16 %v1298_v44, %v1295_v43  ;;  %3801 = vmatprep.subr.bf16.mxu1 %v4136_v38  ;;  %v3898_v43 = vld [vmem:[%s1647_s1] sm:$0xff]  }
 0x2a6   : >> { %3802 = vmatpush3.bf16.msra.mxu1 %v3897_v21 }
 0x2a7   : >> { %3772 = vmatpush3.bf16.msra.mxu0 %v1319_v49  ;;  %3803 = vmatprep.subr.bf16.mxu1 %v4136_v38 }
 0x2a8   : >> { %3773 = vmatprep.subr.bf16.mxu0 %v4136_v38 }
 0x2aa   : >> { %3804 = vmatpush3.bf16.msra.mxu1 %v3898_v43 }
 0x2ab   : >> { %3760 = vmatmul.mubr.msk.bf16.gmra.mxu1 %vm1322_vm1, %v1016_v48  ;;  %v1287_v48 = vadd.f32 %v3324_v32, %v1286_v17 }
 0x2ac   : >> { %3763 = vmatprep.mubr.msk.bf16.mxu1 %vm4137_vm0, %v4136_v38 }
 0x2b3   : >> { %3764 = vmatmul.mubr.msk.bf16.gmra.mxu1 %vm1322_vm1, %v1017_v50  ;;  %v1279_v50 = vadd.f32 %v3324_v32, %v1278_v11 }
 0x2b4   : >> { %3805 = vmatprep.mubr.msk.bf16.mxu1 %vm4137_vm0, %v4136_v38 }
 0x353   : >> { %v4525_v51 = vpop.f32.mrf.mxu1 }
 0x354   : >> { %v1427_v52 = vsel %vm1426_vm2, %v4525_v51, -inf }
 0x355   : >> { %1428 = vmax.xlane.f32.xlu0 %v1427_v52  ;;  %v3749_v53 = vpop.f32.mrf.mxu1  ;;  %v1282_v52 = vadd.f32 %v3324_v32, %v1281_v13 }
 0x356   : >> { %v1318_v53 = vpack.c.bf16 %v1290_v15, %v1287_v48 }
 0x357   : >> { %v4529_v22 = vpop.f32.mrf.mxu1 }
 0x358   : >> { %v1430_v54 = vsel %vm1426_vm2, %v4529_v22, -inf  ;;  %3774 = vmatpush3.bf16.msra.mxu0 %v1318_v53 }
 0x359   : >> { %1431 = vmax.xlane.f32.xlu0 %v1430_v54  ;;  %v3750_v29 = vpop.f32.mrf.mxu1  ;;  %v1317_v54 = vpack.c.bf16 %v1282_v52, %v1279_v50  ;;  %3775 = vmatprep.subr.bf16.mxu0 %v4136_v38 }
 0x35b   : >> { %v4533_v55 = vpop.f32.mrf.mxu1 }
 0x35c   : >> { %v1433_v56 = vsel %vm1426_vm2, %v4533_v55, -inf  ;;  %3776 = vmatpush3.bf16.msra.mxu0 %v1317_v54 }
 0x35d   : >> { %1434 = vmax.xlane.f32.xlu1 %v1433_v56  ;;  %v3753_v57 = vpop.f32.mrf.mxu1 }
 0x35f   : >> { %v4537_v58 = vpop.f32.mrf.mxu1 }
 0x360   : >> { %v1436_v59 = vsel %vm1426_vm2, %v4537_v58, -inf }
 0x361   : >> { %1437 = vmax.xlane.f32.xlu1 %v1436_v59  ;;  %v3754_v60 = vpop.f32.mrf.mxu1 }
 0x363   : >> { %v4541_v30 = vpop.f32.mrf.mxu1 }
 0x364   : >> { %v1439_v61 = vsel %vm1426_vm2, %v4541_v30, -inf }
 0x365   : >> { %1440 = vmax.xlane.f32.xlu0 %v1439_v61  ;;  %v3757_v37 = vpop.f32.mrf.mxu1 }
 0x367   : >> { %v4545_v62 = vpop.f32.mrf.mxu1 }
 0x368   : >> { %v1442_v63 = vsel %vm1426_vm2, %v4545_v62, -inf }
 0x369   : >> { %1443 = vmax.xlane.f32.xlu1 %v1442_v63  ;;  %v3758_v0 = vpop.f32.mrf.mxu1 }
 0x36b   : >> { %v4549_v1 = vpop.f32.mrf.mxu1 }
 0x36c   : >> { %v1445_v2 = vsel %vm1426_vm2, %v4549_v1, -inf }
 0x36d   : >> { %1446 = vmax.xlane.f32.xlu0 %v1445_v2  ;;  %v3761_v45 = vpop.f32.mrf.mxu1 }
 0x36f   : >> { %v4553_v46 = vpop.f32.mrf.mxu1 }
 0x370   : >> { %v1448_v3 = vsel %vm1426_vm2, %v4553_v46, -inf }
 0x371   : >> { %1449 = vmax.xlane.f32.xlu1 %v1448_v3  ;;  %v3762_v4 = vpop.f32.mrf.mxu1 }
 0x373   : >> { %v4557_v5 = vpop.f32.mrf.mxu1 }
 0x374   : >> { %v1451_v6 = vsel %vm1426_vm2, %v4557_v5, -inf }
 0x375   : >> { %1452 = vmax.xlane.f32.xlu0 %v1451_v6  ;;  %v3765_v7 = vpop.f32.mrf.mxu1 }
 0x377   : >> { %v4561_v8 = vpop.f32.mrf.mxu1 }
 0x378   : >> { %v1454_v9 = vsel %vm1426_vm2, %v4561_v8, -inf }
 0x379   : >> { %1455 = vmax.xlane.f32.xlu1 %v1454_v9  ;;  %v3766_v10 = vpop.f32.mrf.mxu1 }
 0x3de   : >> { %v1429_v29 = vpop.xlane.xlu0 %1428 }
 0x3df   : >> { %v1457_v56 = vsub.f32 %v4525_v51, %v1429_v29 }
 0x3e1   : >> { %v1467_v57 = vmul.f32 1.442695, %v1457_v56 }
 0x3e2   : >> { %v1432_v59 = vpop.xlane.xlu0 %1431 }
 0x3e3   : >> { %3899 = vpow2.f32 %v1467_v57  ;;  %v1458_v60 = vsub.f32 %v4529_v22, %v1432_v59 }
 0x3e5   : >> { %v1469_v61 = vmul.f32 1.442695, %v1458_v60 }
 0x3e6   : >> { %v1435_v37 = vpop.xlane.xlu1 %1434 }
 0x3e7   : >> { %3901 = vpow2.f32 %v1469_v61  ;;  %v1459_v63 = vsub.f32 %v4533_v55, %v1435_v37 }
 0x3e9   : >> { %v1471_v0 = vmul.f32 1.442695, %v1459_v63 }
 0x3ea   : >> { %v1438_v2 = vpop.xlane.xlu1 %1437 }
 0x3eb   : >> { %3903 = vpow2.f32 %v1471_v0  ;;  %v1460_v45 = vsub.f32 %v4537_v58, %v1438_v2 }
 0x3ed   : >> { %v1473_v3 = vmul.f32 1.442695, %v1460_v45 }
 0x3ee   : >> { %v1441_v4 = vpop.xlane.xlu0 %1440 }
 0x3ef   : >> { %3905 = vpow2.f32 %v1473_v3  ;;  %v1461_v51 = vsub.f32 %v4541_v30, %v1441_v4 }
 0x3f0   : >> { %v4578_v6 = vpop.eup %3899 }
 0x3f1   : >> { %v1475_v7 = vmul.f32 1.442695, %v1461_v51  ;;  %v1487_v22 = vsel %vm1426_vm2, %v4578_v6, 0.0 }
 0x3f2   : >> { %v1444_v9 = vpop.xlane.xlu1 %1443  ;;  %1488 = vadd.xlane.f32.xlu0 %v1487_v22 }
 0x3f3   : >> { %3907 = vpow2.f32 %v1475_v7  ;;  %v1462_v55 = vsub.f32 %v4545_v62, %v1444_v9 }
 0x3f4   : >> { %v4583_v10 = vpop.eup %3901 }
 0x3f5   : >> { %v1477_v11 = vmul.f32 1.442695, %v1462_v55  ;;  %v1490_v58 = vsel %vm1426_vm2, %v4583_v10, 0.0 }
 0x3f6   : >> { %v1447_v12 = vpop.xlane.xlu0 %1446  ;;  %1491 = vadd.xlane.f32.xlu1 %v1490_v58 }
 0x3f7   : >> { %3909 = vpow2.f32 %v1477_v11  ;;  %v1463_v30 = vsub.f32 %v4549_v1, %v1447_v12 }
 0x3f8   : >> { %v4588_v13 = vpop.eup %3903 }
 0x3f9   : >> { %v1479_v16 = vmul.f32 1.442695, %v1463_v30  ;;  %v1493_v17 = vsel %vm1426_vm2, %v4588_v13, 0.0 }
 0x3fa   : >> { %v1450_v18 = vpop.xlane.xlu1 %1449  ;;  %1494 = vadd.xlane.f32.xlu0 %v1493_v17 }
 0x3fb   : >> { %3911 = vpow2.f32 %v1479_v16  ;;  %v1464_v62 = vsub.f32 %v4553_v46, %v1450_v18 }
 0x3fc   : >> { %v4593_v19 = vpop.eup %3905 }
 0x3fd   : >> { %v1481_v20 = vmul.f32 1.442695, %v1464_v62  ;;  %v1496_v23 = vsel %vm1426_vm2, %v4593_v19, 0.0 }
 0x3fe   : >> { %v1453_v24 = vpop.xlane.xlu0 %1452  ;;  %1497 = vadd.xlane.f32.xlu1 %v1496_v23 }
 0x3ff   : >> { %3913 = vpow2.f32 %v1481_v20  ;;  %v1465_v1 = vsub.f32 %v4557_v5, %v1453_v24 }
 0x400   : >> { %v4598_v26 = vpop.eup %3907 }
 0x401   : >> { %v1483_v27 = vmul.f32 1.442695, %v1465_v1  ;;  %v1499_v14 = vsel %vm1426_vm2, %v4598_v26, 0.0 }
 0x402   : >> { %1500 = vadd.xlane.f32.xlu0 %v1499_v14  ;;  %v1456_v28 = vpop.xlane.xlu1 %1455 }
 0x403   : >> { %3915 = vpow2.f32 %v1483_v27  ;;  %v1466_v46 = vsub.f32 %v4561_v8, %v1456_v28 }
 0x404   : >> { %v4603_v31 = vpop.eup %3909 }
 0x405   : >> { %v1485_v25 = vmul.f32 1.442695, %v1466_v46  ;;  %v1502_v32 = vsel %vm1426_vm2, %v4603_v31, 0.0 }
 0x406   : >> { %1503 = vadd.xlane.f32.xlu1 %v1502_v32 }
 0x407   : >> { %3917 = vpow2.f32 %v1485_v25 }
 0x408   : >> { %v4607_v5 = vpop.eup %3911 }
 0x409   : >> { %v1505_v34 = vsel %vm1426_vm2, %v4607_v5, 0.0 }
 0x40a   : >> { %1506 = vadd.xlane.f32.xlu0 %v1505_v34 }
 0x40c   : >> { %v4611_v33 = vpop.eup %3913 }
 0x40d   : >> { %v1508_v8 = vsel %vm1426_vm2, %v4611_v33, 0.0 }
 0x40e   : >> { %1509 = vadd.xlane.f32.xlu1 %v1508_v8 }
 0x410   : >> { %v4615_v35 = vpop.eup %3915 }
 0x411   : >> { %v1511_v36 = vsel %vm1426_vm2, %v4615_v35, 0.0 }
 0x412   : >> { %1512 = vadd.xlane.f32.xlu0 %v1511_v36 }
 0x414   : >> { %v4619_v41 = vpop.eup %3917 }
 0x415   : >> { %v1514_v42 = vsel %vm1426_vm2, %v4619_v41, 0.0 }
 0x416   : >> { %1515 = vadd.xlane.f32.xlu1 %v1514_v42 }
 0x47b   : >> { %v1489_v44 = vpop.xlane.xlu0 %1488 }
 0x47c   : >> { %3919 = vrcp.f32 %v1489_v44 }
 0x47f   : >> { %v1492_v47 = vpop.xlane.xlu1 %1491 }
 0x480   : >> { %3921 = vrcp.f32 %v1492_v47  ;;  %v1631_v47 = vld [vmem:[#allocation3] sm:$0xff] }
 0x483   : >> { %v1495_v48 = vpop.xlane.xlu0 %1494 }
 0x484   : >> { %3923 = vrcp.f32 %v1495_v48 }
 0x487   : >> { %v1498_v15 = vpop.xlane.xlu1 %1497 }
 0x488   : >> { %3925 = vrcp.f32 %v1498_v15 }
 0x489   : >> { %v3920_v49 = vpop.eup %3919 }
 0x48a   : >> { %v1518_v53 = vmul.f32 %v3920_v49, %v4578_v6 }
 0x48b   : >> { %v1501_v50 = vpop.xlane.xlu0 %1500 }
 0x48c   : >> { %3927 = vrcp.f32 %v1501_v50  ;;  %v1632_v50 = vld [vmem:[#allocation3 + $0x18] sm:$0xff] }
 0x48d   : >> { %v3922_v52 = vpop.eup %3921 }
 0x48e   : >> { %v1520_v54 = vmul.f32 %v3922_v52, %v4583_v10 }
 0x48f   : >> { %v1504_v29 = vpop.xlane.xlu1 %1503 }
 0x490   : >> { %v1537_v56 = vpack.c.bf16 %v1520_v54, %v1518_v53  ;;  %3929 = vrcp.f32 %v1504_v29  ;;  %v1633_v54 = vld [vmem:[#allocation3 + $0x10] sm:$0xff] }
 0x491   : >> { %v3924_v57 = vpop.eup %3923 }
 0x492   : >> { %3778 = vmatmul.mubr.msk.bf16.vlgmr.msra.gmra.mxu0 %vm1426_vm2, %v1537_v56  ;;  %v1522_v61 = vmul.f32 %v3924_v57, %v4588_v13 }
 0x493   : >> { %v1507_v59 = vpop.xlane.xlu0 %1506  ;;  %3781 = vmatprep.mubr.msk.bf16.mxu0 %vm4137_vm0, %v4136_v38 }
 0x494   : >> { %3931 = vrcp.f32 %v1507_v59  ;;  %v1634_v59 = vld [vmem:[#allocation3 + $0x48] sm:$0xff] }
 0x495   : >> { %v3926_v60 = vpop.eup %3925 }
 0x496   : >> { %v1524_v37 = vmul.f32 %v3926_v60, %v4593_v19 }
 0x497   : >> { %v1510_v63 = vpop.xlane.xlu1 %1509 }
 0x498   : >> { %3933 = vrcp.f32 %v1510_v63  ;;  %v1538_v0 = vpack.c.bf16 %v1524_v37, %v1522_v61  ;;  %v1635_v63 = vld [vmem:[#allocation3 + $0x28] sm:$0xff] }
 0x499   : >> { %v3928_v2 = vpop.eup %3927 }
 0x49a   : >> { %3782 = vmatmul.mubr.msk.bf16.gmra.mxu0 %vm1426_vm2, %v1538_v0  ;;  %v1526_v4 = vmul.f32 %v3928_v2, %v4598_v26 }
 0x49b   : >> { %v1513_v45 = vpop.xlane.xlu0 %1512  ;;  %3785 = vmatprep.mubr.msk.bf16.mxu0 %vm4137_vm0, %v4136_v38 }
 0x49c   : >> { %3935 = vrcp.f32 %v1513_v45 }
 0x49d   : >> { %v3930_v3 = vpop.eup %3929 }
 0x49e   : >> { %v1528_v51 = vmul.f32 %v3930_v3, %v4603_v31  ;;  %v1636_v3 = vld [vmem:[#allocation3 + $0x8] sm:$0xff] }
 0x49f   : >> { %v1516_v6 = vpop.xlane.xlu1 %1515 }
 0x4a0   : >> { %3937 = vrcp.f32 %v1516_v6  ;;  %v1539_v7 = vpack.c.bf16 %v1528_v51, %v1526_v4 }
 0x4a1   : >> { %v3932_v22 = vpop.eup %3931 }
 0x4a2   : >> { %3786 = vmatmul.mubr.msk.bf16.gmra.mxu0 %vm1426_vm2, %v1539_v7  ;;  %v1530_v55 = vmul.f32 %v3932_v22, %v4607_v5  ;;  %v1637_v7 = vld [vmem:[#allocation3 + $0x20] sm:$0xff] }
 0x4a3   : >> { %3789 = vmatprep.mubr.msk.bf16.mxu0 %vm4137_vm0, %v4136_v38 }
 0x4a5   : >> { %v3934_v9 = vpop.eup %3933 }
 0x4a6   : >> { %v1532_v10 = vmul.f32 %v3934_v9, %v4611_v33 }
 0x4a8   : >> { %v1540_v11 = vpack.c.bf16 %v1532_v10, %v1530_v55  ;;  %v1638_v10 = vld [vmem:[#allocation3 + $0x40] sm:$0xff] }
 0x4a9   : >> { %v3936_v58 = vpop.eup %3935 }
 0x4aa   : >> { %3790 = vmatmul.mubr.msk.bf16.gmra.mxu0 %vm1426_vm2, %v1540_v11  ;;  %v1534_v30 = vmul.f32 %v3936_v58, %v4615_v35 }
 0x4ab   : >> { %3793 = vmatprep.mubr.msk.bf16.mxu0 %vm4137_vm0, %v4136_v38 }
 0x4ad   : >> { %v3938_v12 = vpop.eup %3937 }
 0x4ae   : >> { %v1536_v13 = vmul.f32 %v3938_v12, %v4619_v41 }
 0x4b0   : >> { %v1541_v16 = vpack.c.bf16 %v1536_v13, %v1534_v30  ;;  %v1639_v30 = vld [vmem:[#allocation3 + $0x38] sm:$0xff] }
 0x4b2   : >> { %3794 = vmatmul.mubr.msk.bf16.gmra.mxu0 %vm1426_vm2, %v1541_v16 }
 0x552   : >> { %v1591_v17 = vpop.f32.mrf.mxu0 }
 0x554   : >> { %v3779_v18 = vpop.f32.mrf.mxu0 }
 0x556   : >> { %v1594_v62 = vpop.f32.mrf.mxu0 }
 0x557   : >> { %v1640_v19 = vpack.c.bf16 %v1594_v62, %v1591_v17  ;;  %v3355_v62 = vld [vmem:[%s5501_s11] ss:$0 sm:$0xff] (%p821_p4) }
 0x558   : >> { %v3780_v20 = vpop.f32.mrf.mxu0 }
 0x559   : >> { %3806 = vmatmul.mubr.msk.bf16.vlgmr.msra.gmra.mxu1 %vm1322_vm1, %v1640_v19  ;;  %v3354_v19 = vld [vmem:[%s5500_s10] ss:$0 sm:$0xff] (%p821_p4) }
 0x55a   : >> { %v1599_v23 = vpop.f32.mrf.mxu0  ;;  %3809 = vmatprep.mubr.msk.bf16.mxu1 %vm4137_vm0, %v4136_v38 }
 0x55c   : >> { %v3783_v24 = vpop.f32.mrf.mxu0 }
 0x55e   : >> { %v1602_v1 = vpop.f32.mrf.mxu0 }
 0x55f   : >> { %v1641_v26 = vpack.c.bf16 %v1602_v1, %v1599_v23  ;;  %v1788_v23 = vld [vmem:[%s4250_s2] sm:$0xff] (%p821_p4) }
 0x560   : >> { %v3784_v27 = vpop.f32.mrf.mxu0 }
 0x561   : >> { %3810 = vmatmul.mubr.msk.bf16.gmra.mxu1 %vm1322_vm1, %v1641_v26  ;;  %v1790_v27 = vld [vmem:[%s4250_s2 + $0x10] sm:$0xff] (%p821_p4) }
 0x562   : >> { %v1607_v14 = vpop.f32.mrf.mxu0  ;;  %3813 = vmatprep.mubr.msk.bf16.mxu1 %vm4137_vm0, %v4136_v38 }
 0x564   : >> { %v3787_v28 = vpop.f32.mrf.mxu0 }
 0x566   : >> { %v1610_v46 = vpop.f32.mrf.mxu0 }
 0x567   : >> { %v1642_v31 = vpack.c.bf16 %v1610_v46, %v1607_v14 }
 0x568   : >> { %v3788_v25 = vpop.f32.mrf.mxu0 }
 0x569   : >> { %3814 = vmatmul.mubr.msk.bf16.gmra.mxu1 %vm1322_vm1, %v1642_v31 }
 0x56a   : >> { %v1615_v32 = vpop.f32.mrf.mxu0  ;;  %3817 = vmatprep.mubr.msk.bf16.mxu1 %vm4137_vm0, %v4136_v38 }
 0x56c   : >> { %v3791_v5 = vpop.f32.mrf.mxu0 }
 0x56e   : >> { %v1618_v34 = vpop.f32.mrf.mxu0 }
 0x56f   : >> { %v1643_v33 = vpack.c.bf16 %v1618_v34, %v1615_v32  ;;  %v1789_v32 = vld [vmem:[%s4250_s2 + $0x8] sm:$0xff] (%p821_p4) }
 0x570   : >> { %v3792_v8 = vpop.f32.mrf.mxu0 }
 0x571   : >> { %3818 = vmatmul.mubr.msk.bf16.gmra.mxu1 %vm1322_vm1, %v1643_v33 }
 0x572   : >> { %v1623_v35 = vpop.f32.mrf.mxu0  ;;  %3821 = vmatprep.mubr.msk.bf16.mxu1 %vm4137_vm0, %v4136_v38 }
 0x574   : >> { %v3795_v36 = vpop.f32.mrf.mxu0 }
 0x576   : >> { %v1626_v41 = vpop.f32.mrf.mxu0 }
 0x577   : >> { %v1644_v42 = vpack.c.bf16 %v1626_v41, %v1623_v35  ;;  %v1791_v35 = vld [vmem:[%s4250_s2 + $0x18] sm:$0xff] (%p821_p4) }
 0x578   : >> { %v3796_v39 = vpop.f32.mrf.mxu0 }
 0x579   : >> { %3822 = vmatmul.mubr.msk.bf16.gmra.mxu1 %vm1322_vm1, %v1644_v42 }
 0x619   : >> { %v1729_v21 = vpop.f32.mrf.mxu1 }
 0x61a   : >> { %v1768_v43 = vadd.f32 %v1729_v21, %v1630_v40 }
 0x61b   : >> { %v3807_v44 = vpop.f32.mrf.mxu1 }
 0x61c   : >> { %1778 = vst [vmem:[#allocation3 + $0x30] sm:$0xff] %v1768_v43  ;;  %v1792_v43 = vld [vmem:[%s4250_s2 + $0x20] sm:$0xff] (%p821_p4)  ;;  %v1793_v44 = vld [vmem:[%s4250_s2 + $0x28] sm:$0xff] (%p821_p4) }
 0x61d   : >> { %v1732_v48 = vpop.f32.mrf.mxu1 }
 0x61e   : >> { %v1769_v15 = vadd.f32 %v1732_v48, %v1631_v47 }
 0x61f   : >> { %v3808_v49 = vpop.f32.mrf.mxu1 }
 0x620   : >> { %1779 = vst [vmem:[#allocation3] sm:$0xff] %v1769_v15 }
 0x621   : >> { %v1737_v52 = vpop.f32.mrf.mxu1 }
 0x622   : >> { %v1770_v53 = vadd.f32 %v1737_v52, %v1632_v50 }
 0x623   : >> { %v3811_v38 = vpop.f32.mrf.mxu1  ;;  %v1799_v18 = vld [vmem:[#allocation3 + $0x30] sm:$0xff] (%p821_p4) }
 0x624   : >> { %1780 = vst [vmem:[#allocation3 + $0x18] sm:$0xff] %v1770_v53  ;;  %v1816_v24 = vadd.f32 (%p821_p4), %v3354_v19, %v1799_v18 }
 0x625   : >> { %v1740_v29 = vpop.f32.mrf.mxu1 }
 0x626   : >> { %v1771_v56 = vadd.f32 %v1740_v29, %v1633_v54  ;;  %v1832_v31 = vmul.f32 (%p821_p4), %v3355_v62, %v1816_v24 }
 0x627   : >> { %v3812_v57 = vpop.f32.mrf.mxu1  ;;  %v1800_v26 = vld [vmem:[#allocation3] sm:$0xff] (%p821_p4) }
 0x628   : >> { %1781 = vst [vmem:[#allocation3 + $0x10] sm:$0xff] %v1771_v56  ;;  %v1817_v14 = vadd.f32 (%p821_p4), %v3354_v19, %v1800_v26  ;;  %v4679_v39 = vadd.f32 (%p821_p4), %v1832_v31, %v1788_v23  ;;  %v1794_v56 = vld [vmem:[%s4250_s2 + $0x30] sm:$0xff] (%p821_p4)  ;;  %v1795_v57 = vld [vmem:[%s4250_s2 + $0x38] sm:$0xff] (%p821_p4) }
 0x629   : >> { %v1745_v60 = vpop.f32.mrf.mxu1 }
 0x62a   : >> { %v1772_v61 = vadd.f32 %v1745_v60, %v1634_v59  ;;  %v1833_v8 = vmul.f32 (%p821_p4), %v3355_v62, %v1817_v14  ;;  %5544 = vst [vmem:[#allocation4_spill] sm:$0xff] (%p821_p4), %v4679_v39  ;;  %1854 = vadd.xlane.f32.xlu0 (%p821_p4), %v4679_v39 }
 0x62b   : >> { %v3815_v37 = vpop.f32.mrf.mxu1  ;;  %v1801_v20 = vld [vmem:[#allocation3 + $0x18] sm:$0xff] (%p821_p4) }
 0x62c   : >> { %1782 = vst [vmem:[#allocation3 + $0x48] sm:$0xff] %v1772_v61  ;;  %v1818_v1 = vadd.f32 (%p821_p4), %v3354_v19, %v1801_v20  ;;  %v4685_v48 = vadd.f32 (%p821_p4), %v1833_v8, %v1789_v32 }
 0x62d   : >> { %v1748_v0 = vpop.f32.mrf.mxu1 }
 0x62e   : >> { %v1773_v2 = vadd.f32 %v1748_v0, %v1635_v63  ;;  %v1834_v25 = vmul.f32 (%p821_p4), %v3355_v62, %v1818_v1  ;;  %5546 = vst [vmem:[#allocation6_spill] sm:$0xff] (%p821_p4), %v4685_v48  ;;  %1856 = vadd.xlane.f32.xlu0 (%p821_p4), %v4685_v48  ;;  %v1796_v63 = vld [vmem:[%s4250_s2 + $0x40] sm:$0xff] (%p821_p4) }
 0x62f   : >> { %v3816_v45 = vpop.f32.mrf.mxu1  ;;  %v1802_v28 = vld [vmem:[#allocation3 + $0x10] sm:$0xff] (%p821_p4) }
 0x630   : >> { %1783 = vst [vmem:[#allocation3 + $0x28] sm:$0xff] %v1773_v2  ;;  %v1819_v5 = vadd.f32 (%p821_p4), %v3354_v19, %v1802_v28  ;;  %v4681_v40 = vadd.f32 (%p821_p4), %v1834_v25, %v1790_v27  ;;  %v1797_v2 = vld [vmem:[%s4250_s2 + $0x48] sm:$0xff] (%p821_p4) }
 0x631   : >> { %v1753_v4 = vpop.f32.mrf.mxu1 }
 0x632   : >> { %v1774_v51 = vadd.f32 %v1753_v4, %v1636_v3  ;;  %5545 = vst [vmem:[#allocation5_spill] sm:$0xff] (%p821_p4), %v4681_v40  ;;  %v1835_v21 = vmul.f32 (%p821_p4), %v3355_v62, %v1819_v5  ;;  %1858 = vadd.xlane.f32.xlu1 (%p821_p4), %v4681_v40 }
 0x633   : >> { %v3819_v6 = vpop.f32.mrf.mxu1  ;;  %v1803_v46 = vld [vmem:[#allocation3 + $0x48] sm:$0xff] (%p821_p4) }
 0x634   : >> { %1784 = vst [vmem:[#allocation3 + $0x8] sm:$0xff] %v1774_v51  ;;  %v1820_v34 = vadd.f32 (%p821_p4), %v3354_v19, %v1803_v46  ;;  %v4689_v52 = vadd.f32 (%p821_p4), %v1835_v21, %v1791_v35 }
 0x635   : >> { %v1756_v22 = vpop.f32.mrf.mxu1 }
 0x636   : >> { %v1775_v9 = vadd.f32 %v1756_v22, %v1637_v7  ;;  %v1836_v15 = vmul.f32 (%p821_p4), %v3355_v62, %v1820_v34  ;;  %5547 = vst [vmem:[#allocation7_spill] sm:$0xff] (%p821_p4), %v4689_v52  ;;  %1860 = vadd.xlane.f32.xlu1 (%p821_p4), %v4689_v52  ;;  %v3939_v7 = vld [vmem:[%s5504_s14 + $0xe4] ss:$16 sps:$4 sm:$0xff] (%p821_p4)   ;;  %v3941_v22 = vld [vmem:[%s5504_s14 + $0xec] ss:$16 sps:$4 sm:$0xff] (%p821_p4)  }
 0x637   : >> { %v3820_v55 = vpop.f32.mrf.mxu1  ;;  %v1804_v33 = vld [vmem:[#allocation3 + $0x28] sm:$0xff] (%p821_p4)  ;;  %2215 = vmatprep.subr.bf16.mxu0 (%p821_p4), %v3939_v7  ;;  %2298 = vmatprep.subr.bf16.mxu1 (%p821_p4), %v3941_v22  ;;  %v3962_v22 = vld [vmem:[%s5504_s14 + $0x88] ss:$16 sps:$4 sm:$0xff] (%p821_p4)  }
 0x638   : >> { %1785 = vst [vmem:[#allocation3 + $0x20] sm:$0xff] %v1775_v9  ;;  %v1821_v36 = vadd.f32 (%p821_p4), %v3354_v19, %v1804_v33  ;;  %v4691_v54 = vadd.f32 (%p821_p4), %v1836_v15, %v1792_v43  ;;  %v3943_v9 = vld [vmem:[%s5504_s14 + $0xe0] ss:$16 sps:$4 sm:$0xff] (%p821_p4)   ;;  %v3944_v55 = vld [vmem:[%s5504_s14 + $0xe8] ss:$16 sps:$4 sm:$0xff] (%p821_p4)  }
 0x639   : >> { %v1761_v11 = vpop.f32.mrf.mxu1  ;;  %2216 = vmatpush1.bf16.msra.mxu0 (%p821_p4), %v3943_v9  ;;  %2299 = vmatpush1.bf16.msra.mxu1 (%p821_p4), %v3944_v55  ;;  %v3945_v15 = vld [vmem:[%s5504_s14 + $0xc4] ss:$16 sps:$4 sm:$0xff] (%p821_p4)   ;;  %v3961_v7 = vld [vmem:[%s5504_s14 + $0x80] ss:$16 sps:$4 sm:$0xff] (%p821_p4)   ;;  %v3965_v55 = vld [vmem:[%s5504_s14 + $0x6c] ss:$16 sps:$4 sm:$0xff] (%p821_p4)  }
 0x63a   : >> { %v1776_v58 = vadd.f32 %v1761_v11, %v1638_v10  ;;  %v1837_v49 = vmul.f32 (%p821_p4), %v3355_v62, %v1821_v36  ;;  %5548 = vst [vmem:[#allocation8_spill] sm:$0xff] (%p821_p4), %v4691_v54  ;;  %1862 = vadd.xlane.f32.xlu0 (%p821_p4), %v4691_v54  ;;  %2217 = vmatprep.subr.bf16.mxu0 (%p821_p4), %v3945_v15  ;;  %v3963_v9 = vld [vmem:[%s5504_s14 + $0x64] ss:$16 sps:$4 sm:$0xff] (%p821_p4)  }
 0x63b   : >> { %v3823_v12 = vpop.f32.mrf.mxu1  ;;  %v1805_v41 = vld [vmem:[#allocation3 + $0x8] sm:$0xff] (%p821_p4) }
 0x63c   : >> { %1786 = vst [vmem:[#allocation3 + $0x40] sm:$0xff] %v1776_v58  ;;  %823 = sbr.rel (!%p821_p4) target bundleno = 352 (0x160), region = 140  ;;  %v1822_v53 = vadd.f32 (%p821_p4), %v3354_v19, %v1805_v41  ;;  %v4693_v29 = vadd.f32 (%p821_p4), %v1837_v49, %v1793_v44  ;;  %v3947_v49 = vld [vmem:[%s5504_s14 + $0xcc] ss:$16 sps:$4 sm:$0xff] (%p821_p4)  }
 0x63d   : >> { %v1764_v13 = vpop.f32.mrf.mxu1  ;;  %2300 = vmatprep.subr.bf16.mxu1 (%p821_p4), %v3947_v49 }
 0x63e   : >> { %v1777_v16 = vadd.f32 %v1764_v13, %v1639_v30  ;;  %5549 = vst [vmem:[#allocation9_spill] sm:$0xff] (%p821_p4), %v4693_v29  ;;  %v1838_v60 = vmul.f32 (%p821_p4), %v3355_v62, %v1822_v53  ;;  %1864 = vadd.xlane.f32.xlu1 (%p821_p4), %v4693_v29  ;;  %v3950_v53 = vld [vmem:[%s5504_s14 + $0xc8] ss:$16 sps:$4 sm:$0xff] (%p821_p4)  }
 0x63f   : >> { %v3824_v17 = vpop.f32.mrf.mxu1  ;;  %v1806_v42 = vld [vmem:[#allocation3 + $0x20] sm:$0xff] (%p821_p4)  ;;  %2301 = vmatpush1.bf16.msra.mxu1 (%p821_p4), %v3950_v53 }
 0x640   : >> { %1787 = vst [vmem:[#allocation3 + $0x38] sm:$0xff] %v1777_v16  ;;  %v1823_v38 = vadd.f32 (%p821_p4), %v3354_v19, %v1806_v42  ;;  %v4703_v45 = vadd.f32 (%p821_p4), %v1838_v60, %v1794_v56  ;;  %v3951_v60 = vld [vmem:[%s5504_s14 + $0xa4] ss:$16 sps:$4 sm:$0xff] (%p821_p4)  }
 0x642   : > { %v1839_v61 = vmul.f32 %v3355_v62, %v1823_v38  ;;  %5550 = vst [vmem:[#allocation10_spill] sm:$0xff] %v4703_v45  ;;  %1866 = vadd.xlane.f32.xlu0 %v4703_v45 }
 0x643   : > { %v1807_v47 = vld [vmem:[#allocation3 + $0x40] sm:$0xff] }
 0x644   : > { %v1824_v59 = vadd.f32 %v3354_v19, %v1807_v47  ;;  %v4705_v3 = vadd.f32 %v1839_v61, %v1795_v57  ;;  %v3953_v61 = vld [vmem:[%s5504_s14 + $0xac] ss:$16 sps:$4 sm:$0xff]  }
 0x645   : > { %2302 = vmatprep.subr.bf16.mxu1 %v3953_v61 }
 0x646   : > { %v1840_v0 = vmul.f32 %v3355_v62, %v1824_v59  ;;  %5551 = vst [vmem:[#allocation11_spill] sm:$0xff] %v4705_v3  ;;  %1868 = vadd.xlane.f32.xlu1 %v4705_v3 }
 0x647   : > { %v1808_v50 = vld [vmem:[#allocation3 + $0x38] sm:$0xff] }
 0x648   : > { %v1825_v37 = vadd.f32 %v3354_v19, %v1808_v50  ;;  %v4709_v51 = vadd.f32 %v1840_v0, %v1796_v63  ;;  %v3949_v50 = vld [vmem:[%s5504_s14 + $0xc0] ss:$16 sps:$4 sm:$0xff]   ;;  %v3956_v0 = vld [vmem:[%s5504_s14 + $0xa8] ss:$16 sps:$4 sm:$0xff]  }
 0x649   : > { %2218 = vmatpush1.bf16.msra.mxu0 %v3949_v50  ;;  %v3955_v63 = vld [vmem:[%s5504_s14 + $0xa0] ss:$16 sps:$4 sm:$0xff]   ;;  %2303 = vmatpush1.bf16.msra.mxu1 %v3956_v0 }
 0x64a   : > { %v1841_v4 = vmul.f32 %v3355_v62, %v1825_v37  ;;  %5552 = vst [vmem:[#allocation12_spill] sm:$0xff] %v4709_v51  ;;  %1870 = vadd.xlane.f32.xlu0 %v4709_v51  ;;  %2219 = vmatprep.subr.bf16.mxu0 %v3951_v60 }
 0x64c   : > { %v4711_v6 = vadd.f32 %v1841_v4, %v1797_v2  ;;  %v3957_v2 = vld [vmem:[%s5504_s14 + $0x84] ss:$16 sps:$4 sm:$0xff]   ;;  %v3959_v4 = vld [vmem:[%s5504_s14 + $0x8c] ss:$16 sps:$4 sm:$0xff]  }
 0x64d   : > { %2220 = vmatpush1.bf16.msra.mxu0 %v3955_v63  ;;  %2304 = vmatprep.subr.bf16.mxu1 %v3959_v4  ;;  %v4867_v4 = vld [vmem:[%s5502_s12] ss:$0 sm:$0xff] }
 0x64e   : > { %5553 = vst [vmem:[#allocation13_spill] sm:$0xff] %v4711_v6  ;;  %1872 = vadd.xlane.f32.xlu1 %v4711_v6  ;;  %2221 = vmatprep.subr.bf16.mxu0 %v3957_v2 }
 0x64f   : > { %2305 = vmatpush1.bf16.msra.mxu1 %v3962_v22 }
 0x650   : > { %2306 = vmatprep.subr.bf16.mxu1 %v3965_v55 }
 0x651   : > { %2222 = vmatpush1.bf16.msra.mxu0 %v3961_v7 }
 0x652   : > { %2223 = vmatprep.subr.bf16.mxu0 %v3963_v9 }
 0x6b3   : > { %v1855_v10 = vpop.xlane.xlu0 %1854 }
 0x6b4   : > { %v1874_v58 = vmul.f32 0.0078125, %v1855_v10  ;;  %v3967_v10 = vld [vmem:[%s5504_s14 + $0x60] ss:$16 sps:$4 sm:$0xff]  }
 0x6b5   : > { %2224 = vmatpush1.bf16.msra.mxu0 %v3967_v10 }
 0x6b6   : > { %v4728_v30 = vsub.f32 %v4679_v39, %v1874_v58  ;;  %v3969_v58 = vld [vmem:[%s5504_s14 + $0x44] ss:$16 sps:$4 sm:$0xff]  }
 0x6b7   : > { %v1857_v16 = vpop.xlane.xlu0 %1856  ;;  %2225 = vmatprep.subr.bf16.mxu0 %v3969_v58 }
 0x6b8   : > { %v1875_v18 = vmul.f32 0.0078125, %v1857_v16  ;;  %v1894_v62 = vmul.f32 %v4728_v30, %v4728_v30  ;;  %v3973_v16 = vld [vmem:[%s5504_s14 + $0x40] ss:$16 sps:$4 sm:$0xff]  }
 0x6b9   : > { %2226 = vmatpush1.bf16.msra.mxu0 %v3973_v16  ;;  %v3357_v16 = vld [vmem:[%s5503_s13] ss:$0 sm:$0xff] }
 0x6ba   : > { %v4736_v20 = vsub.f32 %v4685_v48, %v1875_v18  ;;  %1904 = vadd.xlane.f32.xlu0 %v1894_v62  ;;  %v3975_v18 = vld [vmem:[%s5504_s14 + $0x24] ss:$16 sps:$4 sm:$0xff]   ;;  %v3977_v62 = vld [vmem:[%s5504_s14 + $0x2c] ss:$16 sps:$4 sm:$0xff]  }
 0x6bb   : > { %v1859_v11 = vpop.xlane.xlu1 %1858  ;;  %2227 = vmatprep.subr.bf16.mxu0 %v3975_v18 }
 0x6bc   : > { %v1876_v12 = vmul.f32 0.0078125, %v1859_v11  ;;  %v1895_v14 = vmul.f32 %v4736_v20, %v4736_v20  ;;  %v3968_v11 = vld [vmem:[%s5504_s14 + $0x68] ss:$16 sps:$4 sm:$0xff]  }
 0x6bd   : > { %2307 = vmatpush1.bf16.msra.mxu1 %v3968_v11 }
 0x6be   : > { %v4731_v13 = vsub.f32 %v4681_v40, %v1876_v12  ;;  %1906 = vadd.xlane.f32.xlu1 %v1895_v14  ;;  %v3971_v12 = vld [vmem:[%s5504_s14 + $0x4c] ss:$16 sps:$4 sm:$0xff]   ;;  %v3986_v14 = vld [vmem:[%s5504_s14 + $0x8] ss:$16 sps:$4 sm:$0xff]  }
 0x6bf   : > { %v1861_v17 = vpop.xlane.xlu1 %1860  ;;  %2308 = vmatprep.subr.bf16.mxu1 %v3971_v12 }
 0x6c0   : > { %v1877_v19 = vmul.f32 0.0078125, %v1861_v17  ;;  %v1896_v24 = vmul.f32 %v4731_v13, %v4731_v13  ;;  %v3974_v17 = vld [vmem:[%s5504_s14 + $0x48] ss:$16 sps:$4 sm:$0xff]  }
 0x6c1   : > { %2309 = vmatpush1.bf16.msra.mxu1 %v3974_v17 }
 0x6c2   : > { %v4739_v23 = vsub.f32 %v4689_v52, %v1877_v19  ;;  %1908 = vadd.xlane.f32.xlu0 %v1896_v24  ;;  %v3979_v19 = vld [vmem:[%s5504_s14 + $0x20] ss:$16 sps:$4 sm:$0xff]   ;;  %v3980_v24 = vld [vmem:[%s5504_s14 + $0x28] ss:$16 sps:$4 sm:$0xff]   ;;  %2310 = vmatprep.subr.bf16.mxu1 %v3977_v62 }
 0x6c3   : > { %v1863_v1 = vpop.xlane.xlu0 %1862  ;;  %2228 = vmatpush1.bf16.msra.mxu0 %v3979_v19 }
 0x6c4   : > { %v1878_v27 = vmul.f32 0.0078125, %v1863_v1  ;;  %v1897_v25 = vmul.f32 %v4739_v23, %v4739_v23  ;;  %v3981_v1 = vld [vmem:[%s5504_s14 + $0x4] ss:$16 sps:$4 sm:$0xff]  }
 0x6c5   : > { %2311 = vmatpush1.bf16.msra.mxu1 %v3980_v24  ;;  %2229 = vmatprep.subr.bf16.mxu0 %v3981_v1 }
 0x6c6   : > { %v4746_v46 = vsub.f32 %v4691_v54, %v1878_v27  ;;  %1910 = vadd.xlane.f32.xlu1 %v1897_v25  ;;  %v3985_v27 = vld [vmem:[%s5504_s14] ss:$16 sps:$4 sm:$0xff]  }
 0x6c7   : > { %v1865_v26 = vpop.xlane.xlu1 %1864  ;;  %2230 = vmatpush1.bf16.msra.mxu0 %v3985_v27 }
 0x6c8   : > { %v1879_v28 = vmul.f32 0.0078125, %v1865_v26  ;;  %v1898_v33 = vmul.f32 %v4746_v46, %v4746_v46  ;;  %v3983_v26 = vld [vmem:[%s5504_s14 + $0xc] ss:$16 sps:$4 sm:$0xff]  }
 0x6c9   : > { %2312 = vmatprep.subr.bf16.mxu1 %v3983_v26 }
 0x6ca   : > { %v4749_v31 = vsub.f32 %v4693_v29, %v1879_v28  ;;  %1912 = vadd.xlane.f32.xlu0 %v1898_v33  ;;  %v4138_v28 = vmov 0   ;;  %2313 = vmatpush1.bf16.msra.mxu1 %v3986_v14 }
 0x6cb   : > { %v1867_v32 = vpop.xlane.xlu0 %1866  ;;  %2247 = vmatprep.mubr.bf16.mxu0 %v4138_v28  ;;  %2330 = vmatprep.mubr.bf16.mxu1 %v4138_v28 }
 0x6cc   : > { %v1880_v34 = vmul.f32 0.0078125, %v1867_v32  ;;  %v1899_v41 = vmul.f32 %v4749_v31, %v4749_v31 }
 0x6ce   : > { %v4756_v35 = vsub.f32 %v4703_v45, %v1880_v34  ;;  %1914 = vadd.xlane.f32.xlu1 %v1899_v41 }
 0x6cf   : > { %v1869_v5 = vpop.xlane.xlu1 %1868 }
 0x6d0   : > { %v1881_v8 = vmul.f32 0.0078125, %v1869_v5  ;;  %v1900_v44 = vmul.f32 %v4756_v35, %v4756_v35 }
 0x6d2   : > { %v4759_v36 = vsub.f32 %v4705_v3, %v1881_v8  ;;  %1916 = vadd.xlane.f32.xlu0 %v1900_v44 }
 0x6d3   : > { %v1871_v42 = vpop.xlane.xlu0 %1870 }
 0x6d4   : > { %v1882_v43 = vmul.f32 0.0078125, %v1871_v42  ;;  %v1901_v57 = vmul.f32 %v4759_v36, %v4759_v36 }
 0x6d6   : > { %v4778_v38 = vsub.f32 %v4709_v51, %v1882_v43  ;;  %1918 = vadd.xlane.f32.xlu1 %v1901_v57 }
 0x6d7   : > { %v1873_v21 = vpop.xlane.xlu1 %1872 }
 0x6d8   : > { %v1883_v47 = vmul.f32 0.0078125, %v1873_v21  ;;  %v1902_v59 = vmul.f32 %v4778_v38, %v4778_v38 }
 0x6da   : > { %v4781_v56 = vsub.f32 %v4711_v6, %v1883_v47  ;;  %1920 = vadd.xlane.f32.xlu0 %v1902_v59 }
 0x6dc   : > { %v1903_v37 = vmul.f32 %v4781_v56, %v4781_v56 }
 0x6de   : > { %1922 = vadd.xlane.f32.xlu1 %v1903_v37 }
 0x743   : > { %v1905_v25 = vpop.xlane.xlu0 %1904 }
 0x744   : > { %v1924_v32 = vmul.f32 0.0078125, %v1905_v25 }
 0x746   : > { %v1934_v5 = vadd.f32 1e-06, %v1924_v32 }
 0x747   : > { %v1907_v34 = vpop.xlane.xlu1 %1906 }
 0x748   : > { %4019 = vrsqrt.f32 %v1934_v5  ;;  %v1925_v8 = vmul.f32 0.0078125, %v1907_v34 }
 0x74a   : > { %v1935_v42 = vadd.f32 1e-06, %v1925_v8 }
 0x74b   : > { %v1909_v33 = vpop.xlane.xlu0 %1908 }
 0x74c   : > { %v1926_v41 = vmul.f32 0.0078125, %v1909_v33  ;;  %4021 = vrsqrt.f32 %v1935_v42 }
 0x74e   : > { %v1936_v21 = vadd.f32 1e-06, %v1926_v41 }
 0x74f   : > { %v1911_v43 = vpop.xlane.xlu1 %1910 }
 0x750   : > { %v1927_v47 = vmul.f32 0.0078125, %v1911_v43  ;;  %4023 = vrsqrt.f32 %v1936_v21 }
 0x752   : > { %v1937_v15 = vadd.f32 1e-06, %v1927_v47 }
 0x753   : > { %v1913_v44 = vpop.xlane.xlu0 %1912 }
 0x754   : > { %v1928_v49 = vmul.f32 0.0078125, %v1913_v44  ;;  %4025 = vrsqrt.f32 %v1937_v15 }
 0x755   : > { %v4020_v63 = vpop.eup %4019 }
 0x756   : > { %v1938_v57 = vadd.f32 1e-06, %v1928_v49  ;;  %v1954_v2 = vmul.f32 %v4020_v63, %v4728_v30 }
 0x757   : > { %v1915_v50 = vpop.xlane.xlu1 %1914 }
 0x758   : > { %v1929_v53 = vmul.f32 0.0078125, %v1915_v50  ;;  %v1970_v58 = vmul.f32 %v4867_v4, %v1954_v2 }
 0x759   : > { %v4022_v22 = vpop.eup %4021 }
 0x75a   : > { %v1939_v59 = vadd.f32 1e-06, %v1929_v53  ;;  %v1955_v11 = vmul.f32 %v4022_v22, %v4736_v20  ;;  %v1986_v19 = vadd.f32 %v3357_v16, %v1970_v58  ;;  %v3995_v58 = vld [vmem:[%s5506_s16 + $0x68] sm:$0xff]  }
 0x75b   : > { %v1917_v60 = vpop.xlane.xlu0 %1916 }
 0x75c   : > { %4027 = vrsqrt.f32 %v1939_v59  ;;  %v1930_v0 = vmul.f32 0.0078125, %v1917_v60  ;;  %v1971_v17 = vmul.f32 %v4867_v4, %v1955_v11  ;;  %v3994_v11 = vld [vmem:[%s5506_s16 + $0xb0] sm:$0xff]  }
 0x75d   : > { %4029 = vrsqrt.f32 %v1938_v57  ;;  %v4024_v12 = vpop.eup %4023 }
 0x75e   : > { %v1940_v9 = vadd.f32 1e-06, %v1930_v0  ;;  %v1987_v24 = vadd.f32 %v3357_v16, %v1971_v17  ;;  %v1956_v1 = vmul.f32 %v4024_v12, %v4731_v13  ;;  %v3997_v12 = vld [vmem:[%s5506_s16 + $0xe8] sm:$0xff]   ;;  %v3999_v17 = vld [vmem:[%s5506_s16 + $0x60] sm:$0xff]  }
 0x75f   : > { %v1919_v61 = vpop.xlane.xlu1 %1918 }
 0x760   : > { %v1931_v37 = vmul.f32 0.0078125, %v1919_v61  ;;  %v1996_v27 = vpack.c.bf16 %v1987_v24, %v1986_v19  ;;  %v1972_v5 = vmul.f32 %v4867_v4, %v1956_v1  ;;  %v4002_v19 = vld [vmem:[%s5506_s16 + $0xa0] sm:$0xff]   ;;  %v4003_v24 = vld [vmem:[%s5506_s16 + $0x58] sm:$0xff]  }
 0x761   : > { %v4026_v18 = vpop.eup %4025  ;;  %v4005_v1 = vld [vmem:[%s5506_s16 + $0xd8] sm:$0xff]  }
 0x762   : > { %v1941_v7 = vadd.f32 1e-06, %v1931_v37  ;;  %v1957_v20 = vmul.f32 %v4026_v18, %v4739_v23  ;;  %2248 = vmatmul.mubr.bf16.vlgmr.msra.gmra.mxu0 %v1996_v27  ;;  %2331 = vmatmul.mubr.bf16.vlgmr.msra.gmra.mxu1 %v1996_v27  ;;  %v1988_v23 = vadd.f32 %v3357_v16, %v1972_v5  ;;  %v4001_v18 = vld [vmem:[%s5506_s16 + $0xe0] sm:$0xff]   ;;  %v4007_v27 = vld [vmem:[%s5506_s16 + $0x50] sm:$0xff]   ;;  %v4011_v5 = vld [vmem:[%s5506_s16 + $0x48] sm:$0xff]  }
 0x763   : > { %v1921_v10 = vpop.xlane.xlu0 %1920  ;;  %2257 = vmatprep.mubr.bf16.mxu0 %v4138_v28  ;;  %2340 = vmatprep.mubr.bf16.mxu1 %v4138_v28 }
 0x764   : > { %4031 = vrsqrt.f32 %v1941_v7  ;;  %v1932_v62 = vmul.f32 0.0078125, %v1921_v10  ;;  %v1973_v14 = vmul.f32 %v4867_v4, %v1957_v20  ;;  %v3993_v10 = vld [vmem:[%s5506_s16 + $0xf0] sm:$0xff]   ;;  %v4004_v20 = vld [vmem:[%s5506_s16 + $0x18] sm:$0xff]  }
 0x765   : > { %4033 = vrsqrt.f32 %v1940_v9  ;;  %v3991_v9 = vld [vmem:[%s5506_s16 + $0x70] sm:$0xff]  }
 0x766   : > { %v1942_v32 = vadd.f32 1e-06, %v1932_v62  ;;  %v1989_v33 = vadd.f32 %v3357_v16, %v1973_v14  ;;  %v4000_v62 = vld [vmem:[%s5506_s16 + $0x20] sm:$0xff]   ;;  %v4009_v14 = vld [vmem:[%s5506_s16 + $0xd0] sm:$0xff]  }
 0x767   : > { %v1923_v55 = vpop.xlane.xlu1 %1922 }
 0x768   : > { %v1933_v30 = vmul.f32 0.0078125, %v1923_v55  ;;  %v1997_v41 = vpack.c.bf16 %v1989_v33, %v1988_v23  ;;  %v3992_v55 = vld [vmem:[%s5506_s16 + $0x30] sm:$0xff]   ;;  %v4012_v33 = vld [vmem:[%s5506_s16 + $0x8] sm:$0xff]   ;;  %v4015_v23 = vld [vmem:[%s5506_s16 + $0x40] sm:$0xff]  }
 0x769   : > { %v4028_v25 = vpop.eup %4027 }
 0x76a   : > { %v1943_v26 = vadd.f32 1e-06, %v1933_v30  ;;  %v4030_v34 = vpop.eup %4029  ;;  %v1959_v13 = vmul.f32 %v4028_v25, %v4749_v31  ;;  %2258 = vmatmul.mubr.bf16.gmra.mxu0 %v1997_v41  ;;  %2341 = vmatmul.mubr.bf16.gmra.mxu1 %v1997_v41  ;;  %v3998_v30 = vld [vmem:[%s5506_s16 + $0xa8] sm:$0xff]   ;;  %v4008_v25 = vld [vmem:[%s5506_s16 + $0x10] sm:$0xff]   ;;  %v4017_v41 = vld [vmem:[%s5506_s16 + $0xc0] sm:$0xff]  }
 0x76b   : > { %v1958_v8 = vmul.f32 %v4030_v34, %v4746_v46  ;;  %2267 = vmatprep.mubr.bf16.mxu0 %v4138_v28  ;;  %2350 = vmatprep.mubr.bf16.mxu1 %v4138_v28  ;;  %v4013_v34 = vld [vmem:[%s5506_s16 + $0xc8] sm:$0xff]  }
 0x76c   : > { %4035 = vrsqrt.f32 %v1943_v26  ;;  %v1975_v42 = vmul.f32 %v4867_v4, %v1959_v13  ;;  %v4006_v26 = vld [vmem:[%s5506_s16 + $0x98] sm:$0xff]   ;;  %v4014_v13 = vld [vmem:[%s5506_s16 + $0x88] sm:$0xff]  }
 0x76d   : > { %4037 = vrsqrt.f32 %v1942_v32  ;;  %v1974_v44 = vmul.f32 %v4867_v4, %v1958_v8  ;;  %v4010_v32 = vld [vmem:[%s5506_s16 + $0x90] sm:$0xff]   ;;  %v4016_v8 = vld [vmem:[%s5506_s16] sm:$0xff]  }
 0x76e   : > { %v1991_v47 = vadd.f32 %v3357_v16, %v1975_v42  ;;  %v4018_v42 = vld [vmem:[%s5506_s16 + $0x80] sm:$0xff]  }
 0x76f   : > { %v1990_v15 = vadd.f32 %v3357_v16, %v1974_v44 }
 0x771   : > { %v4032_v21 = vpop.eup %4031  ;;  %v1998_v46 = vpack.c.bf16 %v1991_v47, %v1990_v15 }
 0x772   : > { %v4034_v43 = vpop.eup %4033  ;;  %v1961_v31 = vmul.f32 %v4032_v21, %v4759_v36  ;;  %v2035_v21 = vlaneseq }
 0x773   : > { %v1960_v49 = vmul.f32 %v4034_v43, %v4756_v35  ;;  %2268 = vmatmul.mubr.bf16.gmra.mxu0 %v1998_v46  ;;  %2351 = vmatmul.mubr.bf16.gmra.mxu1 %v1998_v46 }
 0x774   : > { %v1977_v50 = vmul.f32 %v4867_v4, %v1961_v31  ;;  %2277 = vmatprep.mubr.bf16.mxu0 %v4138_v28  ;;  %2360 = vmatprep.mubr.bf16.mxu1 %v4138_v28  ;;  %v2036_v43 = vshrl.u32 %v2035_v21, 7  ;;  %v2033_v31 = vld [vmem:[%s5505_s15] sm:$0xf] }
 0x775   : > { %v1976_v57 = vmul.f32 %v4867_v4, %v1960_v49 }
 0x776   : > { %v1993_v60 = vadd.f32 %v3357_v16, %v1977_v50  ;;  %v2037_v44 = vsub.s32 0, %v2036_v43  ;;  %v2045_v47 = vsub.s32 2, %v2036_v43  ;;  %v2041_v15 = vsub.s32 1, %v2036_v43 }
 0x777   : > { %v1992_v36 = vadd.f32 %v3357_v16, %v1976_v57  ;;  %v2049_v49 = vsub.s32 3, %v2036_v43 }
 0x778   : > { %v4998_v46 = vrot.slane %v2033_v31, %v2037_v44  ;;  %v5000_v50 = vrot.slane %v2033_v31, %v2045_v47 }
 0x779   : > { %v4036_v53 = vpop.eup %4035  ;;  %v1999_v35 = vpack.c.bf16 %v1993_v60, %v1992_v36  ;;  %v5004_v57 = vrot.slane %v2033_v31, %v2049_v49 }
 0x77a   : > { %v4038_v59 = vpop.eup %4037  ;;  %v1963_v61 = vmul.f32 %v4036_v53, %v4781_v56  ;;  %v3989_v56 = vld [vmem:[%s5506_s16 + $0xf8] sm:$0xff]   ;;  %v5002_v53 = vrot.slane %v2033_v31, %v2041_v15 }
 0x77b   : > { %v1962_v37 = vmul.f32 %v4038_v59, %v4778_v38  ;;  %2278 = vmatmul.mubr.bf16.gmra.mxu0 %v1999_v35  ;;  %2361 = vmatmul.mubr.bf16.gmra.mxu1 %v1999_v35  ;;  %v3987_v38 = vld [vmem:[%s5506_s16 + $0x78] sm:$0xff]  }
 0x77c   : > { %v1979_v63 = vmul.f32 %v4867_v4, %v1963_v61  ;;  %2287 = vmatprep.mubr.bf16.mxu0 %v4138_v28  ;;  %2370 = vmatprep.mubr.bf16.mxu1 %v4138_v28  ;;  %v3990_v28 = vld [vmem:[%s5506_s16 + $0xb8] sm:$0xff]  }
 0x77d   : > { %v1978_v0 = vmul.f32 %v4867_v4, %v1962_v37  ;;  %v3988_v4 = vld [vmem:[%s5506_s16 + $0x38] sm:$0xff]   ;;  %3537 = vmatprep.subr.bf16.mxu0 %v3987_v38  ;;  %3583 = vmatprep.subr.bf16.mxu1 %v3989_v56 }
 0x77e   : > { %v1995_v2 = vadd.f32 %v3357_v16, %v1979_v63  ;;  %3538 = vmatpush3.bf16.msra.mxu0 %v3988_v4  ;;  %3584 = vmatpush3.bf16.msra.mxu1 %v3990_v28 }
 0x77f   : > { %v1994_v7 = vadd.f32 %v3357_v16, %v1978_v0  ;;  %3539 = vmatprep.subr.bf16.mxu0 %v3991_v9  ;;  %3585 = vmatprep.subr.bf16.mxu1 %v3993_v10  ;;  %v3996_v16 = vld [vmem:[%s5506_s16 + $0x28] sm:$0xff]  }
 0x781   : > { %v2000_v22 = vpack.c.bf16 %v1995_v2, %v1994_v7 }
 0x782   : > { %3540 = vmatpush3.bf16.msra.mxu0 %v3992_v55  ;;  %3586 = vmatpush3.bf16.msra.mxu1 %v3994_v11 }
 0x783   : > { %2288 = vmatmul.mubr.bf16.gmra.mxu0 %v2000_v22  ;;  %2371 = vmatmul.mubr.bf16.gmra.mxu1 %v2000_v22 }
 0x784   : > { %3541 = vmatprep.subr.bf16.mxu0 %v3995_v58  ;;  %3587 = vmatprep.subr.bf16.mxu1 %v3997_v12 }
 0x786   : > { %3542 = vmatpush3.bf16.msra.mxu0 %v3996_v16  ;;  %3588 = vmatpush3.bf16.msra.mxu1 %v3998_v30 }
 0x787   : > { %3543 = vmatprep.subr.bf16.mxu0 %v3999_v17  ;;  %3589 = vmatprep.subr.bf16.mxu1 %v4001_v18 }
 0x78a   : > { %3544 = vmatpush3.bf16.msra.mxu0 %v4000_v62  ;;  %3590 = vmatpush3.bf16.msra.mxu1 %v4002_v19 }
 0x78b   : > { %3545 = vmatprep.subr.bf16.mxu0 %v4003_v24  ;;  %3591 = vmatprep.subr.bf16.mxu1 %v4005_v1 }
 0x78e   : > { %3546 = vmatpush3.bf16.msra.mxu0 %v4004_v20  ;;  %3592 = vmatpush3.bf16.msra.mxu1 %v4006_v26 }
 0x78f   : > { %3547 = vmatprep.subr.bf16.mxu0 %v4007_v27  ;;  %3593 = vmatprep.subr.bf16.mxu1 %v4009_v14 }
 0x792   : > { %3548 = vmatpush3.bf16.msra.mxu0 %v4008_v25  ;;  %3594 = vmatpush3.bf16.msra.mxu1 %v4010_v32 }
 0x793   : > { %3549 = vmatprep.subr.bf16.mxu0 %v4011_v5  ;;  %3595 = vmatprep.subr.bf16.mxu1 %v4013_v34 }
 0x796   : > { %3550 = vmatpush3.bf16.msra.mxu0 %v4012_v33  ;;  %3596 = vmatpush3.bf16.msra.mxu1 %v4014_v13 }
 0x797   : > { %3551 = vmatprep.subr.bf16.mxu0 %v4015_v23  ;;  %3597 = vmatprep.subr.bf16.mxu1 %v4017_v41 }
 0x79a   : > { %3552 = vmatpush3.bf16.msra.mxu0 %v4016_v8  ;;  %3598 = vmatpush3.bf16.msra.mxu1 %v4018_v42 }
 0x822   : > { %v2249_v59 = vpop.f32.mrf.mxu0  ;;  %v2332_v60 = vpop.f32.mrf.mxu1 }
 0x823   : > { %v5007_v61 = vadd.f32 %v2249_v59, %v4998_v46  ;;  %v5010_v36 = vadd.f32 %v2332_v60, %v5000_v50 }
 0x824   : > { %v2251_v37 = vpop.f32.mrf.mxu0  ;;  %v2334_v35 = vpop.f32.mrf.mxu1 }
 0x825   : > { %v2381_v63 = vmul.f32 %v5007_v61, %v5007_v61  ;;  %v2383_v0 = vmul.f32 %v5010_v36, %v5010_v36  ;;  %v5017_v2 = vadd.f32 %v2251_v37, %v5002_v53  ;;  %v5020_v7 = vadd.f32 %v2334_v35, %v5004_v57 }
 0x826   : > { %v2253_v22 = vpop.f32.mrf.mxu0  ;;  %v2336_v38 = vpop.f32.mrf.mxu1 }
 0x827   : > { %v2421_v56 = vmul.f32 %v2381_v63, %v5007_v61  ;;  %v2423_v4 = vmul.f32 %v2383_v0, %v5010_v36  ;;  %v2382_v28 = vmul.f32 %v5017_v2, %v5017_v2  ;;  %v2384_v9 = vmul.f32 %v5020_v7, %v5020_v7 }
 0x828   : > { %v5029_v55 = vadd.f32 %v2253_v22, %v4998_v46  ;;  %v5032_v10 = vadd.f32 %v2336_v38, %v5000_v50  ;;  %v2255_v11 = vpop.f32.mrf.mxu0  ;;  %v2338_v58 = vpop.f32.mrf.mxu1 }
 0x829   : > { %v2461_v12 = vmul.f32 0.044715, %v2421_v56  ;;  %v2463_v16 = vmul.f32 0.044715, %v2423_v4  ;;  %v2422_v30 = vmul.f32 %v2382_v28, %v5017_v2  ;;  %v2424_v17 = vmul.f32 %v2384_v9, %v5020_v7 }
 0x82a   : > { %v2385_v18 = vmul.f32 %v5029_v55, %v5029_v55  ;;  %v2387_v62 = vmul.f32 %v5032_v10, %v5032_v10  ;;  %v5041_v19 = vadd.f32 %v2255_v11, %v5002_v53  ;;  %v5044_v24 = vadd.f32 %v2338_v58, %v5004_v57  ;;  %v2259_v1 = vpop.f32.mrf.mxu0  ;;  %v2342_v20 = vpop.f32.mrf.mxu1 }
 0x82b   : > { %v2501_v26 = vadd.f32 %v2461_v12, %v5007_v61  ;;  %v2503_v27 = vadd.f32 %v2463_v16, %v5010_v36  ;;  %v2462_v14 = vmul.f32 0.044715, %v2422_v30  ;;  %v2464_v25 = vmul.f32 0.044715, %v2424_v17 }
 0x82c   : > { %v2425_v32 = vmul.f32 %v2385_v18, %v5029_v55  ;;  %v2427_v5 = vmul.f32 %v2387_v62, %v5032_v10  ;;  %v2386_v34 = vmul.f32 %v5041_v19, %v5041_v19  ;;  %v2388_v33 = vmul.f32 %v5044_v24, %v5044_v24  ;;  %v2261_v13 = vpop.f32.mrf.mxu0  ;;  %v2344_v23 = vpop.f32.mrf.mxu1 }
 0x82d   : > { %v2541_v8 = vmul.f32 0.7978846, %v2501_v26  ;;  %v2543_v41 = vmul.f32 0.7978846, %v2503_v27  ;;  %v2502_v42 = vadd.f32 %v2462_v14, %v5017_v2  ;;  %v2504_v21 = vadd.f32 %v2464_v25, %v5020_v7 }
 0x82e   : > { %v2465_v43 = vmul.f32 0.044715, %v2425_v32  ;;  %v2467_v44 = vmul.f32 0.044715, %v2427_v5  ;;  %v2426_v47 = vmul.f32 %v2386_v34, %v5041_v19  ;;  %v2428_v31 = vmul.f32 %v2388_v33, %v5044_v24  ;;  %v2263_v60 = vpop.f32.mrf.mxu0  ;;  %v2346_v0 = vpop.f32.mrf.mxu1 }
 0x82f   : > { %4039 = vtanh.f32 %v2541_v8  ;;  %v2542_v15 = vmul.f32 0.7978846, %v2502_v42  ;;  %v2544_v49 = vmul.f32 0.7978846, %v2504_v21  ;;  %v5059_v59 = vadd.f32 %v2259_v1, %v4998_v46 }
 0x830   : > { %4041 = vtanh.f32 %v2543_v41  ;;  %v2505_v37 = vadd.f32 %v2465_v43, %v5029_v55  ;;  %v2507_v35 = vadd.f32 %v2467_v44, %v5032_v10  ;;  %v2466_v63 = vmul.f32 0.044715, %v2426_v47  ;;  %v2265_v30 = vpop.f32.mrf.mxu0  ;;  %v2348_v1 = vpop.f32.mrf.mxu1 }
 0x831   : > { %4043 = vtanh.f32 %v2542_v15  ;;  %v2468_v22 = vmul.f32 0.044715, %v2428_v31  ;;  %v2389_v38 = vmul.f32 %v5059_v59, %v5059_v59  ;;  %v5066_v56 = vadd.f32 %v2342_v20, %v5000_v50 }
 0x832   : > { %4045 = vtanh.f32 %v2544_v49  ;;  %v2545_v4 = vmul.f32 0.7978846, %v2505_v37  ;;  %v2547_v28 = vmul.f32 0.7978846, %v2507_v35  ;;  %v2506_v9 = vadd.f32 %v2466_v63, %v5041_v19 }
 0x833   : > { %v2508_v11 = vadd.f32 %v2468_v22, %v5044_v24  ;;  %v2429_v58 = vmul.f32 %v2389_v38, %v5059_v59  ;;  %v2391_v12 = vmul.f32 %v5066_v56, %v5066_v56  ;;  %v5074_v16 = vadd.f32 %v2261_v13, %v5002_v53  ;;  %v2269_v13 = vpop.f32.mrf.mxu0  ;;  %v2352_v21 = vpop.f32.mrf.mxu1 }
 0x834   : > { %4047 = vtanh.f32 %v2545_v4  ;;  %v2546_v17 = vmul.f32 0.7978846, %v2506_v9  ;;  %v5077_v18 = vadd.f32 %v2344_v23, %v5004_v57  ;;  %v5080_v62 = vadd.f32 %v2263_v60, %v4998_v46 }
 0x835   : > { %4049 = vtanh.f32 %v2547_v28  ;;  %v2548_v20 = vmul.f32 0.7978846, %v2508_v11  ;;  %v2469_v26 = vmul.f32 0.044715, %v2429_v58  ;;  %v2431_v27 = vmul.f32 %v2391_v12, %v5066_v56  ;;  %v2271_v22 = vpop.f32.mrf.mxu0  ;;  %v2354_v58 = vpop.f32.mrf.mxu1 }
 0x836   : > { %4051 = vtanh.f32 %v2546_v17  ;;  %v2390_v14 = vmul.f32 %v5074_v16, %v5074_v16  ;;  %v2392_v25 = vmul.f32 %v5077_v18, %v5077_v18  ;;  %v2393_v32 = vmul.f32 %v5080_v62, %v5080_v62 }
 0x837   : > { %4053 = vtanh.f32 %v2548_v20  ;;  %v2509_v5 = vadd.f32 %v2469_v26, %v5059_v59  ;;  %v2471_v34 = vmul.f32 0.044715, %v2431_v27  ;;  %v5091_v33 = vadd.f32 %v2346_v0, %v5000_v50 }
 0x838   : > { %v2430_v23 = vmul.f32 %v2390_v14, %v5074_v16  ;;  %v2432_v8 = vmul.f32 %v2392_v25, %v5077_v18  ;;  %v2433_v41 = vmul.f32 %v2393_v32, %v5080_v62  ;;  %v5097_v42 = vadd.f32 %v2265_v30, %v5002_v53 }
 0x839   : > { %v2549_v43 = vmul.f32 0.7978846, %v2509_v5  ;;  %v2511_v44 = vadd.f32 %v2471_v34, %v5066_v56  ;;  %v2395_v47 = vmul.f32 %v5091_v33, %v5091_v33  ;;  %v5103_v31 = vadd.f32 %v2348_v1, %v5004_v57 }
 0x83a   : > { %v2470_v15 = vmul.f32 0.044715, %v2430_v23  ;;  %v2472_v49 = vmul.f32 0.044715, %v2432_v8  ;;  %v2473_v60 = vmul.f32 0.044715, %v2433_v41  ;;  %v2394_v37 = vmul.f32 %v5097_v42, %v5097_v42  ;;  %v2273_v41 = vpop.f32.mrf.mxu0 }
 0x83b   : > { %4055 = vtanh.f32 %v2549_v43  ;;  %v2551_v35 = vmul.f32 0.7978846, %v2511_v44  ;;  %v2435_v63 = vmul.f32 %v2395_v47, %v5091_v33  ;;  %v2396_v0 = vmul.f32 %v5103_v31, %v5103_v31 }
 0x83c   : > { %v4040_v38 = vpop.eup %4039  ;;  %v2510_v4 = vadd.f32 %v2470_v15, %v5074_v16  ;;  %v2512_v28 = vadd.f32 %v2472_v49, %v5077_v18  ;;  %v2513_v9 = vadd.f32 %v2473_v60, %v5080_v62  ;;  %v2434_v11 = vmul.f32 %v2394_v37, %v5097_v42  ;;  %v2356_v15 = vpop.f32.mrf.mxu1 }
 0x83d   : > { %v4042_v12 = vpop.eup %4041  ;;  %v2621_v30 = vadd.f32 1.0, %v4040_v38  ;;  %4057 = vtanh.f32 %v2551_v35  ;;  %v2475_v17 = vmul.f32 0.044715, %v2435_v63  ;;  %v2436_v1 = vmul.f32 %v2396_v0, %v5103_v31 }
 0x83e   : > { %v5115_v20 = vpop.eup %4043  ;;  %v2623_v26 = vadd.f32 1.0, %v4042_v12  ;;  %v2550_v27 = vmul.f32 0.7978846, %v2510_v4  ;;  %v2552_v14 = vmul.f32 0.7978846, %v2512_v28  ;;  %v5118_v25 = vadd.f32 %v2269_v13, %v4998_v46 }
 0x83f   : > { %v5120_v32 = vpop.eup %4045  ;;  %v2661_v5 = vmul.f32 0.5, %v2621_v30  ;;  %v2553_v34 = vmul.f32 0.7978846, %v2513_v9  ;;  %v2515_v23 = vadd.f32 %v2475_v17, %v5091_v33  ;;  %v2474_v8 = vmul.f32 0.044715, %v2434_v11  ;;  %v2275_v11 = vpop.f32.mrf.mxu0 }
 0x840   : > { %5554 = vst [vmem:[#allocation14_spill] sm:$0xff] %v5118_v25  ;;  %v2663_v43 = vmul.f32 0.5, %v2623_v26  ;;  %4059 = vtanh.f32 %v2550_v27  ;;  %v2476_v44 = vmul.f32 0.044715, %v2436_v1  ;;  %v2397_v47 = vmul.f32 %v5118_v25, %v5118_v25  ;;  %v2358_v26 = vpop.f32.mrf.mxu1 }
 0x841   : > { %v4048_v49 = vpop.eup %4047  ;;  %v5126_v60 = vmul.f32 %v2661_v5, %v5007_v61  ;;  %4061 = vtanh.f32 %v2552_v14  ;;  %v2555_v13 = vmul.f32 0.7978846, %v2515_v23  ;;  %v2514_v37 = vadd.f32 %v2474_v8, %v5097_v42 }
 0x842   : > { %v4050_v35 = vpop.eup %4049  ;;  %v5130_v63 = vmul.f32 %v2663_v43, %v5010_v36  ;;  %v2625_v0 = vadd.f32 1.0, %v4048_v49  ;;  %4063 = vtanh.f32 %v2553_v34  ;;  %v2516_v38 = vadd.f32 %v2476_v44, %v5103_v31 }
 0x843   : > { %v5133_v4 = vpop.eup %4051  ;;  %v2627_v28 = vadd.f32 1.0, %v4050_v35  ;;  %4065 = vtanh.f32 %v2555_v13  ;;  %v2554_v9 = vmul.f32 0.7978846, %v2514_v37  ;;  %v2437_v61 = vmul.f32 %v2397_v47, %v5118_v25  ;;  %v2362_v37 = vpop.f32.mrf.mxu1 }
 0x844   : > { %v5136_v12 = vpop.eup %4053  ;;  %v2665_v30 = vmul.f32 0.5, %v2625_v0  ;;  %v2556_v17 = vmul.f32 0.7978846, %v2516_v38  ;;  %v5139_v1 = vadd.f32 %v2352_v21, %v5000_v50  ;;  %v5142_v36 = vadd.f32 %v2271_v22, %v5002_v53 }
 0x845   : > { %v2667_v27 = vmul.f32 0.5, %v2627_v28  ;;  %4067 = vtanh.f32 %v2554_v9  ;;  %v2477_v14 = vmul.f32 0.044715, %v2437_v61  ;;  %v5145_v5 = vadd.f32 %v2354_v58, %v5004_v57 }
 0x846   : > { %5555 = vst [vmem:[#allocation15_spill] sm:$0xff] %v5139_v1  ;;  %v5148_v34 = vmul.f32 %v2665_v30, %v5029_v55  ;;  %4069 = vtanh.f32 %v2556_v17  ;;  %v2399_v23 = vmul.f32 %v5139_v1, %v5139_v1  ;;  %v2398_v21 = vmul.f32 %v5142_v36, %v5142_v36  ;;  %v2279_v55 = vpop.f32.mrf.mxu0 }
 0x847   : > { %v5155_v22 = vmul.f32 %v2667_v27, %v5032_v10  ;;  %v2517_v8 = vadd.f32 %v2477_v14, %v5118_v25  ;;  %v2400_v43 = vmul.f32 %v5145_v5, %v5145_v5  ;;  %v5161_v58 = vadd.f32 %v2273_v41, %v4998_v46 }
 0x848   : > { %v5163_v44 = vpop.eup %4055  ;;  %v2439_v49 = vmul.f32 %v2399_v23, %v5139_v1  ;;  %v2438_v13 = vmul.f32 %v2398_v21, %v5142_v36  ;;  %v5170_v10 = vadd.f32 %v2356_v15, %v5000_v50  ;;  %v5182_v15 = vadd.f32 %v2275_v11, %v5002_v53  ;;  %v2281_v23 = vpop.f32.mrf.mxu0 }
 0x849   : > { %5556 = vst [vmem:[#allocation16_spill] sm:$0xff] %v5161_v58  ;;  %v2557_v0 = vmul.f32 0.7978846, %v2517_v8  ;;  %v2440_v41 = vmul.f32 %v2400_v43, %v5145_v5  ;;  %v2401_v38 = vmul.f32 %v5161_v58, %v5161_v58  ;;  %v5186_v14 = vadd.f32 %v2358_v26, %v5004_v57 }
 0x84a   : > { %5557 = vst [vmem:[#allocation17_spill] sm:$0xff] %v5170_v10  ;;  %v5177_v28 = vpop.eup %4057  ;;  %v2479_v9 = vmul.f32 0.044715, %v2439_v49  ;;  %v2478_v61 = vmul.f32 0.044715, %v2438_v13  ;;  %v2403_v30 = vmul.f32 %v5170_v10, %v5170_v10  ;;  %v2402_v49 = vmul.f32 %v5182_v15, %v5182_v15  ;;  %v2364_v13 = vpop.f32.mrf.mxu1 }
 0x84b   : > { %4071 = vtanh.f32 %v2557_v0  ;;  %v2480_v17 = vmul.f32 0.044715, %v2440_v41  ;;  %v2441_v27 = vmul.f32 %v2401_v38, %v5161_v58  ;;  %v2404_v26 = vmul.f32 %v5186_v14, %v5186_v14  ;;  %v2283_v45 = vpop.f32.mrf.mxu0 }
 0x84c   : > { %v2519_v21 = vadd.f32 %v2479_v9, %v5139_v1  ;;  %v2518_v8 = vadd.f32 %v2478_v61, %v5142_v36  ;;  %v2443_v43 = vmul.f32 %v2403_v30, %v5170_v10  ;;  %v5199_v38 = vadd.f32 %v2279_v55, %v4998_v46 }
 0x84d   : > { %v5193_v11 = vpop.eup %4059  ;;  %v2520_v0 = vadd.f32 %v2480_v17, %v5145_v5  ;;  %v2481_v41 = vmul.f32 0.044715, %v2441_v27  ;;  %v2442_v47 = vmul.f32 %v2402_v49, %v5182_v15  ;;  %v2444_v17 = vmul.f32 %v2404_v26, %v5186_v14  ;;  %v2366_v49 = vpop.f32.mrf.mxu1 }
 0x84e   : > { %5558 = vst [vmem:[#allocation18_spill] sm:$0xff] %v5199_v38  ;;  %v5201_v9 = vpop.eup %4061  ;;  %v2559_v61 = vmul.f32 0.7978846, %v2519_v21  ;;  %v2558_v35 = vmul.f32 0.7978846, %v2518_v8  ;;  %v2405_v27 = vmul.f32 %v5199_v38, %v5199_v38 }
 0x84f   : > { %v2483_v30 = vmul.f32 0.044715, %v2443_v43  ;;  %v5204_v6 = vpop.eup %4063  ;;  %v2560_v51 = vmul.f32 0.7978846, %v2520_v0  ;;  %v2521_v3 = vadd.f32 %v2481_v41, %v5161_v58  ;;  %v2482_v8 = vmul.f32 0.044715, %v2442_v47 }
 0x850   : > { %v5210_v55 = vpop.eup %4065  ;;  %4073 = vtanh.f32 %v2559_v61  ;;  %v5214_v43 = vadd.f32 %v2362_v37, %v5000_v50  ;;  %v2484_v29 = vmul.f32 0.044715, %v2444_v17  ;;  %v2445_v41 = vmul.f32 %v2405_v27, %v5199_v38 }
 0x851   : > { %v2523_v21 = vadd.f32 %v2483_v30, %v5170_v10  ;;  %4075 = vtanh.f32 %v2558_v35  ;;  %v2561_v0 = vmul.f32 0.7978846, %v2521_v3  ;;  %v2522_v52 = vadd.f32 %v2482_v8, %v5182_v15  ;;  %v2285_v35 = vpop.f32.mrf.mxu0 }
 0x852   : > { %5559 = vst [vmem:[#allocation19_spill] sm:$0xff] %v5214_v43  ;;  %v5217_v26 = vpop.eup %4067  ;;  %4077 = vtanh.f32 %v2560_v51  ;;  %v2407_v61 = vmul.f32 %v5214_v43, %v5214_v43  ;;  %v2524_v47 = vadd.f32 %v2484_v29, %v5186_v14  ;;  %v2485_v37 = vmul.f32 0.044715, %v2445_v41 }
 0x853   : > { %v2563_v54 = vmul.f32 0.7978846, %v2523_v21  ;;  %v5222_v30 = vpop.eup %4069  ;;  %4079 = vtanh.f32 %v2561_v0  ;;  %v5226_v3 = vadd.f32 %v2281_v23, %v5002_v53  ;;  %v2562_v17 = vmul.f32 0.7978846, %v2522_v52  ;;  %v2368_v21 = vpop.f32.mrf.mxu1 }
 0x854   : > { %v2447_v51 = vmul.f32 %v2407_v61, %v5214_v43  ;;  %v5230_v27 = vadd.f32 %v2364_v13, %v5004_v57  ;;  %v2564_v8 = vmul.f32 0.7978846, %v2524_v47  ;;  %v2525_v40 = vadd.f32 %v2485_v37, %v5199_v38  ;;  %v2289_v47 = vpop.f32.mrf.mxu0 }
 0x855   : > { %5560 = vst [vmem:[#allocation20_spill] sm:$0xff] %v5226_v3  ;;  %4081 = vtanh.f32 %v2563_v54  ;;  %v2406_v0 = vmul.f32 %v5226_v3, %v5226_v3  ;;  %v5236_v29 = vadd.f32 %v2283_v45, %v4998_v46  ;;  %v5241_v54 = vadd.f32 %v2366_v49, %v5000_v50 }
 0x856   : > { %5561 = vst [vmem:[#allocation21_spill] sm:$0xff] %v5230_v27  ;;  %4083 = vtanh.f32 %v2562_v17  ;;  %v2487_v23 = vmul.f32 0.044715, %v2447_v51  ;;  %v2408_v52 = vmul.f32 %v5230_v27, %v5230_v27  ;;  %v2565_v13 = vmul.f32 0.7978846, %v2525_v40 }
 0x857   : > { %5562 = vst [vmem:[#allocation22_spill] sm:$0xff] %v5236_v29  ;;  %5563 = vst [vmem:[#allocation23_spill] sm:$0xff] %v5241_v54  ;;  %4085 = vtanh.f32 %v2564_v8  ;;  %v2446_v41 = vmul.f32 %v2406_v0, %v5226_v3  ;;  %v2409_v61 = vmul.f32 %v5236_v29, %v5236_v29  ;;  %v2411_v51 = vmul.f32 %v5241_v54, %v5241_v54  ;;  %v2372_v8 = vpop.f32.mrf.mxu1 }
 0x858   : > { %v5246_v37 = vpop.eup %4071  ;;  %v2527_v45 = vadd.f32 %v2487_v23, %v5214_v43  ;;  %v2448_v17 = vmul.f32 %v2408_v52, %v5230_v27  ;;  %v5253_v49 = vadd.f32 %v2285_v35, %v5002_v53  ;;  %4087 = vtanh.f32 %v2565_v13 }
 0x859   : > { %v2486_v40 = vmul.f32 0.044715, %v2446_v41  ;;  %v2449_v0 = vmul.f32 %v2409_v61, %v5236_v29  ;;  %v5257_v48 = vadd.f32 %v2368_v21, %v5004_v57  ;;  %v2451_v23 = vmul.f32 %v2411_v51, %v5241_v54  ;;  %v2291_v41 = vpop.f32.mrf.mxu0 }
 0x85a   : > { %5564 = vst [vmem:[#allocation24_spill] sm:$0xff] %v5253_v49  ;;  %v2567_v39 = vmul.f32 0.7978846, %v2527_v45  ;;  %v2488_v38 = vmul.f32 0.044715, %v2448_v17  ;;  %v2410_v52 = vmul.f32 %v5253_v49, %v5253_v49  ;;  %v5266_v13 = vadd.f32 %v2289_v47, %v4998_v46  ;;  %v2374_v17 = vpop.f32.mrf.mxu1 }
 0x85b   : > { %5565 = vst [vmem:[#allocation25_spill] sm:$0xff] %v5257_v48  ;;  %v2526_v43 = vadd.f32 %v2486_v40, %v5226_v3  ;;  %v2489_v1 = vmul.f32 0.044715, %v2449_v0  ;;  %v2412_v35 = vmul.f32 %v5257_v48, %v5257_v48  ;;  %v2491_v61 = vmul.f32 0.044715, %v2451_v23 }
 0x85c   : > { %5566 = vst [vmem:[#allocation26_spill] sm:$0xff] %v5266_v13  ;;  %4089 = vtanh.f32 %v2567_v39  ;;  %v2528_v21 = vadd.f32 %v2488_v38, %v5230_v27  ;;  %v2450_v45 = vmul.f32 %v2410_v52, %v5253_v49  ;;  %v2413_v3 = vmul.f32 %v5266_v13, %v5266_v13 }
 0x85d   : > { %v5270_v51 = vpop.eup %4073  ;;  %v2566_v10 = vmul.f32 0.7978846, %v2526_v43  ;;  %v2529_v40 = vadd.f32 %v2489_v1, %v5236_v29  ;;  %v2452_v0 = vmul.f32 %v2412_v35, %v5257_v48  ;;  %v2531_v39 = vadd.f32 %v2491_v61, %v5241_v54  ;;  %v2293_v35 = vpop.f32.mrf.mxu0 }
 0x85e   : > { %v5276_v47 = vpop.eup %4075  ;;  %v2568_v58 = vmul.f32 0.7978846, %v2528_v21  ;;  %v2490_v38 = vmul.f32 0.044715, %v2450_v45  ;;  %v5280_v23 = vadd.f32 %v2372_v8, %v5000_v50  ;;  %v2453_v1 = vmul.f32 %v2413_v3, %v5266_v13  ;;  %v2376_v45 = vpop.f32.mrf.mxu1 }
 0x85f   : > { %v5282_v52 = vpop.eup %4077  ;;  %4091 = vtanh.f32 %v2566_v10  ;;  %v2569_v43 = vmul.f32 0.7978846, %v2529_v40  ;;  %v2492_v27 = vmul.f32 0.044715, %v2452_v0  ;;  %v2571_v25 = vmul.f32 0.7978846, %v2531_v39 }
 0x860   : > { %5567 = vst [vmem:[#allocation27_spill] sm:$0xff] %v5280_v23  ;;  %v5285_v29 = vpop.eup %4079  ;;  %4093 = vtanh.f32 %v2568_v58  ;;  %v2530_v21 = vadd.f32 %v2490_v38, %v5253_v49  ;;  %v2415_v61 = vmul.f32 %v5280_v23, %v5280_v23  ;;  %v2493_v40 = vmul.f32 0.044715, %v2453_v1 }
 0x861   : > { %4095 = vtanh.f32 %v2569_v43  ;;  %v2532_v10 = vadd.f32 %v2492_v27, %v5257_v48  ;;  %v5294_v0 = vadd.f32 %v2291_v41, %v5002_v53  ;;  %v5298_v39 = vadd.f32 %v2374_v17, %v5004_v57  ;;  %v2295_v41 = vpop.f32.mrf.mxu0 }
 0x862   : > { %v5290_v8 = vpop.eup %4081  ;;  %4097 = vtanh.f32 %v2571_v25  ;;  %v2570_v3 = vmul.f32 0.7978846, %v2530_v21  ;;  %v2455_v58 = vmul.f32 %v2415_v61, %v5280_v23  ;;  %v2533_v49 = vadd.f32 %v2493_v40, %v5266_v13  ;;  %v2378_v61 = vpop.f32.mrf.mxu1 }
 0x863   : > { %5568 = vst [vmem:[#allocation28_spill] sm:$0xff] %v5294_v0  ;;  %v5300_v38 = vpop.eup %4083  ;;  %v2572_v54 = vmul.f32 0.7978846, %v2532_v10  ;;  %v2414_v43 = vmul.f32 %v5294_v0, %v5294_v0  ;;  %v5306_v27 = vadd.f32 %v2293_v35, %v4998_v46  ;;  %v2416_v17 = vmul.f32 %v5298_v39, %v5298_v39 }
 0x864   : > { %v5308_v1 = vpop.eup %4085  ;;  %4099 = vtanh.f32 %v2570_v3  ;;  %v2495_v25 = vmul.f32 0.044715, %v2455_v58  ;;  %v5313_v21 = vadd.f32 %v2376_v45, %v5000_v50  ;;  %v2573_v10 = vmul.f32 0.7978846, %v2533_v49 }
 0x865   : > { %5569 = vst [vmem:[#allocation29_spill] sm:$0xff] %v5306_v27  ;;  %4101 = vtanh.f32 %v2572_v54  ;;  %v2454_v40 = vmul.f32 %v2414_v43, %v5294_v0  ;;  %v2417_v46 = vmul.f32 %v5306_v27, %v5306_v27  ;;  %v5318_v35 = vpop.eup %4087  ;;  %v2456_v3 = vmul.f32 %v2416_v17, %v5298_v39 }
 0x866   : > { %5570 = vst [vmem:[#allocation30_spill] sm:$0xff] %v5318_v35  ;;  %v2535_v13 = vadd.f32 %v2495_v25, %v5280_v23  ;;  %v2419_v58 = vmul.f32 %v5313_v21, %v5313_v21  ;;  %v5325_v50 = vadd.f32 %v2295_v41, %v5002_v53  ;;  %4103 = vtanh.f32 %v2573_v10 }
 0x867   : > { %v2494_v54 = vmul.f32 0.044715, %v2454_v40  ;;  %v2457_v49 = vmul.f32 %v2417_v46, %v5306_v27  ;;  %v5329_v45 = vadd.f32 %v2378_v61, %v5004_v57  ;;  %v2496_v48 = vmul.f32 0.044715, %v2456_v3 }
 0x868   : > { %v2575_v43 = vmul.f32 0.7978846, %v2535_v13  ;;  %v2459_v35 = vmul.f32 %v2419_v58, %v5313_v21  ;;  %v2418_v25 = vmul.f32 %v5325_v50, %v5325_v50  ;;  %v2622_v10 = vadd.f32 1.0, %v5115_v20 }
 0x869   : > { %v5334_v17 = vpop.eup %4089  ;;  %v2534_v23 = vadd.f32 %v2494_v54, %v5294_v0  ;;  %v2497_v53 = vmul.f32 0.044715, %v2457_v49  ;;  %v2420_v41 = vmul.f32 %v5329_v45, %v5329_v45  ;;  %v2536_v57 = vadd.f32 %v2496_v48, %v5298_v39 }
 0x86a   : > { %5571 = vst [vmem:[#allocation31_spill] sm:$0xff] %v5334_v17  ;;  %4105 = vtanh.f32 %v2575_v43  ;;  %v2499_v13 = vmul.f32 0.044715, %v2459_v35  ;;  %v2458_v61 = vmul.f32 %v2418_v25, %v5325_v50  ;;  %v2626_v58 = vadd.f32 1.0, %v5133_v4 }
 0x86b   : > { %v2574_v40 = vmul.f32 0.7978846, %v2534_v23  ;;  %v2537_v46 = vadd.f32 %v2497_v53, %v5306_v27  ;;  %v2460_v3 = vmul.f32 %v2420_v41, %v5329_v45  ;;  %v2576_v49 = vmul.f32 0.7978846, %v2536_v57 }
 0x86c   : > { %v5345_v54 = vpop.eup %4091  ;;  %v2539_v0 = vadd.f32 %v2499_v13, %v5313_v21  ;;  %v2498_v17 = vmul.f32 0.044715, %v2458_v61  ;;  %v2662_v20 = vmul.f32 0.5, %v2622_v10  ;;  %v2666_v25 = vmul.f32 0.5, %v2626_v58 }
 0x86d   : > { %v5348_v43 = vpop.eup %4093  ;;  %4107 = vtanh.f32 %v2574_v40  ;;  %v2577_v48 = vmul.f32 0.7978846, %v2537_v46  ;;  %v2500_v35 = vmul.f32 0.044715, %v2460_v3  ;;  %v2624_v13 = vadd.f32 1.0, %v5120_v32 }
 0x86e   : > { %v5350_v23 = vpop.eup %4095  ;;  %4109 = vtanh.f32 %v2576_v49  ;;  %v2579_v53 = vmul.f32 0.7978846, %v2539_v0  ;;  %v2538_v41 = vadd.f32 %v2498_v17, %v5325_v50  ;;  %v2702_v4 = vmul.f32 %v2662_v20, %v5017_v2 }
 0x86f   : > { %v5354_v27 = vpop.eup %4097  ;;  %4111 = vtanh.f32 %v2577_v48  ;;  %v2540_v57 = vadd.f32 %v2500_v35, %v5329_v45  ;;  %v2706_v10 = vmul.f32 %v2666_v25, %v5041_v19  ;;  %v2628_v40 = vadd.f32 1.0, %v5136_v12 }
 0x870   : > { %4113 = vtanh.f32 %v2579_v53  ;;  %v2578_v61 = vmul.f32 0.7978846, %v2538_v41  ;;  %v2630_v46 = vadd.f32 1.0, %v5193_v11  ;;  %v2664_v2 = vmul.f32 0.5, %v2624_v13 }
 0x871   : > { %v5361_v0 = vpop.eup %4099  ;;  %v2580_v17 = vmul.f32 0.7978846, %v2540_v57  ;;  %v2742_v3 = vpack.c.bf16 %v2706_v10, %v2702_v4  ;;  %v2634_v58 = vadd.f32 1.0, %v5217_v26  ;;  %v2668_v20 = vmul.f32 0.5, %v2628_v40 }
 0x872   : > { %v5364_v49 = vpop.eup %4101  ;;  %4115 = vtanh.f32 %v2578_v61  ;;  %v2670_v19 = vmul.f32 0.5, %v2630_v46  ;;  %v2632_v32 = vadd.f32 1.0, %v5201_v9  ;;  %v2704_v12 = vmul.f32 %v2664_v2, %v5020_v7 }
 0x873   : > { %4117 = vtanh.f32 %v2580_v17  ;;  %3056 = vmatprep.mubr.bf16.mxu0 %v2742_v3  ;;  %v2674_v48 = vmul.f32 0.5, %v2634_v58  ;;  %v2636_v11 = vadd.f32 1.0, %v5222_v30  ;;  %v5369_v35 = vpop.eup %4103  ;;  %v2708_v25 = vmul.f32 %v2668_v20, %v5044_v24 }
 0x874   : > { %v5572_v26 = vpack.c.bf16 %v5148_v34, %v5126_v60  ;;  %v2710_v53 = vmul.f32 %v2670_v19, %v5074_v16  ;;  %v2672_v41 = vmul.f32 0.5, %v2632_v32  ;;  %v2629_v9 = vadd.f32 1.0, %v5163_v44 }
 0x875   : > { %v2714_v4 = vmul.f32 %v2674_v48, %v5097_v42  ;;  %v2676_v57 = vmul.f32 0.5, %v2636_v11  ;;  %v2633_v7 = vadd.f32 1.0, %v5204_v6  ;;  %v2631_v30 = vadd.f32 1.0, %v5177_v28 }
 0x876   : > { %3057 = vmatmul.mubr.bf16.vlgmr.msra.gmra.mxu0 %v5572_v26  ;;  %v2744_v10 = vpack.c.bf16 %v2708_v25, %v2704_v12  ;;  %v2712_v13 = vmul.f32 %v2672_v41, %v5077_v18  ;;  %v2669_v24 = vmul.f32 0.5, %v2629_v9  ;;  %v2635_v61 = vadd.f32 1.0, %v5210_v55  ;;  %v5574_v9 = vld [vmem:[#allocation14_spill] sm:$0xff] }
 0x877   : > { %v5382_v60 = vpop.eup %4105  ;;  %v2746_v34 = vpack.c.bf16 %v2714_v4, %v2710_v53  ;;  %v2716_v16 = vmul.f32 %v2676_v57, %v5103_v31  ;;  %v2673_v40 = vmul.f32 0.5, %v2633_v7  ;;  %v2671_v44 = vmul.f32 0.5, %v2631_v30  ;;  %v5575_v4 = vld [vmem:[#allocation16_spill] sm:$0xff] }
 0x878   : > { %3129 = vmatprep.mubr.bf16.mxu1 %v2744_v10  ;;  %v2709_v42 = vmul.f32 %v2669_v24, %v5059_v59  ;;  %v2675_v46 = vmul.f32 0.5, %v2635_v61  ;;  %v2638_v6 = vadd.f32 1.0, %v5276_v47  ;;  %v2642_v28 = vadd.f32 1.0, %v5300_v38  ;;  %v5576_v61 = vld [vmem:[#allocation17_spill] sm:$0xff] }
 0x879   : > { %v5573_v18 = vpack.c.bf16 %v5155_v22, %v5130_v63  ;;  %3064 = vmatprep.mubr.bf16.mxu0 %v2746_v34  ;;  %v2748_v55 = vpack.c.bf16 %v2716_v16, %v2712_v13  ;;  %v2713_v17 = vmul.f32 %v2673_v40, %v5080_v62  ;;  %v2711_v31 = vmul.f32 %v2671_v44, %v5066_v56  ;;  %v5577_v40 = vld [vmem:[#allocation30_spill] sm:$0xff] }
 0x87a   : > { %v2640_v3 = vadd.f32 1.0, %v5282_v52  ;;  %v4108_v2 = vpop.eup %4107  ;;  %v2715_v59 = vmul.f32 %v2675_v46, %v5091_v33  ;;  %v2678_v58 = vmul.f32 0.5, %v2638_v6  ;;  %v2682_v20 = vmul.f32 0.5, %v2642_v28  ;;  %v5579_v46 = vld [vmem:[#allocation24_spill] sm:$0xff] }
 0x87b   : > { %3130 = vmatmul.mubr.bf16.vlgmr.msra.gmra.mxu1 %v5573_v18  ;;  %v2644_v47 = vadd.f32 1.0, %v5308_v1  ;;  %v4110_v38 = vpop.eup %4109  ;;  %v2745_v19 = vpack.c.bf16 %v2713_v17, %v2709_v42  ;;  %v2637_v22 = vadd.f32 1.0, %v5246_v37  ;;  %v2641_v32 = vadd.f32 1.0, %v5285_v29  ;;  %v5578_v42 = vld [vmem:[#allocation20_spill] sm:$0xff]  ;;  %v5581_v17 = vld [vmem:[#allocation21_spill] sm:$0xff] }
 0x87c   : > { %3137 = vmatprep.mubr.bf16.mxu1 %v2748_v55  ;;  %v2680_v63 = vmul.f32 0.5, %v2640_v3  ;;  %v4112_v62 = vpop.eup %4111  ;;  %v2747_v12 = vpack.c.bf16 %v2715_v59, %v2711_v31  ;;  %v2718_v56 = vmul.f32 %v2678_v58, %v5142_v36  ;;  %v2722_v52 = vmul.f32 %v2682_v20, %v5182_v15  ;;  %v5580_v55 = vld [vmem:[#allocation15_spill] sm:$0xff]  ;;  %v5583_v20 = vld [vmem:[#allocation25_spill] sm:$0xff] }
 0x87d   : > { %v2684_v48 = vmul.f32 0.5, %v2644_v47  ;;  %v5400_v33 = vpop.eup %4113  ;;  %v2677_v11 = vmul.f32 0.5, %v2637_v22  ;;  %v2681_v25 = vmul.f32 0.5, %v2641_v32  ;;  %v2639_v26 = vadd.f32 1.0, %v5270_v51  ;;  %v5582_v3 = vld [vmem:[#allocation31_spill] sm:$0xff] }
 0x87e   : > { %3065 = vmatmul.mubr.bf16.gmra.mxu0 %v2745_v19  ;;  %v2720_v1 = vmul.f32 %v2680_v63, %v5145_v5  ;;  %v2750_v53 = vpack.c.bf16 %v2722_v52, %v2718_v56  ;;  %v2643_v29 = vadd.f32 1.0, %v5290_v8  ;;  %v2646_v41 = vadd.f32 1.0, %v5345_v54 }
 0x87f   : > { %v2724_v37 = vmul.f32 %v2684_v48, %v5186_v14  ;;  %v4116_v36 = vpop.eup %4115  ;;  %v2717_v15 = vmul.f32 %v2677_v11, %v5574_v9  ;;  %v2721_v57 = vmul.f32 %v2681_v25, %v5575_v4  ;;  %v2679_v7 = vmul.f32 0.5, %v2639_v26 }
 0x880   : > { %v2650_v30 = vadd.f32 1.0, %v5361_v0  ;;  %v4118_v5 = vpop.eup %4117  ;;  %3072 = vmatprep.mubr.bf16.mxu0 %v2750_v53  ;;  %v2683_v13 = vmul.f32 0.5, %v2643_v29  ;;  %v2686_v51 = vmul.f32 0.5, %v2646_v41  ;;  %v2648_v24 = vadd.f32 1.0, %v5348_v43 }
 0x881   : > { %v2752_v10 = vpack.c.bf16 %v2724_v37, %v2720_v1  ;;  %v2652_v8 = vadd.f32 1.0, %v5364_v49  ;;  %v2749_v54 = vpack.c.bf16 %v2721_v57, %v2717_v15  ;;  %v2645_v44 = vadd.f32 1.0, %v5577_v40 }
 0x882   : > { %v2690_v14 = vmul.f32 0.5, %v2650_v30  ;;  %v2723_v34 = vmul.f32 %v2683_v13, %v5576_v61  ;;  %v2688_v16 = vmul.f32 0.5, %v2648_v24  ;;  %v2726_v0 = vmul.f32 %v2686_v51, %v5578_v42 }
 0x883   : > { %3138 = vmatmul.mubr.bf16.gmra.mxu1 %v2747_v12  ;;  %v2692_v28 = vmul.f32 0.5, %v2652_v8  ;;  %v2649_v18 = vadd.f32 1.0, %v5350_v23  ;;  %v2719_v43 = vmul.f32 %v2679_v7, %v5580_v55  ;;  %v2647_v49 = vadd.f32 1.0, %v5582_v3  ;;  %v5584_v23 = vld [vmem:[#allocation22_spill] sm:$0xff]  ;;  %v5587_v7 = vld [vmem:[#allocation23_spill] sm:$0xff] }
 0x884   : > { %3145 = vmatprep.mubr.bf16.mxu1 %v2752_v10  ;;  %v2730_v6 = vmul.f32 %v2690_v14, %v5579_v46  ;;  %v2728_v31 = vmul.f32 %v2688_v16, %v5581_v17  ;;  %v2651_v59 = vadd.f32 1.0, %v5354_v27  ;;  %v2685_v19 = vmul.f32 0.5, %v2645_v44  ;;  %v5585_v27 = vld [vmem:[#allocation18_spill] sm:$0xff]  ;;  %v5591_v44 = vld [vmem:[#allocation27_spill] sm:$0xff] }
 0x885   : > { %v2732_v47 = vmul.f32 %v2692_v28, %v5583_v20  ;;  %v2689_v63 = vmul.f32 0.5, %v2649_v18  ;;  %v2751_v22 = vpack.c.bf16 %v2723_v34, %v2719_v43  ;;  %v2654_v32 = vadd.f32 1.0, %v4108_v2  ;;  %v5586_v2 = vld [vmem:[#allocation28_spill] sm:$0xff]  ;;  %v5590_v16 = vld [vmem:[#allocation26_spill] sm:$0xff] }
 0x886   : > { %3073 = vmatmul.mubr.bf16.gmra.mxu0 %v2749_v54  ;;  %v2754_v58 = vpack.c.bf16 %v2730_v6, %v2726_v0  ;;  %v2658_v12 = vadd.f32 1.0, %v4116_v36  ;;  %v2691_v48 = vmul.f32 0.5, %v2651_v59  ;;  %v2656_v1 = vadd.f32 1.0, %v4110_v38  ;;  %v5589_v54 = vld [vmem:[#allocation29_spill] sm:$0xff] }
 0x887   : > { %v2756_v56 = vpack.c.bf16 %v2732_v47, %v2728_v31  ;;  %v2729_v52 = vmul.f32 %v2689_v63, %v5584_v23  ;;  %v2687_v11 = vmul.f32 0.5, %v2647_v49  ;;  %v2694_v25 = vmul.f32 0.5, %v2654_v32  ;;  %v5440_v6 = vld [vmem:[%s5507_s17] ss:$0 sm:$0xff] }
 0x888   : > { %3080 = vmatprep.mubr.bf16.mxu0 %v2754_v58  ;;  %v2698_v26 = vmul.f32 0.5, %v2658_v12  ;;  %v2660_v53 = vadd.f32 1.0, %v4118_v5  ;;  %v2725_v37 = vmul.f32 %v2685_v19, %v5585_v27  ;;  %v2696_v29 = vmul.f32 0.5, %v2656_v1  ;;  %v5446_v49 = vld [vmem:[%s5508_s18] ss:$0 sm:$0xff] }
 0x889   : > { %v2653_v41 = vadd.f32 1.0, %v5369_v35  ;;  %v2657_v9 = vadd.f32 1.0, %v4112_v62  ;;  %v2734_v36 = vmul.f32 %v2694_v25, %v5586_v2  ;;  %v2731_v38 = vmul.f32 %v2691_v48, %v5587_v7  ;;  %v5588_v35 = vld [vmem:[#allocation19_spill] sm:$0xff] }
 0x88a   : > { %v2738_v15 = vmul.f32 %v2698_v26, %v5325_v50  ;;  %v2700_v4 = vmul.f32 0.5, %v2660_v53  ;;  %v2753_v57 = vpack.c.bf16 %v2729_v52, %v2725_v37  ;;  %v2736_v5 = vmul.f32 %v2696_v29, %v5298_v39  ;;  %v5592_v52 = vld [vmem:[#allocation4_spill] sm:$0xff] }
 0x88b   : > { %3146 = vmatmul.mubr.bf16.gmra.mxu1 %v2751_v22  ;;  %v2697_v30 = vmul.f32 0.5, %v2657_v9  ;;  %v2659_v51 = vadd.f32 1.0, %v5400_v33  ;;  %v2727_v62 = vmul.f32 %v2687_v11, %v5588_v35  ;;  %v2693_v24 = vmul.f32 0.5, %v2653_v41  ;;  %v5593_v9 = vld [vmem:[#allocation6_spill] sm:$0xff] }
 0x88c   : > { %3153 = vmatprep.mubr.bf16.mxu1 %v2756_v56  ;;  %v2758_v10 = vpack.c.bf16 %v2738_v15, %v2734_v36  ;;  %v2740_v13 = vmul.f32 %v2700_v4, %v5329_v45  ;;  %v2655_v14 = vadd.f32 1.0, %v5382_v60 }
 0x88d   : > { %v2755_v8 = vpack.c.bf16 %v2731_v38, %v2727_v62  ;;  %v2737_v61 = vmul.f32 %v2697_v30, %v5589_v54  ;;  %v2699_v34 = vmul.f32 0.5, %v2659_v51  ;;  %v2733_v40 = vmul.f32 %v2693_v24, %v5590_v16  ;;  %v5595_v16 = vld [vmem:[#allocation7_spill] sm:$0xff] }
 0x88e   : > { %3081 = vmatmul.mubr.bf16.gmra.mxu0 %v2753_v57  ;;  %v2760_v50 = vpack.c.bf16 %v2740_v13, %v2736_v5  ;;  %v2695_v39 = vmul.f32 0.5, %v2655_v14  ;;  %v5594_v13 = vld [vmem:[#allocation5_spill] sm:$0xff] }
 0x88f   : > { %3088 = vmatprep.mubr.bf16.mxu0 %v2758_v10  ;;  %v2757_v45 = vpack.c.bf16 %v2737_v61, %v2733_v40  ;;  %v2739_v33 = vmul.f32 %v2699_v34, %v5313_v21 }
 0x890   : > { %v2735_v42 = vmul.f32 %v2695_v39, %v5591_v44 }
 0x892   : > { %v2759_v0 = vpack.c.bf16 %v2739_v33, %v2735_v42 }
 0x893   : > { %3154 = vmatmul.mubr.bf16.gmra.mxu1 %v2755_v8 }
 0x894   : > { %3161 = vmatprep.mubr.bf16.mxu1 %v2760_v50 }
 0x896   : > { %3089 = vmatmul.mubr.bf16.gmra.mxu0 %v2757_v45 }
 0x89b   : > { %3162 = vmatmul.mubr.bf16.gmra.mxu1 %v2759_v0 }
 0x936   : > { %v3553_v60 = vpop.f32.mrf.mxu0 }
 0x938   : > { %v3554_v46 = vpop.f32.mrf.mxu0 }
 0x939   : > { %v3555_v28 = vadd.f32 %v3554_v46, %v3553_v60 }
 0x93a   : > { %v3556_v18 = vpop.f32.mrf.mxu0 }
 0x93b   : > { %v3599_v55 = vpop.f32.mrf.mxu1  ;;  %v3059_v43 = vadd.f32 %v3555_v28, %v5440_v6 }
 0x93c   : > { %v3557_v17 = vpop.f32.mrf.mxu0 }
 0x93d   : > { %v3600_v31 = vpop.f32.mrf.mxu1  ;;  %v3558_v21 = vadd.f32 %v3557_v17, %v3556_v18  ;;  %v5596_v18 = vld [vmem:[#allocation8_spill] sm:$0xff] }
 0x93e   : > { %v3601_v3 = vadd.f32 %v3600_v31, %v3599_v55  ;;  %v3559_v58 = vpop.f32.mrf.mxu0 }
 0x93f   : > { %v3602_v59 = vpop.f32.mrf.mxu1  ;;  %v3062_v47 = vadd.f32 %v3558_v21, %v5440_v6 }
 0x940   : > { %v3132_v20 = vadd.f32 %v3601_v3, %v3059_v43  ;;  %v3560_v63 = vpop.f32.mrf.mxu0 }
 0x941   : > { %v3603_v19 = vpop.f32.mrf.mxu1  ;;  %v3561_v12 = vadd.f32 %v3560_v63, %v3559_v58 }
 0x942   : > { %v3177_v22 = vmul.f32 %v5446_v49, %v3132_v20  ;;  %v3604_v32 = vadd.f32 %v3603_v19, %v3602_v59  ;;  %v3562_v23 = vpop.f32.mrf.mxu0  ;;  %v5597_v19 = vld [vmem:[#allocation9_spill] sm:$0xff] }
 0x943   : > { %v3605_v56 = vpop.f32.mrf.mxu1  ;;  %v3067_v11 = vadd.f32 %v3561_v12, %v5440_v6 }
 0x944   : > { %v3187_v48 = vadd.f32 %v3177_v22, %v5592_v52  ;;  %v3135_v1 = vadd.f32 %v3604_v32, %v3062_v47  ;;  %v3563_v26 = vpop.f32.mrf.mxu0 }
 0x945   : > { %v3606_v25 = vpop.f32.mrf.mxu1  ;;  %v3564_v37 = vadd.f32 %v3563_v26, %v3562_v23 }
 0x946   : > { %3197 = vst [vmem:[%s4255_s25] sm:$0xff] %v3187_v48  ;;  %v3178_v53 = vmul.f32 %v5446_v49, %v3135_v1  ;;  %v3607_v27 = vadd.f32 %v3606_v25, %v3605_v56  ;;  %v3565_v41 = vpop.f32.mrf.mxu0  ;;  %v5598_v25 = vld [vmem:[#allocation10_spill] sm:$0xff] }
 0x947   : > { %v3608_v29 = vpop.f32.mrf.mxu1  ;;  %v3070_v15 = vadd.f32 %v3564_v37, %v5440_v6 }
 0x948   : > { %v3188_v2 = vadd.f32 %v3178_v53, %v5593_v9  ;;  %v3140_v36 = vadd.f32 %v3607_v27, %v3067_v11  ;;  %v3566_v57 = vpop.f32.mrf.mxu0 }
 0x949   : > { %v3609_v4 = vpop.f32.mrf.mxu1  ;;  %v3567_v30 = vadd.f32 %v3566_v57, %v3565_v41 }
 0x94a   : > { %3198 = vst [vmem:[%s4255_s25 + $0x8] sm:$0xff] %v3188_v2  ;;  %v3179_v7 = vmul.f32 %v5446_v49, %v3140_v36  ;;  %v3610_v38 = vadd.f32 %v3609_v4, %v3608_v29  ;;  %v3568_v5 = vpop.f32.mrf.mxu0 }
 0x94b   : > { %v3611_v10 = vpop.f32.mrf.mxu1  ;;  %v3075_v62 = vadd.f32 %v3567_v30, %v5440_v6 }
 0x94c   : > { %v3189_v51 = vadd.f32 %v3179_v7, %v5594_v13  ;;  %v3143_v35 = vadd.f32 %v3610_v38, %v3070_v15  ;;  %v3569_v14 = vpop.f32.mrf.mxu0  ;;  %v5599_v15 = vld [vmem:[#allocation11_spill] sm:$0xff] }
 0x94d   : > { %v3612_v24 = vpop.f32.mrf.mxu1  ;;  %v3570_v54 = vadd.f32 %v3569_v14, %v3568_v5  ;;  %v5600_v5 = vld [vmem:[#allocation12_spill] sm:$0xff] }
 0x94e   : > { %3199 = vst [vmem:[%s4255_s25 + $0x10] sm:$0xff] %v3189_v51  ;;  %v3180_v50 = vmul.f32 %v5446_v49, %v3143_v35  ;;  %v3613_v8 = vadd.f32 %v3612_v24, %v3611_v10  ;;  %v3571_v34 = vpop.f32.mrf.mxu0 }
 0x94f   : > { %v3614_v61 = vpop.f32.mrf.mxu1  ;;  %v3078_v45 = vadd.f32 %v3570_v54, %v5440_v6 }
 0x950   : > { %v3190_v40 = vadd.f32 %v3180_v50, %v5595_v16  ;;  %v3148_v39 = vadd.f32 %v3613_v8, %v3075_v62  ;;  %v3572_v44 = vpop.f32.mrf.mxu0  ;;  %v5601_v62 = vld [vmem:[#allocation13_spill] sm:$0xff] }
 0x951   : > { %v3615_v33 = vpop.f32.mrf.mxu1  ;;  %v3573_v60 = vadd.f32 %v3572_v44, %v3571_v34 }
 0x952   : > { %3200 = vst [vmem:[%s4255_s25 + $0x18] sm:$0xff] %v3190_v40  ;;  %v3181_v42 = vmul.f32 %v5446_v49, %v3148_v39  ;;  %v3616_v0 = vadd.f32 %v3615_v33, %v3614_v61  ;;  %v3574_v28 = vpop.f32.mrf.mxu0 }
 0x953   : > { %v3617_v46 = vpop.f32.mrf.mxu1  ;;  %v3083_v17 = vadd.f32 %v3573_v60, %v5440_v6 }
 0x954   : > { %v3191_v55 = vadd.f32 %v3181_v42, %v5596_v18  ;;  %v3151_v43 = vadd.f32 %v3616_v0, %v3078_v45  ;;  %v3575_v21 = vpop.f32.mrf.mxu0 }
 0x955   : > { %v3618_v31 = vpop.f32.mrf.mxu1  ;;  %v3576_v58 = vadd.f32 %v3575_v21, %v3574_v28 }
 0x956   : > { %3201 = vst [vmem:[%s4255_s25 + $0x20] sm:$0xff] %v3191_v55  ;;  %v3182_v3 = vmul.f32 %v5446_v49, %v3151_v43  ;;  %v3619_v59 = vadd.f32 %v3618_v31, %v3617_v46  ;;  %v3577_v47 = vpop.f32.mrf.mxu0 }
 0x957   : > { %v3620_v20 = vpop.f32.mrf.mxu1  ;;  %v3086_v32 = vadd.f32 %v3576_v58, %v5440_v6 }
 0x958   : > { %v3192_v63 = vadd.f32 %v3182_v3, %v5597_v19  ;;  %v3156_v22 = vadd.f32 %v3619_v59, %v3083_v17  ;;  %v3578_v56 = vpop.f32.mrf.mxu0 }
 0x959   : > { %v3621_v12 = vpop.f32.mrf.mxu1  ;;  %v3579_v48 = vadd.f32 %v3578_v56, %v3577_v47 }
 0x95a   : > { %3202 = vst [vmem:[%s4255_s25 + $0x28] sm:$0xff] %v3192_v63  ;;  %v3183_v23 = vmul.f32 %v5446_v49, %v3156_v22  ;;  %v3622_v52 = vadd.f32 %v3621_v12, %v3620_v20  ;;  %v3580_v11 = vpop.f32.mrf.mxu0 }
 0x95b   : > { %v3623_v1 = vpop.f32.mrf.mxu1  ;;  %v3091_v27 = vadd.f32 %v3579_v48, %v5440_v6 }
 0x95c   : > { %v3193_v26 = vadd.f32 %v3183_v23, %v5598_v25  ;;  %v3159_v53 = vadd.f32 %v3622_v52, %v3086_v32  ;;  %v3581_v29 = vpop.f32.mrf.mxu0 }
 0x95d   : > { %v3624_v37 = vpop.f32.mrf.mxu1  ;;  %v3582_v2 = vadd.f32 %v3581_v29, %v3580_v11 }
 0x95e   : > { %3203 = vst [vmem:[%s4255_s25 + $0x30] sm:$0xff] %v3193_v26  ;;  %v3184_v41 = vmul.f32 %v5446_v49, %v3159_v53  ;;  %v3625_v9 = vadd.f32 %v3624_v37, %v3623_v1 }
 0x95f   : > { %v3626_v36 = vpop.f32.mrf.mxu1  ;;  %v3094_v7 = vadd.f32 %v3582_v2, %v5440_v6 }
 0x960   : > { %v3194_v4 = vadd.f32 %v3184_v41, %v5599_v15  ;;  %v3164_v57 = vadd.f32 %v3625_v9, %v3091_v27 }
 0x961   : > { %v3627_v38 = vpop.f32.mrf.mxu1 }
 0x962   : > { %3204 = vst [vmem:[%s4255_s25 + $0x38] sm:$0xff] %v3194_v4  ;;  %v3185_v30 = vmul.f32 %v5446_v49, %v3164_v57  ;;  %v3628_v10 = vadd.f32 %v3627_v38, %v3626_v36 }
 0x964   : > { %v3195_v13 = vadd.f32 %v3185_v30, %v5600_v5  ;;  %v3167_v51 = vadd.f32 %v3628_v10, %v3094_v7 }
 0x966   : > { %3205 = vst [vmem:[%s4255_s25 + $0x40] sm:$0xff] %v3195_v13  ;;  %v3186_v35 = vmul.f32 %v5446_v49, %v3167_v51 }
 0x968   : > { %v3196_v24 = vadd.f32 %v3186_v35, %v5601_v62 }
 0x96a   : > { %3206 = vst [vmem:[%s4255_s25 + $0x48] sm:$0xff] %v3196_v24 }
 0x96b PF: > { %s29_s0 = sadd.s32 1, %s4129_s0  }
 0x96c   : > { %p26_p5 = scmp.ge.s32.totalorder %s29_s0, 4  }
 0x96e   :  { %28 = sbr.rel (!%p26_p5) target bundleno = 5 (0x5), region = 151 }

</bundles_post_ra>
